<compile_context>
chip_gen: v7x
topology: tpu7x:2x2x1
jax: 0.10.0
libtpu: 0.0.40
codegen_flags: <defaults>
</compile_context>

<pallas_src>
import functools

import jax
import jax.numpy as jnp
import numpy as np
from jax.experimental import pallas as pl
from jax.experimental.pallas import tpu as pltpu

_PAD = 128  # left/right zero padding (in lanes) of the conv-input scratch


# ----------------------------------------------------------------------------
# Trace-time constants (numpy -> baked into the program, zero runtime cost)
# ----------------------------------------------------------------------------
def _conv_masks(H, W):
    """(9, 1, H*W) validity masks for the 9 taps of a 3x3 'same' conv."""
    m = np.zeros((9, 1, H * W), np.float32)
    t = 0
    for dh in (-1, 0, 1):
        for dw in (-1, 0, 1):
            v = np.zeros((H, W), np.float32)
            v[max(0, -dh):min(H, H - dh), max(0, -dw):min(W, W - dw)] = 1.0
            m[t, 0] = v.reshape(-1)
            t += 1
    return m


def _pool_select(H, W):
    """(H*W, Ho*Wo) 0/1 matrix selecting the (2ho, 2wo) window anchors."""
    Ho, Wo = H // 2, W // 2
    S = np.zeros((H * W, Ho * Wo), np.float32)
    for ho in range(Ho):
        for wo in range(Wo):
            S[(2 * ho) * W + 2 * wo, ho * Wo + wo] = 1.0
    return S


def _upsample_mat(Hc, Wc):
    """(Hc*Wc, 4*Hc*Wc) 0/1 matrix: nearest-neighbour 2x upsample as a matmul."""
    Hf, Wf = 2 * Hc, 2 * Wc
    U = np.zeros((Hc * Wc, Hf * Wf), np.float32)
    for h in range(Hf):
        for w in range(Wf):
            U[(h // 2) * Wc + (w // 2), h * Wf + w] = 1.0
    return U


def _block_rep(C, Np):
    """(C*Np, C): row (c, p) selects channel c."""
    R = np.zeros((C * Np, C), np.float32)
    for c in range(C):
        R[c * Np:(c + 1) * Np, c] = 1.0
    return R


def _pix_mask(C, Np):
    """(C*Np, Np): entry ((c, p), n) = 1 iff p == n."""
    P = np.zeros((C * Np, Np), np.float32)
    eye = np.eye(Np, dtype=np.float32)
    for c in range(C):
        P[c * Np:(c + 1) * Np, :] = eye
    return P


def _wcat(w, cin_pad):
    """(3,3,Cin,Cout) HWIO weight -> (Cout, 9*cin_pad), tap-major, Cin zero-padded."""
    _, _, cin, cout = w.shape
    w9 = jnp.transpose(w, (3, 0, 1, 2)).reshape(cout, 9, cin)
    if cin_pad > cin:
        w9 = jnp.pad(w9, ((0, 0), (0, 0), (0, cin_pad - cin)))
    return w9.reshape(cout, 9 * cin_pad)


def _full(shape):
    nd = len(shape)
    return pl.BlockSpec(shape, lambda b, _nd=nd: (0,) * _nd)


# ----------------------------------------------------------------------------
# Fused forward kernel (one grid step == one batch element)
# ----------------------------------------------------------------------------
def _fwd_kernel(x_ref,
                w1_ref, b1_ref, w2_ref, b2_ref, w3_ref, b3_ref, w4_ref, b4_ref,
                mfull_ref, mhalf_ref, s1_ref, s2_ref, u1_ref, u2_ref,
                fw1_ref, fb1_ref, fw2_ref, fb2_ref,
                repc_ref, repct_ref, pix_ref,
                enc_out_ref, dec_out_ref,
                xp1, tp1, pp1, xp2, tp2, pp2, xp3, tp3, xp4, tp4,
                *, L):
    H = W = L
    Hc = Wc = L // 2
    cv = L // 4
    Np = cv * cv

    def conv3x3(x_val, xpad, taps, masks_ref, wcat_ref, bias_ref,
                hh, ww, cin, cin_pad, act):
        n = hh * ww
        # Stage the input into a zero-padded scratch: the 9 shifted taps become
        # plain static window loads; boundary wraps are zeroed by the masks.
        xpad[...] = jnp.zeros(xpad.shape, jnp.float32)
        xpad[:, _PAD:_PAD + n] = x_val
        taps[...] = jnp.zeros(taps.shape, jnp.float32)
        t = 0
        for dh in (-1, 0, 1):
            for dw in (-1, 0, 1):
                s = dh * ww + dw
                shifted = xpad[:, pl.ds(_PAD + s, n)]                # (cin, n)
                taps[t * cin_pad:t * cin_pad + cin, :] = shifted * masks_ref[t]
                t += 1
        # Single MXU contraction over K = 9 * cin_pad (fused 9-tap matmul).
        out = jnp.dot(wcat_ref[...], taps[...],
                      preferred_element_type=jnp.float32) + bias_ref[...]
        if act == "relu":
            return jnp.maximum(out, 0.0)
        return 1.0 / (1.0 + jnp.exp(-out))                            # sigmoid

    def maxpool2x2(y_val, padbuf, sel_ref, hh, ww):
        n = hh * ww
        padbuf[...] = jnp.zeros(padbuf.shape, jnp.float32)
        padbuf[:, 0:n] = y_val
        m = jnp.maximum(
            jnp.maximum(padbuf[:, pl.ds(0, n)], padbuf[:, pl.ds(1, n)]),
            jnp.maximum(padbuf[:, pl.ds(ww, n)], padbuf[:, pl.ds(ww + 1, n)]))
        # Keep only the even/even window anchors (constant 0/1 selection matmul).
        return jnp.dot(m, sel_ref[...], preferred_element_type=jnp.float32)

    # ------------------------------- encoder --------------------------------
    h = conv3x3(x_ref[...], xp1, tp1, mfull_ref, w1_ref, b1_ref, H, W, 3, 8, "relu")
    h = maxpool2x2(h, pp1, s1_ref, H, W)                      # (16, Hc*Wc)
    h = conv3x3(h, xp2, tp2, mhalf_ref, w2_ref, b2_ref, Hc, Wc, 16, 16, "relu")
    h = maxpool2x2(h, pp2, s2_ref, Hc, Wc)                    # (4, Np)

    # ------------- fc1 (torch NCHW flatten folded into constants) -----------
    ef = jnp.dot(repc_ref[...], h, preferred_element_type=jnp.float32) * pix_ref[...]
    e_part = jnp.dot(fw1_ref[...], ef, preferred_element_type=jnp.float32)   # (128, Np)
    encoded = jnp.sum(e_part, axis=1, keepdims=True) + fb1_ref[...]          # (128, 1)
    enc_out_ref[...] = encoded[None]

    # ------------------- fc2 (+ reshape back to (4, cv, cv)) ----------------
    e_b = jnp.broadcast_to(encoded, (encoded.shape[0], Np))                  # (128, Np)
    m2 = jnp.dot(fw2_ref[...], e_b, preferred_element_type=jnp.float32) + fb2_ref[...]
    d = jnp.dot(repct_ref[...], m2 * pix_ref[...], preferred_element_type=jnp.float32)

    # ------------------------------- decoder --------------------------------
    d = jnp.dot(d, u1_ref[...], preferred_element_type=jnp.float32)          # up 2x
    d = conv3x3(d, xp3, tp3, mhalf_ref, w3_ref, b3_ref, Hc, Wc, 4, 8, "relu")
    d = jnp.dot(d, u2_ref[...], preferred_element_type=jnp.float32)          # up 2x
    d = conv3x3(d, xp4, tp4, mfull_ref, w4_ref, b4_ref, H, W, 16, 16, "sigmoid")
    dec_out_ref[...] = d


# ----------------------------------------------------------------------------
# Wrapper
# ----------------------------------------------------------------------------
def autoencoder_forward(x_nchw, params):
    B, C0, L, _ = x_nchw.shape
    HW = L * L
    Hc = L // 2
    HWc = Hc * Hc
    cv = L // 4
    Np = cv * cv
    f32 = jnp.float32

    # Input layout: NCHW -> (C, B*H*W): pixels on the 128-lane axis.
    x_cn = jnp.transpose(x_nchw, (1, 0, 2, 3)).reshape(C0, B * HW)

    # Trace-time constants (per batch element, since the grid is over batch).
    mfull = _conv_masks(L, L)
    mhalf = _conv_masks(Hc, Hc)
    S1 = _pool_select(L, L)
    S2 = _pool_select(Hc, Hc)
    U1 = _upsample_mat(cv, cv)
    U2 = _upsample_mat(Hc, Hc)
    RepC = _block_rep(4, Np)
    RepCT = np.ascontiguousarray(RepC.T)
    Pix = _pix_mask(4, Np)

    # Parameter repacking (tiny ops, traced once under jit).
    w1c = _wcat(params["w1"], 8)
    w2c = _wcat(params["w2"], 16)
    w3c = _wcat(params["w3"], 8)
    w4c = _wcat(params["w4"], 16)
    b1c = params["b1"].reshape(-1, 1)
    b2c = params["b2"].reshape(-1, 1)
    b3c = params["b3"].reshape(-1, 1)
    b4c = params["b4"].reshape(-1, 1)
    fw1k = params["fw1"].T                    # (128, fc_len)
    fw2k = params["fw2"].T                    # (fc_len, 128)
    fb1k = params["fb1"].reshape(-1, 1)
    fb2k = params["fb2"].reshape(-1, 1)

    consts = [w1c, b1c, w2c, b2c, w3c, b3c, w4c, b4c,
              mfull, mhalf, S1, S2, U1, U2,
              fw1k, fb1k, fw2k, fb2k, RepC, RepCT, Pix]

    in_specs = [pl.BlockSpec((C0, HW), lambda b: (0, b))]
    in_specs += [_full(tuple(c.shape)) for c in consts]

    scratch_shapes = [
        pltpu.VMEM((3, HW + 2 * _PAD), f32),      # xp1 (conv1 padded input)
        pltpu.VMEM((9 * 8, HW), f32),             # tp1 (conv1 taps)
        pltpu.VMEM((16, HW + _PAD), f32),         # pp1 (pool1 padded input)
        pltpu.VMEM((16, HWc + 2 * _PAD), f32),    # xp2
        pltpu.VMEM((9 * 16, HWc), f32),           # tp2
        pltpu.VMEM((4, HWc + _PAD), f32),         # pp2
        pltpu.VMEM((4, HWc + 2 * _PAD), f32),     # xp3
        pltpu.VMEM((9 * 8, HWc), f32),            # tp3
        pltpu.VMEM((16, HW + 2 * _PAD), f32),     # xp4
        pltpu.VMEM((9 * 16, HW), f32),            # tp4
    ]

    enc_out, dec_out = pl.pallas_call(
        functools.partial(_fwd_kernel, L=L),
        out_shape=(jax.ShapeDtypeStruct((B, 128, 1), f32),
                   jax.ShapeDtypeStruct((3, B * HW), f32)),
        grid_spec=pltpu.PrefetchScalarGridSpec(
            num_scalar_prefetch=0,
            grid=(B,),
            in_specs=in_specs,
            out_specs=[pl.BlockSpec((1, 128, 1), lambda b: (b, 0, 0)),
                       pl.BlockSpec((3, HW), lambda b: (0, b))],
            scratch_shapes=scratch_shapes),
        compiler_params=pltpu.CompilerParams(
            dimension_semantics=("parallel",),
            vmem_limit_bytes=32 * 1024 * 1024),
    )(x_cn, *consts)

    encoded = enc_out[:, :, 0]                                    # (B, 128)
    decoded = dec_out.reshape(3, B, L, L).transpose(1, 0, 2, 3)   # NCHW
    return encoded, decoded


# ----------------------------------------------------------------------------
# Parameters + pure-JAX reference (correctness check only)
# ----------------------------------------------------------------------------
def init_params(key, length):
    cv = length // 4
    fc_len = 4 * cv * cv

    def conv_p(k, cin, cout):
        k1, k2 = jax.random.split(k)
        bound = 1.0 / jnp.sqrt(cin * 9.0)
        w = jax.random.uniform(k1, (3, 3, cin, cout), jnp.float32, -bound, bound)
        b = jax.random.uniform(k2, (cout,), jnp.float32, -bound, bound)
        return w, b

    def lin_p(k, din, dout):
        k1, k2 = jax.random.split(k)
        bound = 1.0 / jnp.sqrt(float(din))
        w = jax.random.uniform(k1, (din, dout), jnp.float32, -bound, bound)
        b = jax.random.uniform(k2, (dout,), jnp.float32, -bound, bound)
        return w, b

    keys = jax.random.split(key, 6)
    p = {}
    p["w1"], p["b1"] = conv_p(keys[0], 3, 16)
    p["w2"], p["b2"] = conv_p(keys[1], 16, 4)
    p["w3"], p["b3"] = conv_p(keys[2], 4, 16)
    p["w4"], p["b4"] = conv_p(keys[3], 16, 3)
    p["fw1"], p["fb1"] = lin_p(keys[4], fc_len, 128)
    p["fw2"], p["fb2"] = lin_p(keys[5], 128, fc_len)
    return p


def ref_forward(x_nchw, params):
    def conv_ref(x, w, b):  # x NHWC, w HWIO
        y = jax.lax.conv_general_dilated(
            x, w, window_strides=(1, 1), padding="SAME",
            dimension_numbers=("NHWC", "HWIO", "NHWC"))
        return y + b.reshape(1, 1, 1, -1)

    def pool_ref(x):
        return jax.lax.reduce_window(x, -jnp.inf, jax.lax.max,
                                     (1, 2, 2, 1), (1, 2, 2, 1), "VALID")

    B, _, L, _ = x_nchw.shape
    cv = L // 4
    fc_len = 4 * cv * cv
    x = jnp.transpose(x_nchw, (0, 2, 3, 1))
    h = pool_ref(jax.nn.relu(conv_ref(x, params["w1"], params["b1"])))
    h = pool_ref(jax.nn.relu(conv_ref(h, params["w2"], params["b2"])))
    enc_flat = jnp.transpose(h, (0, 3, 1, 2)).reshape(B, fc_len)
    encoded = enc_flat @ params["fw1"] + params["fb1"]
    dec = encoded @ params["fw2"] + params["fb2"]
    d = jnp.transpose(dec.reshape(B, 4, cv, cv), (0, 2, 3, 1))
    d = jnp.repeat(jnp.repeat(d, 2, axis=1), 2, axis=2)
    d = jax.nn.relu(conv_ref(d, params["w3"], params["b3"]))
    d = jnp.repeat(jnp.repeat(d, 2, axis=1), 2, axis=2)
    d = jax.nn.sigmoid(conv_ref(d, params["w4"], params["b4"]))
    return encoded, jnp.transpose(d, (0, 3, 1, 2))


# ----------------------------------------------------------------------------
if __name__ == "__main__":
    LENGTH = 16
    BATCH = 2

    key = jax.random.PRNGKey(0)
    k_x, k_p = jax.random.split(key)
    x = jax.random.uniform(k_x, (BATCH, 3, LENGTH, LENGTH), jnp.float32)  # NCHW
    params = init_params(k_p, LENGTH)

    fwd = jax.jit(autoencoder_forward)
    encoded, decoded = fwd(x, params)
    jax.block_until_ready((encoded, decoded))

    assert encoded.shape == (BATCH, 128)
    assert decoded.shape == (BATCH, 3, LENGTH, LENGTH)

    enc_ref, dec_ref = ref_forward(x, params)
    assert jnp.allclose(encoded, enc_ref, rtol=1e-4, atol=1e-4), "encoded mismatch"
    assert jnp.allclose(decoded, dec_ref, rtol=1e-4, atol=1e-4), "decoded mismatch"

    print("KERNEL_OK")
</pallas_src>

<mosaic_0001>
module attributes {stable_mosaic.version = 11 : i64} {
  func.func @_fwd_kernel(%arg0: i32, %arg1: memref<3x256xf32, #tpu.memory_space<vmem>>, %arg2: memref<16x72xf32, #tpu.memory_space<vmem>>, %arg3: memref<16x1xf32, #tpu.memory_space<vmem>>, %arg4: memref<4x144xf32, #tpu.memory_space<vmem>>, %arg5: memref<4x1xf32, #tpu.memory_space<vmem>>, %arg6: memref<16x72xf32, #tpu.memory_space<vmem>>, %arg7: memref<16x1xf32, #tpu.memory_space<vmem>>, %arg8: memref<3x144xf32, #tpu.memory_space<vmem>>, %arg9: memref<3x1xf32, #tpu.memory_space<vmem>>, %arg10: memref<9x1x256xf32, #tpu.memory_space<vmem>>, %arg11: memref<9x1x64xf32, #tpu.memory_space<vmem>>, %arg12: memref<256x64xf32, #tpu.memory_space<vmem>>, %arg13: memref<64x16xf32, #tpu.memory_space<vmem>>, %arg14: memref<16x64xf32, #tpu.memory_space<vmem>>, %arg15: memref<64x256xf32, #tpu.memory_space<vmem>>, %arg16: memref<128x64xf32, #tpu.memory_space<vmem>>, %arg17: memref<128x1xf32, #tpu.memory_space<vmem>>, %arg18: memref<64x128xf32, #tpu.memory_space<vmem>>, %arg19: memref<64x1xf32, #tpu.memory_space<vmem>>, %arg20: memref<64x4xf32, #tpu.memory_space<vmem>>, %arg21: memref<4x64xf32, #tpu.memory_space<vmem>>, %arg22: memref<64x16xf32, #tpu.memory_space<vmem>>, %arg23: memref<1x128x1xf32, #tpu.memory_space<vmem>>, %arg24: memref<3x256xf32, #tpu.memory_space<vmem>>, %arg25: memref<3x512xf32, #tpu.memory_space<vmem>>, %arg26: memref<72x256xf32, #tpu.memory_space<vmem>>, %arg27: memref<16x384xf32, #tpu.memory_space<vmem>>, %arg28: memref<16x320xf32, #tpu.memory_space<vmem>>, %arg29: memref<144x64xf32, #tpu.memory_space<vmem>>, %arg30: memref<4x192xf32, #tpu.memory_space<vmem>>, %arg31: memref<4x320xf32, #tpu.memory_space<vmem>>, %arg32: memref<72x64xf32, #tpu.memory_space<vmem>>, %arg33: memref<16x512xf32, #tpu.memory_space<vmem>>, %arg34: memref<144x256xf32, #tpu.memory_space<vmem>>) attributes {dimension_semantics = [#tpu.dimension_semantics<parallel>], iteration_bounds = array<i64: 2>, scalar_prefetch = 0 : i64, scratch_operands = 10 : i64, tpu.core_type = #tpu.core_type<tc>, window_params = [{transform_indices = @transform_0, window_bounds = array<i64: 3, 256>}, {pipeline_mode = #tpu.pipeline_mode<synchronous>, transform_indices = @transform_1, window_bounds = array<i64: 16, 72>}, {pipeline_mode = #tpu.pipeline_mode<synchronous>, transform_indices = @transform_2, window_bounds = array<i64: 16, 1>}, {pipeline_mode = #tpu.pipeline_mode<synchronous>, transform_indices = @transform_3, window_bounds = array<i64: 4, 144>}, {pipeline_mode = #tpu.pipeline_mode<synchronous>, transform_indices = @transform_4, window_bounds = array<i64: 4, 1>}, {pipeline_mode = #tpu.pipeline_mode<synchronous>, transform_indices = @transform_5, window_bounds = array<i64: 16, 72>}, {pipeline_mode = #tpu.pipeline_mode<synchronous>, transform_indices = @transform_6, window_bounds = array<i64: 16, 1>}, {pipeline_mode = #tpu.pipeline_mode<synchronous>, transform_indices = @transform_7, window_bounds = array<i64: 3, 144>}, {pipeline_mode = #tpu.pipeline_mode<synchronous>, transform_indices = @transform_8, window_bounds = array<i64: 3, 1>}, {pipeline_mode = #tpu.pipeline_mode<synchronous>, transform_indices = @transform_9, window_bounds = array<i64: 9, 1, 256>}, {pipeline_mode = #tpu.pipeline_mode<synchronous>, transform_indices = @transform_10, window_bounds = array<i64: 9, 1, 64>}, {pipeline_mode = #tpu.pipeline_mode<synchronous>, transform_indices = @transform_11, window_bounds = array<i64: 256, 64>}, {pipeline_mode = #tpu.pipeline_mode<synchronous>, transform_indices = @transform_12, window_bounds = array<i64: 64, 16>}, {pipeline_mode = #tpu.pipeline_mode<synchronous>, transform_indices = @transform_13, window_bounds = array<i64: 16, 64>}, {pipeline_mode = #tpu.pipeline_mode<synchronous>, transform_indices = @transform_14, window_bounds = array<i64: 64, 256>}, {pipeline_mode = #tpu.pipeline_mode<synchronous>, transform_indices = @transform_15, window_bounds = array<i64: 128, 64>}, {pipeline_mode = #tpu.pipeline_mode<synchronous>, transform_indices = @transform_16, window_bounds = array<i64: 128, 1>}, {pipeline_mode = #tpu.pipeline_mode<synchronous>, transform_indices = @transform_17, window_bounds = array<i64: 64, 128>}, {pipeline_mode = #tpu.pipeline_mode<synchronous>, transform_indices = @transform_18, window_bounds = array<i64: 64, 1>}, {pipeline_mode = #tpu.pipeline_mode<synchronous>, transform_indices = @transform_19, window_bounds = array<i64: 64, 4>}, {pipeline_mode = #tpu.pipeline_mode<synchronous>, transform_indices = @transform_20, window_bounds = array<i64: 4, 64>}, {pipeline_mode = #tpu.pipeline_mode<synchronous>, transform_indices = @transform_21, window_bounds = array<i64: 64, 16>}, {transform_indices = @transform_22, window_bounds = array<i64: 1, 128, 1>}, {transform_indices = @transform_23, window_bounds = array<i64: 3, 256>}]} {
    %c0 = arith.constant 0 : index
    %c0_0 = arith.constant 0 : index
    %0 = vector.load %arg1[%c0, %c0_0] : memref<3x256xf32, #tpu.memory_space<vmem>>, vector<3x256xf32>
    %cst = arith.constant 0.000000e+00 : f32
    %1 = vector.broadcast %cst : f32 to vector<3x512xf32>
    %c0_1 = arith.constant 0 : index
    %c0_2 = arith.constant 0 : index
    %2 = vector.load %arg25[%c0_1, %c0_2] : memref<3x512xf32, #tpu.memory_space<vmem>>, vector<3x512xf32>
    tpu.vector_store %arg25[%c0_1, %c0_2], %1 {strides = array<i32>} : memref<3x512xf32, #tpu.memory_space<vmem>>, vector<3x512xf32>,
    %c0_3 = arith.constant 0 : index
    %c128 = arith.constant 128 : index
    %3 = vector.load %arg25[%c0_3, %c128] : memref<3x512xf32, #tpu.memory_space<vmem>>, vector<3x256xf32>
    tpu.vector_store %arg25[%c0_3, %c128], %0 {strides = array<i32>} : memref<3x512xf32, #tpu.memory_space<vmem>>, vector<3x256xf32>,
    %cst_4 = arith.constant 0.000000e+00 : f32
    %4 = vector.broadcast %cst_4 : f32 to vector<72x256xf32>
    %c0_5 = arith.constant 0 : index
    %c0_6 = arith.constant 0 : index
    %5 = vector.load %arg26[%c0_5, %c0_6] : memref<72x256xf32, #tpu.memory_space<vmem>>, vector<72x256xf32>
    tpu.vector_store %arg26[%c0_5, %c0_6], %4 {strides = array<i32>} : memref<72x256xf32, #tpu.memory_space<vmem>>, vector<72x256xf32>,
    %c0_7 = arith.constant 0 : index
    %c111 = arith.constant 111 : index
    %6 = vector.load %arg25[%c0_7, %c111] : memref<3x512xf32, #tpu.memory_space<vmem>>, vector<3x256xf32>
    %c0_8 = arith.constant 0 : index
    %c0_9 = arith.constant 0 : index
    %c0_10 = arith.constant 0 : index
    %7 = vector.load %arg10[%c0_8, %c0_9, %c0_10] : memref<9x1x256xf32, #tpu.memory_space<vmem>>, vector<1x1x256xf32>
    %8 = vector.shape_cast %7 : vector<1x1x256xf32> to vector<1x256xf32>
    %9 = vector.broadcast %8 : vector<1x256xf32> to vector<3x256xf32>
    %10 = arith.mulf %6, %9 : vector<3x256xf32>
    %c0_11 = arith.constant 0 : index
    %c0_12 = arith.constant 0 : index
    %11 = vector.load %arg26[%c0_11, %c0_12] : memref<72x256xf32, #tpu.memory_space<vmem>>, vector<3x256xf32>
    tpu.vector_store %arg26[%c0_11, %c0_12], %10 {strides = array<i32>} : memref<72x256xf32, #tpu.memory_space<vmem>>, vector<3x256xf32>,
    %c0_13 = arith.constant 0 : index
    %c112 = arith.constant 112 : index
    %12 = vector.load %arg25[%c0_13, %c112] : memref<3x512xf32, #tpu.memory_space<vmem>>, vector<3x256xf32>
    %c1 = arith.constant 1 : index
    %c0_14 = arith.constant 0 : index
    %c0_15 = arith.constant 0 : index
    %13 = vector.load %arg10[%c1, %c0_14, %c0_15] : memref<9x1x256xf32, #tpu.memory_space<vmem>>, vector<1x1x256xf32>
    %14 = vector.shape_cast %13 : vector<1x1x256xf32> to vector<1x256xf32>
    %15 = vector.broadcast %14 : vector<1x256xf32> to vector<3x256xf32>
    %16 = arith.mulf %12, %15 : vector<3x256xf32>
    %c8 = arith.constant 8 : index
    %c0_16 = arith.constant 0 : index
    %17 = vector.load %arg26[%c8, %c0_16] : memref<72x256xf32, #tpu.memory_space<vmem>>, vector<3x256xf32>
    tpu.vector_store %arg26[%c8, %c0_16], %16 {strides = array<i32>} : memref<72x256xf32, #tpu.memory_space<vmem>>, vector<3x256xf32>,
    %c0_17 = arith.constant 0 : index
    %c113 = arith.constant 113 : index
    %18 = vector.load %arg25[%c0_17, %c113] : memref<3x512xf32, #tpu.memory_space<vmem>>, vector<3x256xf32>
    %c2 = arith.constant 2 : index
    %c0_18 = arith.constant 0 : index
    %c0_19 = arith.constant 0 : index
    %19 = vector.load %arg10[%c2, %c0_18, %c0_19] : memref<9x1x256xf32, #tpu.memory_space<vmem>>, vector<1x1x256xf32>
    %20 = vector.shape_cast %19 : vector<1x1x256xf32> to vector<1x256xf32>
    %21 = vector.broadcast %20 : vector<1x256xf32> to vector<3x256xf32>
    %22 = arith.mulf %18, %21 : vector<3x256xf32>
    %c16 = arith.constant 16 : index
    %c0_20 = arith.constant 0 : index
    %23 = vector.load %arg26[%c16, %c0_20] : memref<72x256xf32, #tpu.memory_space<vmem>>, vector<3x256xf32>
    tpu.vector_store %arg26[%c16, %c0_20], %22 {strides = array<i32>} : memref<72x256xf32, #tpu.memory_space<vmem>>, vector<3x256xf32>,
    %c0_21 = arith.constant 0 : index
    %c127 = arith.constant 127 : index
    %24 = vector.load %arg25[%c0_21, %c127] : memref<3x512xf32, #tpu.memory_space<vmem>>, vector<3x256xf32>
    %c3 = arith.constant 3 : index
    %c0_22 = arith.constant 0 : index
    %c0_23 = arith.constant 0 : index
    %25 = vector.load %arg10[%c3, %c0_22, %c0_23] : memref<9x1x256xf32, #tpu.memory_space<vmem>>, vector<1x1x256xf32>
    %26 = vector.shape_cast %25 : vector<1x1x256xf32> to vector<1x256xf32>
    %27 = vector.broadcast %26 : vector<1x256xf32> to vector<3x256xf32>
    %28 = arith.mulf %24, %27 : vector<3x256xf32>
    %c24 = arith.constant 24 : index
    %c0_24 = arith.constant 0 : index
    %29 = vector.load %arg26[%c24, %c0_24] : memref<72x256xf32, #tpu.memory_space<vmem>>, vector<3x256xf32>
    tpu.vector_store %arg26[%c24, %c0_24], %28 {strides = array<i32>} : memref<72x256xf32, #tpu.memory_space<vmem>>, vector<3x256xf32>,
    %c0_25 = arith.constant 0 : index
    %c128_26 = arith.constant 128 : index
    %30 = vector.load %arg25[%c0_25, %c128_26] : memref<3x512xf32, #tpu.memory_space<vmem>>, vector<3x256xf32>
    %c4 = arith.constant 4 : index
    %c0_27 = arith.constant 0 : index
    %c0_28 = arith.constant 0 : index
    %31 = vector.load %arg10[%c4, %c0_27, %c0_28] : memref<9x1x256xf32, #tpu.memory_space<vmem>>, vector<1x1x256xf32>
    %32 = vector.shape_cast %31 : vector<1x1x256xf32> to vector<1x256xf32>
    %33 = vector.broadcast %32 : vector<1x256xf32> to vector<3x256xf32>
    %34 = arith.mulf %30, %33 : vector<3x256xf32>
    %c32 = arith.constant 32 : index
    %c0_29 = arith.constant 0 : index
    %35 = vector.load %arg26[%c32, %c0_29] : memref<72x256xf32, #tpu.memory_space<vmem>>, vector<3x256xf32>
    tpu.vector_store %arg26[%c32, %c0_29], %34 {strides = array<i32>} : memref<72x256xf32, #tpu.memory_space<vmem>>, vector<3x256xf32>,
    %c0_30 = arith.constant 0 : index
    %c129 = arith.constant 129 : index
    %36 = vector.load %arg25[%c0_30, %c129] : memref<3x512xf32, #tpu.memory_space<vmem>>, vector<3x256xf32>
    %c5 = arith.constant 5 : index
    %c0_31 = arith.constant 0 : index
    %c0_32 = arith.constant 0 : index
    %37 = vector.load %arg10[%c5, %c0_31, %c0_32] : memref<9x1x256xf32, #tpu.memory_space<vmem>>, vector<1x1x256xf32>
    %38 = vector.shape_cast %37 : vector<1x1x256xf32> to vector<1x256xf32>
    %39 = vector.broadcast %38 : vector<1x256xf32> to vector<3x256xf32>
    %40 = arith.mulf %36, %39 : vector<3x256xf32>
    %c40 = arith.constant 40 : index
    %c0_33 = arith.constant 0 : index
    %41 = vector.load %arg26[%c40, %c0_33] : memref<72x256xf32, #tpu.memory_space<vmem>>, vector<3x256xf32>
    tpu.vector_store %arg26[%c40, %c0_33], %40 {strides = array<i32>} : memref<72x256xf32, #tpu.memory_space<vmem>>, vector<3x256xf32>,
    %c0_34 = arith.constant 0 : index
    %c143 = arith.constant 143 : index
    %42 = vector.load %arg25[%c0_34, %c143] : memref<3x512xf32, #tpu.memory_space<vmem>>, vector<3x256xf32>
    %c6 = arith.constant 6 : index
    %c0_35 = arith.constant 0 : index
    %c0_36 = arith.constant 0 : index
    %43 = vector.load %arg10[%c6, %c0_35, %c0_36] : memref<9x1x256xf32, #tpu.memory_space<vmem>>, vector<1x1x256xf32>
    %44 = vector.shape_cast %43 : vector<1x1x256xf32> to vector<1x256xf32>
    %45 = vector.broadcast %44 : vector<1x256xf32> to vector<3x256xf32>
    %46 = arith.mulf %42, %45 : vector<3x256xf32>
    %c48 = arith.constant 48 : index
    %c0_37 = arith.constant 0 : index
    %47 = vector.load %arg26[%c48, %c0_37] : memref<72x256xf32, #tpu.memory_space<vmem>>, vector<3x256xf32>
    tpu.vector_store %arg26[%c48, %c0_37], %46 {strides = array<i32>} : memref<72x256xf32, #tpu.memory_space<vmem>>, vector<3x256xf32>,
    %c0_38 = arith.constant 0 : index
    %c144 = arith.constant 144 : index
    %48 = vector.load %arg25[%c0_38, %c144] : memref<3x512xf32, #tpu.memory_space<vmem>>, vector<3x256xf32>
    %c7 = arith.constant 7 : index
    %c0_39 = arith.constant 0 : index
    %c0_40 = arith.constant 0 : index
    %49 = vector.load %arg10[%c7, %c0_39, %c0_40] : memref<9x1x256xf32, #tpu.memory_space<vmem>>, vector<1x1x256xf32>
    %50 = vector.shape_cast %49 : vector<1x1x256xf32> to vector<1x256xf32>
    %51 = vector.broadcast %50 : vector<1x256xf32> to vector<3x256xf32>
    %52 = arith.mulf %48, %51 : vector<3x256xf32>
    %c56 = arith.constant 56 : index
    %c0_41 = arith.constant 0 : index
    %53 = vector.load %arg26[%c56, %c0_41] : memref<72x256xf32, #tpu.memory_space<vmem>>, vector<3x256xf32>
    tpu.vector_store %arg26[%c56, %c0_41], %52 {strides = array<i32>} : memref<72x256xf32, #tpu.memory_space<vmem>>, vector<3x256xf32>,
    %c0_42 = arith.constant 0 : index
    %c145 = arith.constant 145 : index
    %54 = vector.load %arg25[%c0_42, %c145] : memref<3x512xf32, #tpu.memory_space<vmem>>, vector<3x256xf32>
    %c8_43 = arith.constant 8 : index
    %c0_44 = arith.constant 0 : index
    %c0_45 = arith.constant 0 : index
    %55 = vector.load %arg10[%c8_43, %c0_44, %c0_45] : memref<9x1x256xf32, #tpu.memory_space<vmem>>, vector<1x1x256xf32>
    %56 = vector.shape_cast %55 : vector<1x1x256xf32> to vector<1x256xf32>
    %57 = vector.broadcast %56 : vector<1x256xf32> to vector<3x256xf32>
    %58 = arith.mulf %54, %57 : vector<3x256xf32>
    %c64 = arith.constant 64 : index
    %c0_46 = arith.constant 0 : index
    %59 = vector.load %arg26[%c64, %c0_46] : memref<72x256xf32, #tpu.memory_space<vmem>>, vector<3x256xf32>
    tpu.vector_store %arg26[%c64, %c0_46], %58 {strides = array<i32>} : memref<72x256xf32, #tpu.memory_space<vmem>>, vector<3x256xf32>,
    %c0_47 = arith.constant 0 : index
    %c0_48 = arith.constant 0 : index
    %60 = vector.load %arg2[%c0_47, %c0_48] : memref<16x72xf32, #tpu.memory_space<vmem>>, vector<16x72xf32>
    %c0_49 = arith.constant 0 : index
    %c0_50 = arith.constant 0 : index
    %61 = vector.load %arg26[%c0_49, %c0_50] : memref<72x256xf32, #tpu.memory_space<vmem>>, vector<72x256xf32>
    %cst_51 = arith.constant dense<0.000000e+00> : vector<16x256xf32>
    %62 = tpu.matmul %60, %61, %cst_51 {dimension_numbers = #tpu.dot_dimension_numbers<[1], [0], [0], [1], [0, 0, 1, 1], [], []>} : vector<16x72xf32>, vector<72x256xf32>, vector<16x256xf32> -> vector<16x256xf32>
    %c0_52 = arith.constant 0 : index
    %c0_53 = arith.constant 0 : index
    %63 = vector.load %arg3[%c0_52, %c0_53] : memref<16x1xf32, #tpu.memory_space<vmem>>, vector<16x1xf32>
    %64 = vector.broadcast %63 : vector<16x1xf32> to vector<16x256xf32>
    %65 = arith.addf %62, %64 : vector<16x256xf32>
    %cst_54 = arith.constant 0.000000e+00 : f32
    %66 = vector.broadcast %cst_54 : f32 to vector<16x256xf32>
    %67 = arith.maximumf %65, %66 : vector<16x256xf32>
    %cst_55 = arith.constant 0.000000e+00 : f32
    %68 = vector.broadcast %cst_55 : f32 to vector<16x384xf32>
    %c0_56 = arith.constant 0 : index
    %c0_57 = arith.constant 0 : index
    %69 = vector.load %arg27[%c0_56, %c0_57] : memref<16x384xf32, #tpu.memory_space<vmem>>, vector<16x384xf32>
    tpu.vector_store %arg27[%c0_56, %c0_57], %68 {strides = array<i32>} : memref<16x384xf32, #tpu.memory_space<vmem>>, vector<16x384xf32>,
    %c0_58 = arith.constant 0 : index
    %c0_59 = arith.constant 0 : index
    %70 = vector.load %arg27[%c0_58, %c0_59] : memref<16x384xf32, #tpu.memory_space<vmem>>, vector<16x256xf32>
    tpu.vector_store %arg27[%c0_58, %c0_59], %67 {strides = array<i32>} : memref<16x384xf32, #tpu.memory_space<vmem>>, vector<16x256xf32>,
    %c0_60 = arith.constant 0 : index
    %c0_61 = arith.constant 0 : index
    %71 = vector.load %arg27[%c0_60, %c0_61] : memref<16x384xf32, #tpu.memory_space<vmem>>, vector<16x256xf32>
    %c0_62 = arith.constant 0 : index
    %c1_63 = arith.constant 1 : index
    %72 = vector.load %arg27[%c0_62, %c1_63] : memref<16x384xf32, #tpu.memory_space<vmem>>, vector<16x256xf32>
    %73 = arith.maximumf %71, %72 : vector<16x256xf32>
    %c0_64 = arith.constant 0 : index
    %c16_65 = arith.constant 16 : index
    %74 = vector.load %arg27[%c0_64, %c16_65] : memref<16x384xf32, #tpu.memory_space<vmem>>, vector<16x256xf32>
    %c0_66 = arith.constant 0 : index
    %c17 = arith.constant 17 : index
    %75 = vector.load %arg27[%c0_66, %c17] : memref<16x384xf32, #tpu.memory_space<vmem>>, vector<16x256xf32>
    %76 = arith.maximumf %74, %75 : vector<16x256xf32>
    %77 = arith.maximumf %73, %76 : vector<16x256xf32>
    %c0_67 = arith.constant 0 : index
    %c0_68 = arith.constant 0 : index
    %78 = vector.load %arg12[%c0_67, %c0_68] : memref<256x64xf32, #tpu.memory_space<vmem>>, vector<256x64xf32>
    %cst_69 = arith.constant dense<0.000000e+00> : vector<16x64xf32>
    %79 = tpu.matmul %77, %78, %cst_69 {dimension_numbers = #tpu.dot_dimension_numbers<[1], [0], [0], [1], [0, 0, 1, 1], [], []>} : vector<16x256xf32>, vector<256x64xf32>, vector<16x64xf32> -> vector<16x64xf32>
    %cst_70 = arith.constant 0.000000e+00 : f32
    %80 = vector.broadcast %cst_70 : f32 to vector<16x320xf32>
    %c0_71 = arith.constant 0 : index
    %c0_72 = arith.constant 0 : index
    %81 = vector.load %arg28[%c0_71, %c0_72] : memref<16x320xf32, #tpu.memory_space<vmem>>, vector<16x320xf32>
    tpu.vector_store %arg28[%c0_71, %c0_72], %80 {strides = array<i32>} : memref<16x320xf32, #tpu.memory_space<vmem>>, vector<16x320xf32>,
    %c0_73 = arith.constant 0 : index
    %c128_74 = arith.constant 128 : index
    %82 = vector.load %arg28[%c0_73, %c128_74] : memref<16x320xf32, #tpu.memory_space<vmem>>, vector<16x64xf32>
    tpu.vector_store %arg28[%c0_73, %c128_74], %79 {strides = array<i32>} : memref<16x320xf32, #tpu.memory_space<vmem>>, vector<16x64xf32>,
    %cst_75 = arith.constant 0.000000e+00 : f32
    %83 = vector.broadcast %cst_75 : f32 to vector<144x64xf32>
    %c0_76 = arith.constant 0 : index
    %c0_77 = arith.constant 0 : index
    %84 = vector.load %arg29[%c0_76, %c0_77] : memref<144x64xf32, #tpu.memory_space<vmem>>, vector<144x64xf32>
    tpu.vector_store %arg29[%c0_76, %c0_77], %83 {strides = array<i32>} : memref<144x64xf32, #tpu.memory_space<vmem>>, vector<144x64xf32>,
    %c0_78 = arith.constant 0 : index
    %c119 = arith.constant 119 : index
    %85 = vector.load %arg28[%c0_78, %c119] : memref<16x320xf32, #tpu.memory_space<vmem>>, vector<16x64xf32>
    %c0_79 = arith.constant 0 : index
    %c0_80 = arith.constant 0 : index
    %c0_81 = arith.constant 0 : index
    %86 = vector.load %arg11[%c0_79, %c0_80, %c0_81] : memref<9x1x64xf32, #tpu.memory_space<vmem>>, vector<1x1x64xf32>
    %87 = vector.shape_cast %86 : vector<1x1x64xf32> to vector<1x64xf32>
    %88 = vector.broadcast %87 : vector<1x64xf32> to vector<16x64xf32>
    %89 = arith.mulf %85, %88 : vector<16x64xf32>
    %c0_82 = arith.constant 0 : index
    %c0_83 = arith.constant 0 : index
    %90 = vector.load %arg29[%c0_82, %c0_83] : memref<144x64xf32, #tpu.memory_space<vmem>>, vector<16x64xf32>
    tpu.vector_store %arg29[%c0_82, %c0_83], %89 {strides = array<i32>} : memref<144x64xf32, #tpu.memory_space<vmem>>, vector<16x64xf32>,
    %c0_84 = arith.constant 0 : index
    %c120 = arith.constant 120 : index
    %91 = vector.load %arg28[%c0_84, %c120] : memref<16x320xf32, #tpu.memory_space<vmem>>, vector<16x64xf32>
    %c1_85 = arith.constant 1 : index
    %c0_86 = arith.constant 0 : index
    %c0_87 = arith.constant 0 : index
    %92 = vector.load %arg11[%c1_85, %c0_86, %c0_87] : memref<9x1x64xf32, #tpu.memory_space<vmem>>, vector<1x1x64xf32>
    %93 = vector.shape_cast %92 : vector<1x1x64xf32> to vector<1x64xf32>
    %94 = vector.broadcast %93 : vector<1x64xf32> to vector<16x64xf32>
    %95 = arith.mulf %91, %94 : vector<16x64xf32>
    %c16_88 = arith.constant 16 : index
    %c0_89 = arith.constant 0 : index
    %96 = vector.load %arg29[%c16_88, %c0_89] : memref<144x64xf32, #tpu.memory_space<vmem>>, vector<16x64xf32>
    tpu.vector_store %arg29[%c16_88, %c0_89], %95 {strides = array<i32>} : memref<144x64xf32, #tpu.memory_space<vmem>>, vector<16x64xf32>,
    %c0_90 = arith.constant 0 : index
    %c121 = arith.constant 121 : index
    %97 = vector.load %arg28[%c0_90, %c121] : memref<16x320xf32, #tpu.memory_space<vmem>>, vector<16x64xf32>
    %c2_91 = arith.constant 2 : index
    %c0_92 = arith.constant 0 : index
    %c0_93 = arith.constant 0 : index
    %98 = vector.load %arg11[%c2_91, %c0_92, %c0_93] : memref<9x1x64xf32, #tpu.memory_space<vmem>>, vector<1x1x64xf32>
    %99 = vector.shape_cast %98 : vector<1x1x64xf32> to vector<1x64xf32>
    %100 = vector.broadcast %99 : vector<1x64xf32> to vector<16x64xf32>
    %101 = arith.mulf %97, %100 : vector<16x64xf32>
    %c32_94 = arith.constant 32 : index
    %c0_95 = arith.constant 0 : index
    %102 = vector.load %arg29[%c32_94, %c0_95] : memref<144x64xf32, #tpu.memory_space<vmem>>, vector<16x64xf32>
    tpu.vector_store %arg29[%c32_94, %c0_95], %101 {strides = array<i32>} : memref<144x64xf32, #tpu.memory_space<vmem>>, vector<16x64xf32>,
    %c0_96 = arith.constant 0 : index
    %c127_97 = arith.constant 127 : index
    %103 = vector.load %arg28[%c0_96, %c127_97] : memref<16x320xf32, #tpu.memory_space<vmem>>, vector<16x64xf32>
    %c3_98 = arith.constant 3 : index
    %c0_99 = arith.constant 0 : index
    %c0_100 = arith.constant 0 : index
    %104 = vector.load %arg11[%c3_98, %c0_99, %c0_100] : memref<9x1x64xf32, #tpu.memory_space<vmem>>, vector<1x1x64xf32>
    %105 = vector.shape_cast %104 : vector<1x1x64xf32> to vector<1x64xf32>
    %106 = vector.broadcast %105 : vector<1x64xf32> to vector<16x64xf32>
    %107 = arith.mulf %103, %106 : vector<16x64xf32>
    %c48_101 = arith.constant 48 : index
    %c0_102 = arith.constant 0 : index
    %108 = vector.load %arg29[%c48_101, %c0_102] : memref<144x64xf32, #tpu.memory_space<vmem>>, vector<16x64xf32>
    tpu.vector_store %arg29[%c48_101, %c0_102], %107 {strides = array<i32>} : memref<144x64xf32, #tpu.memory_space<vmem>>, vector<16x64xf32>,
    %c0_103 = arith.constant 0 : index
    %c128_104 = arith.constant 128 : index
    %109 = vector.load %arg28[%c0_103, %c128_104] : memref<16x320xf32, #tpu.memory_space<vmem>>, vector<16x64xf32>
    %c4_105 = arith.constant 4 : index
    %c0_106 = arith.constant 0 : index
    %c0_107 = arith.constant 0 : index
    %110 = vector.load %arg11[%c4_105, %c0_106, %c0_107] : memref<9x1x64xf32, #tpu.memory_space<vmem>>, vector<1x1x64xf32>
    %111 = vector.shape_cast %110 : vector<1x1x64xf32> to vector<1x64xf32>
    %112 = vector.broadcast %111 : vector<1x64xf32> to vector<16x64xf32>
    %113 = arith.mulf %109, %112 : vector<16x64xf32>
    %c64_108 = arith.constant 64 : index
    %c0_109 = arith.constant 0 : index
    %114 = vector.load %arg29[%c64_108, %c0_109] : memref<144x64xf32, #tpu.memory_space<vmem>>, vector<16x64xf32>
    tpu.vector_store %arg29[%c64_108, %c0_109], %113 {strides = array<i32>} : memref<144x64xf32, #tpu.memory_space<vmem>>, vector<16x64xf32>,
    %c0_110 = arith.constant 0 : index
    %c129_111 = arith.constant 129 : index
    %115 = vector.load %arg28[%c0_110, %c129_111] : memref<16x320xf32, #tpu.memory_space<vmem>>, vector<16x64xf32>
    %c5_112 = arith.constant 5 : index
    %c0_113 = arith.constant 0 : index
    %c0_114 = arith.constant 0 : index
    %116 = vector.load %arg11[%c5_112, %c0_113, %c0_114] : memref<9x1x64xf32, #tpu.memory_space<vmem>>, vector<1x1x64xf32>
    %117 = vector.shape_cast %116 : vector<1x1x64xf32> to vector<1x64xf32>
    %118 = vector.broadcast %117 : vector<1x64xf32> to vector<16x64xf32>
    %119 = arith.mulf %115, %118 : vector<16x64xf32>
    %c80 = arith.constant 80 : index
    %c0_115 = arith.constant 0 : index
    %120 = vector.load %arg29[%c80, %c0_115] : memref<144x64xf32, #tpu.memory_space<vmem>>, vector<16x64xf32>
    tpu.vector_store %arg29[%c80, %c0_115], %119 {strides = array<i32>} : memref<144x64xf32, #tpu.memory_space<vmem>>, vector<16x64xf32>,
    %c0_116 = arith.constant 0 : index
    %c135 = arith.constant 135 : index
    %121 = vector.load %arg28[%c0_116, %c135] : memref<16x320xf32, #tpu.memory_space<vmem>>, vector<16x64xf32>
    %c6_117 = arith.constant 6 : index
    %c0_118 = arith.constant 0 : index
    %c0_119 = arith.constant 0 : index
    %122 = vector.load %arg11[%c6_117, %c0_118, %c0_119] : memref<9x1x64xf32, #tpu.memory_space<vmem>>, vector<1x1x64xf32>
    %123 = vector.shape_cast %122 : vector<1x1x64xf32> to vector<1x64xf32>
    %124 = vector.broadcast %123 : vector<1x64xf32> to vector<16x64xf32>
    %125 = arith.mulf %121, %124 : vector<16x64xf32>
    %c96 = arith.constant 96 : index
    %c0_120 = arith.constant 0 : index
    %126 = vector.load %arg29[%c96, %c0_120] : memref<144x64xf32, #tpu.memory_space<vmem>>, vector<16x64xf32>
    tpu.vector_store %arg29[%c96, %c0_120], %125 {strides = array<i32>} : memref<144x64xf32, #tpu.memory_space<vmem>>, vector<16x64xf32>,
    %c0_121 = arith.constant 0 : index
    %c136 = arith.constant 136 : index
    %127 = vector.load %arg28[%c0_121, %c136] : memref<16x320xf32, #tpu.memory_space<vmem>>, vector<16x64xf32>
    %c7_122 = arith.constant 7 : index
    %c0_123 = arith.constant 0 : index
    %c0_124 = arith.constant 0 : index
    %128 = vector.load %arg11[%c7_122, %c0_123, %c0_124] : memref<9x1x64xf32, #tpu.memory_space<vmem>>, vector<1x1x64xf32>
    %129 = vector.shape_cast %128 : vector<1x1x64xf32> to vector<1x64xf32>
    %130 = vector.broadcast %129 : vector<1x64xf32> to vector<16x64xf32>
    %131 = arith.mulf %127, %130 : vector<16x64xf32>
    %c112_125 = arith.constant 112 : index
    %c0_126 = arith.constant 0 : index
    %132 = vector.load %arg29[%c112_125, %c0_126] : memref<144x64xf32, #tpu.memory_space<vmem>>, vector<16x64xf32>
    tpu.vector_store %arg29[%c112_125, %c0_126], %131 {strides = array<i32>} : memref<144x64xf32, #tpu.memory_space<vmem>>, vector<16x64xf32>,
    %c0_127 = arith.constant 0 : index
    %c137 = arith.constant 137 : index
    %133 = vector.load %arg28[%c0_127, %c137] : memref<16x320xf32, #tpu.memory_space<vmem>>, vector<16x64xf32>
    %c8_128 = arith.constant 8 : index
    %c0_129 = arith.constant 0 : index
    %c0_130 = arith.constant 0 : index
    %134 = vector.load %arg11[%c8_128, %c0_129, %c0_130] : memref<9x1x64xf32, #tpu.memory_space<vmem>>, vector<1x1x64xf32>
    %135 = vector.shape_cast %134 : vector<1x1x64xf32> to vector<1x64xf32>
    %136 = vector.broadcast %135 : vector<1x64xf32> to vector<16x64xf32>
    %137 = arith.mulf %133, %136 : vector<16x64xf32>
    %c128_131 = arith.constant 128 : index
    %c0_132 = arith.constant 0 : index
    %138 = vector.load %arg29[%c128_131, %c0_132] : memref<144x64xf32, #tpu.memory_space<vmem>>, vector<16x64xf32>
    tpu.vector_store %arg29[%c128_131, %c0_132], %137 {strides = array<i32>} : memref<144x64xf32, #tpu.memory_space<vmem>>, vector<16x64xf32>,
    %c0_133 = arith.constant 0 : index
    %c0_134 = arith.constant 0 : index
    %139 = vector.load %arg4[%c0_133, %c0_134] : memref<4x144xf32, #tpu.memory_space<vmem>>, vector<4x144xf32>
    %c0_135 = arith.constant 0 : index
    %c0_136 = arith.constant 0 : index
    %140 = vector.load %arg29[%c0_135, %c0_136] : memref<144x64xf32, #tpu.memory_space<vmem>>, vector<144x64xf32>
    %cst_137 = arith.constant dense<0.000000e+00> : vector<4x64xf32>
    %141 = tpu.matmul %139, %140, %cst_137 {dimension_numbers = #tpu.dot_dimension_numbers<[1], [0], [0], [1], [0, 0, 1, 1], [], []>} : vector<4x144xf32>, vector<144x64xf32>, vector<4x64xf32> -> vector<4x64xf32>
    %c0_138 = arith.constant 0 : index
    %c0_139 = arith.constant 0 : index
    %142 = vector.load %arg5[%c0_138, %c0_139] : memref<4x1xf32, #tpu.memory_space<vmem>>, vector<4x1xf32>
    %143 = vector.broadcast %142 : vector<4x1xf32> to vector<4x64xf32>
    %144 = arith.addf %141, %143 : vector<4x64xf32>
    %cst_140 = arith.constant 0.000000e+00 : f32
    %145 = vector.broadcast %cst_140 : f32 to vector<4x64xf32>
    %146 = arith.maximumf %144, %145 : vector<4x64xf32>
    %cst_141 = arith.constant 0.000000e+00 : f32
    %147 = vector.broadcast %cst_141 : f32 to vector<4x192xf32>
    %c0_142 = arith.constant 0 : index
    %c0_143 = arith.constant 0 : index
    %148 = vector.load %arg30[%c0_142, %c0_143] : memref<4x192xf32, #tpu.memory_space<vmem>>, vector<4x192xf32>
    tpu.vector_store %arg30[%c0_142, %c0_143], %147 {strides = array<i32>} : memref<4x192xf32, #tpu.memory_space<vmem>>, vector<4x192xf32>,
    %c0_144 = arith.constant 0 : index
    %c0_145 = arith.constant 0 : index
    %149 = vector.load %arg30[%c0_144, %c0_145] : memref<4x192xf32, #tpu.memory_space<vmem>>, vector<4x64xf32>
    tpu.vector_store %arg30[%c0_144, %c0_145], %146 {strides = array<i32>} : memref<4x192xf32, #tpu.memory_space<vmem>>, vector<4x64xf32>,
    %c0_146 = arith.constant 0 : index
    %c0_147 = arith.constant 0 : index
    %150 = vector.load %arg30[%c0_146, %c0_147] : memref<4x192xf32, #tpu.memory_space<vmem>>, vector<4x64xf32>
    %c0_148 = arith.constant 0 : index
    %c1_149 = arith.constant 1 : index
    %151 = vector.load %arg30[%c0_148, %c1_149] : memref<4x192xf32, #tpu.memory_space<vmem>>, vector<4x64xf32>
    %152 = arith.maximumf %150, %151 : vector<4x64xf32>
    %c0_150 = arith.constant 0 : index
    %c8_151 = arith.constant 8 : index
    %153 = vector.load %arg30[%c0_150, %c8_151] : memref<4x192xf32, #tpu.memory_space<vmem>>, vector<4x64xf32>
    %c0_152 = arith.constant 0 : index
    %c9 = arith.constant 9 : index
    %154 = vector.load %arg30[%c0_152, %c9] : memref<4x192xf32, #tpu.memory_space<vmem>>, vector<4x64xf32>
    %155 = arith.maximumf %153, %154 : vector<4x64xf32>
    %156 = arith.maximumf %152, %155 : vector<4x64xf32>
    %c0_153 = arith.constant 0 : index
    %c0_154 = arith.constant 0 : index
    %157 = vector.load %arg13[%c0_153, %c0_154] : memref<64x16xf32, #tpu.memory_space<vmem>>, vector<64x16xf32>
    %cst_155 = arith.constant dense<0.000000e+00> : vector<4x16xf32>
    %158 = tpu.matmul %156, %157, %cst_155 {dimension_numbers = #tpu.dot_dimension_numbers<[1], [0], [0], [1], [0, 0, 1, 1], [], []>} : vector<4x64xf32>, vector<64x16xf32>, vector<4x16xf32> -> vector<4x16xf32>
    %c0_156 = arith.constant 0 : index
    %c0_157 = arith.constant 0 : index
    %159 = vector.load %arg20[%c0_156, %c0_157] : memref<64x4xf32, #tpu.memory_space<vmem>>, vector<64x4xf32>
    %cst_158 = arith.constant dense<0.000000e+00> : vector<64x16xf32>
    %160 = tpu.matmul %159, %158, %cst_158 {dimension_numbers = #tpu.dot_dimension_numbers<[1], [0], [0], [1], [0, 0, 1, 1], [], []>} : vector<64x4xf32>, vector<4x16xf32>, vector<64x16xf32> -> vector<64x16xf32>
    %c0_159 = arith.constant 0 : index
    %c0_160 = arith.constant 0 : index
    %161 = vector.load %arg22[%c0_159, %c0_160] : memref<64x16xf32, #tpu.memory_space<vmem>>, vector<64x16xf32>
    %162 = arith.mulf %160, %161 : vector<64x16xf32>
    %c0_161 = arith.constant 0 : index
    %c0_162 = arith.constant 0 : index
    %163 = vector.load %arg16[%c0_161, %c0_162] : memref<128x64xf32, #tpu.memory_space<vmem>>, vector<128x64xf32>
    %cst_163 = arith.constant dense<0.000000e+00> : vector<128x16xf32>
    %164 = tpu.matmul %163, %162, %cst_163 {dimension_numbers = #tpu.dot_dimension_numbers<[1], [0], [0], [1], [0, 0, 1, 1], [], []>} : vector<128x64xf32>, vector<64x16xf32>, vector<128x16xf32> -> vector<128x16xf32>
    %cst_164 = arith.constant dense<0.000000e+00> : vector<128xf32>
    %165 = vector.multi_reduction <add>, %164, %cst_164 [1] : vector<128x16xf32> to vector<128xf32>
    %166 = vector.shape_cast %165 : vector<128xf32> to vector<128x1xf32>
    %c0_165 = arith.constant 0 : index
    %c0_166 = arith.constant 0 : index
    %167 = vector.load %arg17[%c0_165, %c0_166] : memref<128x1xf32, #tpu.memory_space<vmem>>, vector<128x1xf32>
    %168 = arith.addf %166, %167 : vector<128x1xf32>
    %169 = vector.shape_cast %168 : vector<128x1xf32> to vector<1x128x1xf32>
    %c0_167 = arith.constant 0 : index
    %c0_168 = arith.constant 0 : index
    %c0_169 = arith.constant 0 : index
    %170 = vector.load %arg23[%c0_167, %c0_168, %c0_169] : memref<1x128x1xf32, #tpu.memory_space<vmem>>, vector<1x128x1xf32>
    tpu.vector_store %arg23[%c0_167, %c0_168, %c0_169], %169 {strides = array<i32>} : memref<1x128x1xf32, #tpu.memory_space<vmem>>, vector<1x128x1xf32>,
    %171 = vector.shape_cast %168 : vector<128x1xf32> to vector<128x1xf32>
    %172 = vector.broadcast %171 : vector<128x1xf32> to vector<128x16xf32>
    %c0_170 = arith.constant 0 : index
    %c0_171 = arith.constant 0 : index
    %173 = vector.load %arg18[%c0_170, %c0_171] : memref<64x128xf32, #tpu.memory_space<vmem>>, vector<64x128xf32>
    %cst_172 = arith.constant dense<0.000000e+00> : vector<64x16xf32>
    %174 = tpu.matmul %173, %172, %cst_172 {dimension_numbers = #tpu.dot_dimension_numbers<[1], [0], [0], [1], [0, 0, 1, 1], [], []>} : vector<64x128xf32>, vector<128x16xf32>, vector<64x16xf32> -> vector<64x16xf32>
    %c0_173 = arith.constant 0 : index
    %c0_174 = arith.constant 0 : index
    %175 = vector.load %arg19[%c0_173, %c0_174] : memref<64x1xf32, #tpu.memory_space<vmem>>, vector<64x1xf32>
    %176 = vector.broadcast %175 : vector<64x1xf32> to vector<64x16xf32>
    %177 = arith.addf %174, %176 : vector<64x16xf32>
    %c0_175 = arith.constant 0 : index
    %c0_176 = arith.constant 0 : index
    %178 = vector.load %arg21[%c0_175, %c0_176] : memref<4x64xf32, #tpu.memory_space<vmem>>, vector<4x64xf32>
    %c0_177 = arith.constant 0 : index
    %c0_178 = arith.constant 0 : index
    %179 = vector.load %arg22[%c0_177, %c0_178] : memref<64x16xf32, #tpu.memory_space<vmem>>, vector<64x16xf32>
    %180 = arith.mulf %177, %179 : vector<64x16xf32>
    %cst_179 = arith.constant dense<0.000000e+00> : vector<4x16xf32>
    %181 = tpu.matmul %178, %180, %cst_179 {dimension_numbers = #tpu.dot_dimension_numbers<[1], [0], [0], [1], [0, 0, 1, 1], [], []>} : vector<4x64xf32>, vector<64x16xf32>, vector<4x16xf32> -> vector<4x16xf32>
    %c0_180 = arith.constant 0 : index
    %c0_181 = arith.constant 0 : index
    %182 = vector.load %arg14[%c0_180, %c0_181] : memref<16x64xf32, #tpu.memory_space<vmem>>, vector<16x64xf32>
    %cst_182 = arith.constant dense<0.000000e+00> : vector<4x64xf32>
    %183 = tpu.matmul %181, %182, %cst_182 {dimension_numbers = #tpu.dot_dimension_numbers<[1], [0], [0], [1], [0, 0, 1, 1], [], []>} : vector<4x16xf32>, vector<16x64xf32>, vector<4x64xf32> -> vector<4x64xf32>
    %cst_183 = arith.constant 0.000000e+00 : f32
    %184 = vector.broadcast %cst_183 : f32 to vector<4x320xf32>
    %c0_184 = arith.constant 0 : index
    %c0_185 = arith.constant 0 : index
    %185 = vector.load %arg31[%c0_184, %c0_185] : memref<4x320xf32, #tpu.memory_space<vmem>>, vector<4x320xf32>
    tpu.vector_store %arg31[%c0_184, %c0_185], %184 {strides = array<i32>} : memref<4x320xf32, #tpu.memory_space<vmem>>, vector<4x320xf32>,
    %c0_186 = arith.constant 0 : index
    %c128_187 = arith.constant 128 : index
    %186 = vector.load %arg31[%c0_186, %c128_187] : memref<4x320xf32, #tpu.memory_space<vmem>>, vector<4x64xf32>
    tpu.vector_store %arg31[%c0_186, %c128_187], %183 {strides = array<i32>} : memref<4x320xf32, #tpu.memory_space<vmem>>, vector<4x64xf32>,
    %cst_188 = arith.constant 0.000000e+00 : f32
    %187 = vector.broadcast %cst_188 : f32 to vector<72x64xf32>
    %c0_189 = arith.constant 0 : index
    %c0_190 = arith.constant 0 : index
    %188 = vector.load %arg32[%c0_189, %c0_190] : memref<72x64xf32, #tpu.memory_space<vmem>>, vector<72x64xf32>
    tpu.vector_store %arg32[%c0_189, %c0_190], %187 {strides = array<i32>} : memref<72x64xf32, #tpu.memory_space<vmem>>, vector<72x64xf32>,
    %c0_191 = arith.constant 0 : index
    %c119_192 = arith.constant 119 : index
    %189 = vector.load %arg31[%c0_191, %c119_192] : memref<4x320xf32, #tpu.memory_space<vmem>>, vector<4x64xf32>
    %c0_193 = arith.constant 0 : index
    %c0_194 = arith.constant 0 : index
    %c0_195 = arith.constant 0 : index
    %190 = vector.load %arg11[%c0_193, %c0_194, %c0_195] : memref<9x1x64xf32, #tpu.memory_space<vmem>>, vector<1x1x64xf32>
    %191 = vector.shape_cast %190 : vector<1x1x64xf32> to vector<1x64xf32>
    %192 = vector.broadcast %191 : vector<1x64xf32> to vector<4x64xf32>
    %193 = arith.mulf %189, %192 : vector<4x64xf32>
    %c0_196 = arith.constant 0 : index
    %c0_197 = arith.constant 0 : index
    %194 = vector.load %arg32[%c0_196, %c0_197] : memref<72x64xf32, #tpu.memory_space<vmem>>, vector<4x64xf32>
    tpu.vector_store %arg32[%c0_196, %c0_197], %193 {strides = array<i32>} : memref<72x64xf32, #tpu.memory_space<vmem>>, vector<4x64xf32>,
    %c0_198 = arith.constant 0 : index
    %c120_199 = arith.constant 120 : index
    %195 = vector.load %arg31[%c0_198, %c120_199] : memref<4x320xf32, #tpu.memory_space<vmem>>, vector<4x64xf32>
    %c1_200 = arith.constant 1 : index
    %c0_201 = arith.constant 0 : index
    %c0_202 = arith.constant 0 : index
    %196 = vector.load %arg11[%c1_200, %c0_201, %c0_202] : memref<9x1x64xf32, #tpu.memory_space<vmem>>, vector<1x1x64xf32>
    %197 = vector.shape_cast %196 : vector<1x1x64xf32> to vector<1x64xf32>
    %198 = vector.broadcast %197 : vector<1x64xf32> to vector<4x64xf32>
    %199 = arith.mulf %195, %198 : vector<4x64xf32>
    %c8_203 = arith.constant 8 : index
    %c0_204 = arith.constant 0 : index
    %200 = vector.load %arg32[%c8_203, %c0_204] : memref<72x64xf32, #tpu.memory_space<vmem>>, vector<4x64xf32>
    tpu.vector_store %arg32[%c8_203, %c0_204], %199 {strides = array<i32>} : memref<72x64xf32, #tpu.memory_space<vmem>>, vector<4x64xf32>,
    %c0_205 = arith.constant 0 : index
    %c121_206 = arith.constant 121 : index
    %201 = vector.load %arg31[%c0_205, %c121_206] : memref<4x320xf32, #tpu.memory_space<vmem>>, vector<4x64xf32>
    %c2_207 = arith.constant 2 : index
    %c0_208 = arith.constant 0 : index
    %c0_209 = arith.constant 0 : index
    %202 = vector.load %arg11[%c2_207, %c0_208, %c0_209] : memref<9x1x64xf32, #tpu.memory_space<vmem>>, vector<1x1x64xf32>
    %203 = vector.shape_cast %202 : vector<1x1x64xf32> to vector<1x64xf32>
    %204 = vector.broadcast %203 : vector<1x64xf32> to vector<4x64xf32>
    %205 = arith.mulf %201, %204 : vector<4x64xf32>
    %c16_210 = arith.constant 16 : index
    %c0_211 = arith.constant 0 : index
    %206 = vector.load %arg32[%c16_210, %c0_211] : memref<72x64xf32, #tpu.memory_space<vmem>>, vector<4x64xf32>
    tpu.vector_store %arg32[%c16_210, %c0_211], %205 {strides = array<i32>} : memref<72x64xf32, #tpu.memory_space<vmem>>, vector<4x64xf32>,
    %c0_212 = arith.constant 0 : index
    %c127_213 = arith.constant 127 : index
    %207 = vector.load %arg31[%c0_212, %c127_213] : memref<4x320xf32, #tpu.memory_space<vmem>>, vector<4x64xf32>
    %c3_214 = arith.constant 3 : index
    %c0_215 = arith.constant 0 : index
    %c0_216 = arith.constant 0 : index
    %208 = vector.load %arg11[%c3_214, %c0_215, %c0_216] : memref<9x1x64xf32, #tpu.memory_space<vmem>>, vector<1x1x64xf32>
    %209 = vector.shape_cast %208 : vector<1x1x64xf32> to vector<1x64xf32>
    %210 = vector.broadcast %209 : vector<1x64xf32> to vector<4x64xf32>
    %211 = arith.mulf %207, %210 : vector<4x64xf32>
    %c24_217 = arith.constant 24 : index
    %c0_218 = arith.constant 0 : index
    %212 = vector.load %arg32[%c24_217, %c0_218] : memref<72x64xf32, #tpu.memory_space<vmem>>, vector<4x64xf32>
    tpu.vector_store %arg32[%c24_217, %c0_218], %211 {strides = array<i32>} : memref<72x64xf32, #tpu.memory_space<vmem>>, vector<4x64xf32>,
    %c0_219 = arith.constant 0 : index
    %c128_220 = arith.constant 128 : index
    %213 = vector.load %arg31[%c0_219, %c128_220] : memref<4x320xf32, #tpu.memory_space<vmem>>, vector<4x64xf32>
    %c4_221 = arith.constant 4 : index
    %c0_222 = arith.constant 0 : index
    %c0_223 = arith.constant 0 : index
    %214 = vector.load %arg11[%c4_221, %c0_222, %c0_223] : memref<9x1x64xf32, #tpu.memory_space<vmem>>, vector<1x1x64xf32>
    %215 = vector.shape_cast %214 : vector<1x1x64xf32> to vector<1x64xf32>
    %216 = vector.broadcast %215 : vector<1x64xf32> to vector<4x64xf32>
    %217 = arith.mulf %213, %216 : vector<4x64xf32>
    %c32_224 = arith.constant 32 : index
    %c0_225 = arith.constant 0 : index
    %218 = vector.load %arg32[%c32_224, %c0_225] : memref<72x64xf32, #tpu.memory_space<vmem>>, vector<4x64xf32>
    tpu.vector_store %arg32[%c32_224, %c0_225], %217 {strides = array<i32>} : memref<72x64xf32, #tpu.memory_space<vmem>>, vector<4x64xf32>,
    %c0_226 = arith.constant 0 : index
    %c129_227 = arith.constant 129 : index
    %219 = vector.load %arg31[%c0_226, %c129_227] : memref<4x320xf32, #tpu.memory_space<vmem>>, vector<4x64xf32>
    %c5_228 = arith.constant 5 : index
    %c0_229 = arith.constant 0 : index
    %c0_230 = arith.constant 0 : index
    %220 = vector.load %arg11[%c5_228, %c0_229, %c0_230] : memref<9x1x64xf32, #tpu.memory_space<vmem>>, vector<1x1x64xf32>
    %221 = vector.shape_cast %220 : vector<1x1x64xf32> to vector<1x64xf32>
    %222 = vector.broadcast %221 : vector<1x64xf32> to vector<4x64xf32>
    %223 = arith.mulf %219, %222 : vector<4x64xf32>
    %c40_231 = arith.constant 40 : index
    %c0_232 = arith.constant 0 : index
    %224 = vector.load %arg32[%c40_231, %c0_232] : memref<72x64xf32, #tpu.memory_space<vmem>>, vector<4x64xf32>
    tpu.vector_store %arg32[%c40_231, %c0_232], %223 {strides = array<i32>} : memref<72x64xf32, #tpu.memory_space<vmem>>, vector<4x64xf32>,
    %c0_233 = arith.constant 0 : index
    %c135_234 = arith.constant 135 : index
    %225 = vector.load %arg31[%c0_233, %c135_234] : memref<4x320xf32, #tpu.memory_space<vmem>>, vector<4x64xf32>
    %c6_235 = arith.constant 6 : index
    %c0_236 = arith.constant 0 : index
    %c0_237 = arith.constant 0 : index
    %226 = vector.load %arg11[%c6_235, %c0_236, %c0_237] : memref<9x1x64xf32, #tpu.memory_space<vmem>>, vector<1x1x64xf32>
    %227 = vector.shape_cast %226 : vector<1x1x64xf32> to vector<1x64xf32>
    %228 = vector.broadcast %227 : vector<1x64xf32> to vector<4x64xf32>
    %229 = arith.mulf %225, %228 : vector<4x64xf32>
    %c48_238 = arith.constant 48 : index
    %c0_239 = arith.constant 0 : index
    %230 = vector.load %arg32[%c48_238, %c0_239] : memref<72x64xf32, #tpu.memory_space<vmem>>, vector<4x64xf32>
    tpu.vector_store %arg32[%c48_238, %c0_239], %229 {strides = array<i32>} : memref<72x64xf32, #tpu.memory_space<vmem>>, vector<4x64xf32>,
    %c0_240 = arith.constant 0 : index
    %c136_241 = arith.constant 136 : index
    %231 = vector.load %arg31[%c0_240, %c136_241] : memref<4x320xf32, #tpu.memory_space<vmem>>, vector<4x64xf32>
    %c7_242 = arith.constant 7 : index
    %c0_243 = arith.constant 0 : index
    %c0_244 = arith.constant 0 : index
    %232 = vector.load %arg11[%c7_242, %c0_243, %c0_244] : memref<9x1x64xf32, #tpu.memory_space<vmem>>, vector<1x1x64xf32>
    %233 = vector.shape_cast %232 : vector<1x1x64xf32> to vector<1x64xf32>
    %234 = vector.broadcast %233 : vector<1x64xf32> to vector<4x64xf32>
    %235 = arith.mulf %231, %234 : vector<4x64xf32>
    %c56_245 = arith.constant 56 : index
    %c0_246 = arith.constant 0 : index
    %236 = vector.load %arg32[%c56_245, %c0_246] : memref<72x64xf32, #tpu.memory_space<vmem>>, vector<4x64xf32>
    tpu.vector_store %arg32[%c56_245, %c0_246], %235 {strides = array<i32>} : memref<72x64xf32, #tpu.memory_space<vmem>>, vector<4x64xf32>,
    %c0_247 = arith.constant 0 : index
    %c137_248 = arith.constant 137 : index
    %237 = vector.load %arg31[%c0_247, %c137_248] : memref<4x320xf32, #tpu.memory_space<vmem>>, vector<4x64xf32>
    %c8_249 = arith.constant 8 : index
    %c0_250 = arith.constant 0 : index
    %c0_251 = arith.constant 0 : index
    %238 = vector.load %arg11[%c8_249, %c0_250, %c0_251] : memref<9x1x64xf32, #tpu.memory_space<vmem>>, vector<1x1x64xf32>
    %239 = vector.shape_cast %238 : vector<1x1x64xf32> to vector<1x64xf32>
    %240 = vector.broadcast %239 : vector<1x64xf32> to vector<4x64xf32>
    %241 = arith.mulf %237, %240 : vector<4x64xf32>
    %c64_252 = arith.constant 64 : index
    %c0_253 = arith.constant 0 : index
    %242 = vector.load %arg32[%c64_252, %c0_253] : memref<72x64xf32, #tpu.memory_space<vmem>>, vector<4x64xf32>
    tpu.vector_store %arg32[%c64_252, %c0_253], %241 {strides = array<i32>} : memref<72x64xf32, #tpu.memory_space<vmem>>, vector<4x64xf32>,
    %c0_254 = arith.constant 0 : index
    %c0_255 = arith.constant 0 : index
    %243 = vector.load %arg6[%c0_254, %c0_255] : memref<16x72xf32, #tpu.memory_space<vmem>>, vector<16x72xf32>
    %c0_256 = arith.constant 0 : index
    %c0_257 = arith.constant 0 : index
    %244 = vector.load %arg32[%c0_256, %c0_257] : memref<72x64xf32, #tpu.memory_space<vmem>>, vector<72x64xf32>
    %cst_258 = arith.constant dense<0.000000e+00> : vector<16x64xf32>
    %245 = tpu.matmul %243, %244, %cst_258 {dimension_numbers = #tpu.dot_dimension_numbers<[1], [0], [0], [1], [0, 0, 1, 1], [], []>} : vector<16x72xf32>, vector<72x64xf32>, vector<16x64xf32> -> vector<16x64xf32>
    %c0_259 = arith.constant 0 : index
    %c0_260 = arith.constant 0 : index
    %246 = vector.load %arg7[%c0_259, %c0_260] : memref<16x1xf32, #tpu.memory_space<vmem>>, vector<16x1xf32>
    %247 = vector.broadcast %246 : vector<16x1xf32> to vector<16x64xf32>
    %248 = arith.addf %245, %247 : vector<16x64xf32>
    %cst_261 = arith.constant 0.000000e+00 : f32
    %249 = vector.broadcast %cst_261 : f32 to vector<16x64xf32>
    %250 = arith.maximumf %248, %249 : vector<16x64xf32>
    %c0_262 = arith.constant 0 : index
    %c0_263 = arith.constant 0 : index
    %251 = vector.load %arg15[%c0_262, %c0_263] : memref<64x256xf32, #tpu.memory_space<vmem>>, vector<64x256xf32>
    %cst_264 = arith.constant dense<0.000000e+00> : vector<16x256xf32>
    %252 = tpu.matmul %250, %251, %cst_264 {dimension_numbers = #tpu.dot_dimension_numbers<[1], [0], [0], [1], [0, 0, 1, 1], [], []>} : vector<16x64xf32>, vector<64x256xf32>, vector<16x256xf32> -> vector<16x256xf32>
    %cst_265 = arith.constant 0.000000e+00 : f32
    %253 = vector.broadcast %cst_265 : f32 to vector<16x512xf32>
    %c0_266 = arith.constant 0 : index
    %c0_267 = arith.constant 0 : index
    %254 = vector.load %arg33[%c0_266, %c0_267] : memref<16x512xf32, #tpu.memory_space<vmem>>, vector<16x512xf32>
    tpu.vector_store %arg33[%c0_266, %c0_267], %253 {strides = array<i32>} : memref<16x512xf32, #tpu.memory_space<vmem>>, vector<16x512xf32>,
    %c0_268 = arith.constant 0 : index
    %c128_269 = arith.constant 128 : index
    %255 = vector.load %arg33[%c0_268, %c128_269] : memref<16x512xf32, #tpu.memory_space<vmem>>, vector<16x256xf32>
    tpu.vector_store %arg33[%c0_268, %c128_269], %252 {strides = array<i32>} : memref<16x512xf32, #tpu.memory_space<vmem>>, vector<16x256xf32>,
    %cst_270 = arith.constant 0.000000e+00 : f32
    %256 = vector.broadcast %cst_270 : f32 to vector<144x256xf32>
    %c0_271 = arith.constant 0 : index
    %c0_272 = arith.constant 0 : index
    %257 = vector.load %arg34[%c0_271, %c0_272] : memref<144x256xf32, #tpu.memory_space<vmem>>, vector<144x256xf32>
    tpu.vector_store %arg34[%c0_271, %c0_272], %256 {strides = array<i32>} : memref<144x256xf32, #tpu.memory_space<vmem>>, vector<144x256xf32>,
    %c0_273 = arith.constant 0 : index
    %c111_274 = arith.constant 111 : index
    %258 = vector.load %arg33[%c0_273, %c111_274] : memref<16x512xf32, #tpu.memory_space<vmem>>, vector<16x256xf32>
    %c0_275 = arith.constant 0 : index
    %c0_276 = arith.constant 0 : index
    %c0_277 = arith.constant 0 : index
    %259 = vector.load %arg10[%c0_275, %c0_276, %c0_277] : memref<9x1x256xf32, #tpu.memory_space<vmem>>, vector<1x1x256xf32>
    %260 = vector.shape_cast %259 : vector<1x1x256xf32> to vector<1x256xf32>
    %261 = vector.broadcast %260 : vector<1x256xf32> to vector<16x256xf32>
    %262 = arith.mulf %258, %261 : vector<16x256xf32>
    %c0_278 = arith.constant 0 : index
    %c0_279 = arith.constant 0 : index
    %263 = vector.load %arg34[%c0_278, %c0_279] : memref<144x256xf32, #tpu.memory_space<vmem>>, vector<16x256xf32>
    tpu.vector_store %arg34[%c0_278, %c0_279], %262 {strides = array<i32>} : memref<144x256xf32, #tpu.memory_space<vmem>>, vector<16x256xf32>,
    %c0_280 = arith.constant 0 : index
    %c112_281 = arith.constant 112 : index
    %264 = vector.load %arg33[%c0_280, %c112_281] : memref<16x512xf32, #tpu.memory_space<vmem>>, vector<16x256xf32>
    %c1_282 = arith.constant 1 : index
    %c0_283 = arith.constant 0 : index
    %c0_284 = arith.constant 0 : index
    %265 = vector.load %arg10[%c1_282, %c0_283, %c0_284] : memref<9x1x256xf32, #tpu.memory_space<vmem>>, vector<1x1x256xf32>
    %266 = vector.shape_cast %265 : vector<1x1x256xf32> to vector<1x256xf32>
    %267 = vector.broadcast %266 : vector<1x256xf32> to vector<16x256xf32>
    %268 = arith.mulf %264, %267 : vector<16x256xf32>
    %c16_285 = arith.constant 16 : index
    %c0_286 = arith.constant 0 : index
    %269 = vector.load %arg34[%c16_285, %c0_286] : memref<144x256xf32, #tpu.memory_space<vmem>>, vector<16x256xf32>
    tpu.vector_store %arg34[%c16_285, %c0_286], %268 {strides = array<i32>} : memref<144x256xf32, #tpu.memory_space<vmem>>, vector<16x256xf32>,
    %c0_287 = arith.constant 0 : index
    %c113_288 = arith.constant 113 : index
    %270 = vector.load %arg33[%c0_287, %c113_288] : memref<16x512xf32, #tpu.memory_space<vmem>>, vector<16x256xf32>
    %c2_289 = arith.constant 2 : index
    %c0_290 = arith.constant 0 : index
    %c0_291 = arith.constant 0 : index
    %271 = vector.load %arg10[%c2_289, %c0_290, %c0_291] : memref<9x1x256xf32, #tpu.memory_space<vmem>>, vector<1x1x256xf32>
    %272 = vector.shape_cast %271 : vector<1x1x256xf32> to vector<1x256xf32>
    %273 = vector.broadcast %272 : vector<1x256xf32> to vector<16x256xf32>
    %274 = arith.mulf %270, %273 : vector<16x256xf32>
    %c32_292 = arith.constant 32 : index
    %c0_293 = arith.constant 0 : index
    %275 = vector.load %arg34[%c32_292, %c0_293] : memref<144x256xf32, #tpu.memory_space<vmem>>, vector<16x256xf32>
    tpu.vector_store %arg34[%c32_292, %c0_293], %274 {strides = array<i32>} : memref<144x256xf32, #tpu.memory_space<vmem>>, vector<16x256xf32>,
    %c0_294 = arith.constant 0 : index
    %c127_295 = arith.constant 127 : index
    %276 = vector.load %arg33[%c0_294, %c127_295] : memref<16x512xf32, #tpu.memory_space<vmem>>, vector<16x256xf32>
    %c3_296 = arith.constant 3 : index
    %c0_297 = arith.constant 0 : index
    %c0_298 = arith.constant 0 : index
    %277 = vector.load %arg10[%c3_296, %c0_297, %c0_298] : memref<9x1x256xf32, #tpu.memory_space<vmem>>, vector<1x1x256xf32>
    %278 = vector.shape_cast %277 : vector<1x1x256xf32> to vector<1x256xf32>
    %279 = vector.broadcast %278 : vector<1x256xf32> to vector<16x256xf32>
    %280 = arith.mulf %276, %279 : vector<16x256xf32>
    %c48_299 = arith.constant 48 : index
    %c0_300 = arith.constant 0 : index
    %281 = vector.load %arg34[%c48_299, %c0_300] : memref<144x256xf32, #tpu.memory_space<vmem>>, vector<16x256xf32>
    tpu.vector_store %arg34[%c48_299, %c0_300], %280 {strides = array<i32>} : memref<144x256xf32, #tpu.memory_space<vmem>>, vector<16x256xf32>,
    %c0_301 = arith.constant 0 : index
    %c128_302 = arith.constant 128 : index
    %282 = vector.load %arg33[%c0_301, %c128_302] : memref<16x512xf32, #tpu.memory_space<vmem>>, vector<16x256xf32>
    %c4_303 = arith.constant 4 : index
    %c0_304 = arith.constant 0 : index
    %c0_305 = arith.constant 0 : index
    %283 = vector.load %arg10[%c4_303, %c0_304, %c0_305] : memref<9x1x256xf32, #tpu.memory_space<vmem>>, vector<1x1x256xf32>
    %284 = vector.shape_cast %283 : vector<1x1x256xf32> to vector<1x256xf32>
    %285 = vector.broadcast %284 : vector<1x256xf32> to vector<16x256xf32>
    %286 = arith.mulf %282, %285 : vector<16x256xf32>
    %c64_306 = arith.constant 64 : index
    %c0_307 = arith.constant 0 : index
    %287 = vector.load %arg34[%c64_306, %c0_307] : memref<144x256xf32, #tpu.memory_space<vmem>>, vector<16x256xf32>
    tpu.vector_store %arg34[%c64_306, %c0_307], %286 {strides = array<i32>} : memref<144x256xf32, #tpu.memory_space<vmem>>, vector<16x256xf32>,
    %c0_308 = arith.constant 0 : index
    %c129_309 = arith.constant 129 : index
    %288 = vector.load %arg33[%c0_308, %c129_309] : memref<16x512xf32, #tpu.memory_space<vmem>>, vector<16x256xf32>
    %c5_310 = arith.constant 5 : index
    %c0_311 = arith.constant 0 : index
    %c0_312 = arith.constant 0 : index
    %289 = vector.load %arg10[%c5_310, %c0_311, %c0_312] : memref<9x1x256xf32, #tpu.memory_space<vmem>>, vector<1x1x256xf32>
    %290 = vector.shape_cast %289 : vector<1x1x256xf32> to vector<1x256xf32>
    %291 = vector.broadcast %290 : vector<1x256xf32> to vector<16x256xf32>
    %292 = arith.mulf %288, %291 : vector<16x256xf32>
    %c80_313 = arith.constant 80 : index
    %c0_314 = arith.constant 0 : index
    %293 = vector.load %arg34[%c80_313, %c0_314] : memref<144x256xf32, #tpu.memory_space<vmem>>, vector<16x256xf32>
    tpu.vector_store %arg34[%c80_313, %c0_314], %292 {strides = array<i32>} : memref<144x256xf32, #tpu.memory_space<vmem>>, vector<16x256xf32>,
    %c0_315 = arith.constant 0 : index
    %c143_316 = arith.constant 143 : index
    %294 = vector.load %arg33[%c0_315, %c143_316] : memref<16x512xf32, #tpu.memory_space<vmem>>, vector<16x256xf32>
    %c6_317 = arith.constant 6 : index
    %c0_318 = arith.constant 0 : index
    %c0_319 = arith.constant 0 : index
    %295 = vector.load %arg10[%c6_317, %c0_318, %c0_319] : memref<9x1x256xf32, #tpu.memory_space<vmem>>, vector<1x1x256xf32>
    %296 = vector.shape_cast %295 : vector<1x1x256xf32> to vector<1x256xf32>
    %297 = vector.broadcast %296 : vector<1x256xf32> to vector<16x256xf32>
    %298 = arith.mulf %294, %297 : vector<16x256xf32>
    %c96_320 = arith.constant 96 : index
    %c0_321 = arith.constant 0 : index
    %299 = vector.load %arg34[%c96_320, %c0_321] : memref<144x256xf32, #tpu.memory_space<vmem>>, vector<16x256xf32>
    tpu.vector_store %arg34[%c96_320, %c0_321], %298 {strides = array<i32>} : memref<144x256xf32, #tpu.memory_space<vmem>>, vector<16x256xf32>,
    %c0_322 = arith.constant 0 : index
    %c144_323 = arith.constant 144 : index
    %300 = vector.load %arg33[%c0_322, %c144_323] : memref<16x512xf32, #tpu.memory_space<vmem>>, vector<16x256xf32>
    %c7_324 = arith.constant 7 : index
    %c0_325 = arith.constant 0 : index
    %c0_326 = arith.constant 0 : index
    %301 = vector.load %arg10[%c7_324, %c0_325, %c0_326] : memref<9x1x256xf32, #tpu.memory_space<vmem>>, vector<1x1x256xf32>
    %302 = vector.shape_cast %301 : vector<1x1x256xf32> to vector<1x256xf32>
    %303 = vector.broadcast %302 : vector<1x256xf32> to vector<16x256xf32>
    %304 = arith.mulf %300, %303 : vector<16x256xf32>
    %c112_327 = arith.constant 112 : index
    %c0_328 = arith.constant 0 : index
    %305 = vector.load %arg34[%c112_327, %c0_328] : memref<144x256xf32, #tpu.memory_space<vmem>>, vector<16x256xf32>
    tpu.vector_store %arg34[%c112_327, %c0_328], %304 {strides = array<i32>} : memref<144x256xf32, #tpu.memory_space<vmem>>, vector<16x256xf32>,
    %c0_329 = arith.constant 0 : index
    %c145_330 = arith.constant 145 : index
    %306 = vector.load %arg33[%c0_329, %c145_330] : memref<16x512xf32, #tpu.memory_space<vmem>>, vector<16x256xf32>
    %c8_331 = arith.constant 8 : index
    %c0_332 = arith.constant 0 : index
    %c0_333 = arith.constant 0 : index
    %307 = vector.load %arg10[%c8_331, %c0_332, %c0_333] : memref<9x1x256xf32, #tpu.memory_space<vmem>>, vector<1x1x256xf32>
    %308 = vector.shape_cast %307 : vector<1x1x256xf32> to vector<1x256xf32>
    %309 = vector.broadcast %308 : vector<1x256xf32> to vector<16x256xf32>
    %310 = arith.mulf %306, %309 : vector<16x256xf32>
    %c128_334 = arith.constant 128 : index
    %c0_335 = arith.constant 0 : index
    %311 = vector.load %arg34[%c128_334, %c0_335] : memref<144x256xf32, #tpu.memory_space<vmem>>, vector<16x256xf32>
    tpu.vector_store %arg34[%c128_334, %c0_335], %310 {strides = array<i32>} : memref<144x256xf32, #tpu.memory_space<vmem>>, vector<16x256xf32>,
    %c0_336 = arith.constant 0 : index
    %c0_337 = arith.constant 0 : index
    %312 = vector.load %arg8[%c0_336, %c0_337] : memref<3x144xf32, #tpu.memory_space<vmem>>, vector<3x144xf32>
    %c0_338 = arith.constant 0 : index
    %c0_339 = arith.constant 0 : index
    %313 = vector.load %arg34[%c0_338, %c0_339] : memref<144x256xf32, #tpu.memory_space<vmem>>, vector<144x256xf32>
    %cst_340 = arith.constant dense<0.000000e+00> : vector<3x256xf32>
    %314 = tpu.matmul %312, %313, %cst_340 {dimension_numbers = #tpu.dot_dimension_numbers<[1], [0], [0], [1], [0, 0, 1, 1], [], []>} : vector<3x144xf32>, vector<144x256xf32>, vector<3x256xf32> -> vector<3x256xf32>
    %c0_341 = arith.constant 0 : index
    %c0_342 = arith.constant 0 : index
    %315 = vector.load %arg9[%c0_341, %c0_342] : memref<3x1xf32, #tpu.memory_space<vmem>>, vector<3x1xf32>
    %316 = vector.broadcast %315 : vector<3x1xf32> to vector<3x256xf32>
    %317 = arith.addf %314, %316 : vector<3x256xf32>
    %cst_343 = arith.constant 0.000000e+00 : f32
    %318 = vector.broadcast %cst_343 : f32 to vector<3x256xf32>
    %319 = arith.subf %318, %317 : vector<3x256xf32>
    %320 = math.exp %319 : vector<3x256xf32>
    %cst_344 = arith.constant 1.000000e+00 : f32
    %321 = vector.broadcast %cst_344 : f32 to vector<3x256xf32>
    %322 = arith.addf %321, %320 : vector<3x256xf32>
    %cst_345 = arith.constant 1.000000e+00 : f32
    %323 = vector.broadcast %cst_345 : f32 to vector<3x256xf32>
    %324 = arith.divf %323, %322 : vector<3x256xf32>
    %c0_346 = arith.constant 0 : index
    %c0_347 = arith.constant 0 : index
    %325 = vector.load %arg24[%c0_346, %c0_347] : memref<3x256xf32, #tpu.memory_space<vmem>>, vector<3x256xf32>
    tpu.vector_store %arg24[%c0_346, %c0_347], %324 {strides = array<i32>} : memref<3x256xf32, #tpu.memory_space<vmem>>, vector<3x256xf32>,
    return
  }
  func.func @transform_0(%arg0: i32) -> (i32, i32) {
    %c0_i32 = arith.constant 0 : i32
    %c0_i32_0 = arith.constant 0 : i32
    return %c0_i32, %arg0 : i32, i32
  }
  func.func @transform_1(%arg0: i32) -> (i32, i32) {
    %c0_i32 = arith.constant 0 : i32
    %c0_i32_0 = arith.constant 0 : i32
    %c0_i32_1 = arith.constant 0 : i32
    return %c0_i32, %c0_i32_0 : i32, i32
  }
  func.func @transform_2(%arg0: i32) -> (i32, i32) {
    %c0_i32 = arith.constant 0 : i32
    %c0_i32_0 = arith.constant 0 : i32
    %c0_i32_1 = arith.constant 0 : i32
    return %c0_i32, %c0_i32_0 : i32, i32
  }
  func.func @transform_3(%arg0: i32) -> (i32, i32) {
    %c0_i32 = arith.constant 0 : i32
    %c0_i32_0 = arith.constant 0 : i32
    %c0_i32_1 = arith.constant 0 : i32
    return %c0_i32, %c0_i32_0 : i32, i32
  }
  func.func @transform_4(%arg0: i32) -> (i32, i32) {
    %c0_i32 = arith.constant 0 : i32
    %c0_i32_0 = arith.constant 0 : i32
    %c0_i32_1 = arith.constant 0 : i32
    return %c0_i32, %c0_i32_0 : i32, i32
  }
  func.func @transform_5(%arg0: i32) -> (i32, i32) {
    %c0_i32 = arith.constant 0 : i32
    %c0_i32_0 = arith.constant 0 : i32
    %c0_i32_1 = arith.constant 0 : i32
    return %c0_i32, %c0_i32_0 : i32, i32
  }
  func.func @transform_6(%arg0: i32) -> (i32, i32) {
    %c0_i32 = arith.constant 0 : i32
    %c0_i32_0 = arith.constant 0 : i32
    %c0_i32_1 = arith.constant 0 : i32
    return %c0_i32, %c0_i32_0 : i32, i32
  }
  func.func @transform_7(%arg0: i32) -> (i32, i32) {
    %c0_i32 = arith.constant 0 : i32
    %c0_i32_0 = arith.constant 0 : i32
    %c0_i32_1 = arith.constant 0 : i32
    return %c0_i32, %c0_i32_0 : i32, i32
  }
  func.func @transform_8(%arg0: i32) -> (i32, i32) {
    %c0_i32 = arith.constant 0 : i32
    %c0_i32_0 = arith.constant 0 : i32
    %c0_i32_1 = arith.constant 0 : i32
    return %c0_i32, %c0_i32_0 : i32, i32
  }
  func.func @transform_9(%arg0: i32) -> (i32, i32, i32) {
    %c0_i32 = arith.constant 0 : i32
    %c0_i32_0 = arith.constant 0 : i32
    %c0_i32_1 = arith.constant 0 : i32
    %c0_i32_2 = arith.constant 0 : i32
    return %c0_i32, %c0_i32_0, %c0_i32_1 : i32, i32, i32
  }
  func.func @transform_10(%arg0: i32) -> (i32, i32, i32) {
    %c0_i32 = arith.constant 0 : i32
    %c0_i32_0 = arith.constant 0 : i32
    %c0_i32_1 = arith.constant 0 : i32
    %c0_i32_2 = arith.constant 0 : i32
    return %c0_i32, %c0_i32_0, %c0_i32_1 : i32, i32, i32
  }
  func.func @transform_11(%arg0: i32) -> (i32, i32) {
    %c0_i32 = arith.constant 0 : i32
    %c0_i32_0 = arith.constant 0 : i32
    %c0_i32_1 = arith.constant 0 : i32
    return %c0_i32, %c0_i32_0 : i32, i32
  }
  func.func @transform_12(%arg0: i32) -> (i32, i32) {
    %c0_i32 = arith.constant 0 : i32
    %c0_i32_0 = arith.constant 0 : i32
    %c0_i32_1 = arith.constant 0 : i32
    return %c0_i32, %c0_i32_0 : i32, i32
  }
  func.func @transform_13(%arg0: i32) -> (i32, i32) {
    %c0_i32 = arith.constant 0 : i32
    %c0_i32_0 = arith.constant 0 : i32
    %c0_i32_1 = arith.constant 0 : i32
    return %c0_i32, %c0_i32_0 : i32, i32
  }
  func.func @transform_14(%arg0: i32) -> (i32, i32) {
    %c0_i32 = arith.constant 0 : i32
    %c0_i32_0 = arith.constant 0 : i32
    %c0_i32_1 = arith.constant 0 : i32
    return %c0_i32, %c0_i32_0 : i32, i32
  }
  func.func @transform_15(%arg0: i32) -> (i32, i32) {
    %c0_i32 = arith.constant 0 : i32
    %c0_i32_0 = arith.constant 0 : i32
    %c0_i32_1 = arith.constant 0 : i32
    return %c0_i32, %c0_i32_0 : i32, i32
  }
  func.func @transform_16(%arg0: i32) -> (i32, i32) {
    %c0_i32 = arith.constant 0 : i32
    %c0_i32_0 = arith.constant 0 : i32
    %c0_i32_1 = arith.constant 0 : i32
    return %c0_i32, %c0_i32_0 : i32, i32
  }
  func.func @transform_17(%arg0: i32) -> (i32, i32) {
    %c0_i32 = arith.constant 0 : i32
    %c0_i32_0 = arith.constant 0 : i32
    %c0_i32_1 = arith.constant 0 : i32
    return %c0_i32, %c0_i32_0 : i32, i32
  }
  func.func @transform_18(%arg0: i32) -> (i32, i32) {
    %c0_i32 = arith.constant 0 : i32
    %c0_i32_0 = arith.constant 0 : i32
    %c0_i32_1 = arith.constant 0 : i32
    return %c0_i32, %c0_i32_0 : i32, i32
  }
  func.func @transform_19(%arg0: i32) -> (i32, i32) {
    %c0_i32 = arith.constant 0 : i32
    %c0_i32_0 = arith.constant 0 : i32
    %c0_i32_1 = arith.constant 0 : i32
    return %c0_i32, %c0_i32_0 : i32, i32
  }
  func.func @transform_20(%arg0: i32) -> (i32, i32) {
    %c0_i32 = arith.constant 0 : i32
    %c0_i32_0 = arith.constant 0 : i32
    %c0_i32_1 = arith.constant 0 : i32
    return %c0_i32, %c0_i32_0 : i32, i32
  }
  func.func @transform_21(%arg0: i32) -> (i32, i32) {
    %c0_i32 = arith.constant 0 : i32
    %c0_i32_0 = arith.constant 0 : i32
    %c0_i32_1 = arith.constant 0 : i32
    return %c0_i32, %c0_i32_0 : i32, i32
  }
  func.func @transform_22(%arg0: i32) -> (i32, i32, i32) {
    %c0_i32 = arith.constant 0 : i32
    %c0_i32_0 = arith.constant 0 : i32
    %c0_i32_1 = arith.constant 0 : i32
    return %arg0, %c0_i32, %c0_i32_0 : i32, i32, i32
  }
  func.func @transform_23(%arg0: i32) -> (i32, i32) {
    %c0_i32 = arith.constant 0 : i32
    %c0_i32_0 = arith.constant 0 : i32
    return %c0_i32, %arg0 : i32, i32
  }
}

</mosaic_0001>

<bundles_post_ra>
// kernel: autoencoder_forward.1
= control target key start
LH: loop header
LB: loop body
LE: loop exit
PB: predicated region body
PF: predicated region fallthrough
CT: control target
= control target key end

     0   :  { %s6054_s0 = inlined_call_operand.vmem [shape: f32[3,512], index: 0, kind: input, shape index: {}]   ;;  %s6055_s1 = inlined_call_operand.vmem [shape: f32[16,72], index: 1, kind: input, shape index: {}]   ;;  %s6056_s2 = inlined_call_operand.vmem [shape: f32[16,1], index: 2, kind: input, shape index: {}]   ;;  %s6057_s3 = inlined_call_operand.vmem [shape: f32[4,144], index: 3, kind: input, shape index: {}]   ;;  %s6058_s4 = inlined_call_operand.vmem [shape: f32[4,1], index: 4, kind: input, shape index: {}]   ;;  %s6059_s5 = inlined_call_operand.vmem [shape: f32[16,72], index: 5, kind: input, shape index: {}]   ;;  %s6060_s6 = inlined_call_operand.vmem [shape: f32[16,1], index: 6, kind: input, shape index: {}]   ;;  %s6061_s7 = inlined_call_operand.vmem [shape: f32[3,144], index: 7, kind: input, shape index: {}]   ;;  %s6062_s8 = inlined_call_operand.vmem [shape: f32[3,1], index: 8, kind: input, shape index: {}]   ;;  %s6063_s9 = inlined_call_operand.vmem [shape: f32[9,1,256], index: 9, kind: input, shape index: {}]   ;;  %s6064_s10 = inlined_call_operand.vmem [shape: f32[9,1,64], index: 10, kind: input, shape index: {}]   ;;  %s6065_s11 = inlined_call_operand.vmem [shape: f32[256,64], index: 11, kind: input, shape index: {}]   ;;  %s6066_s12 = inlined_call_operand.vmem [shape: f32[64,16], index: 12, kind: input, shape index: {}]   ;;  %s6067_s13 = inlined_call_operand.vmem [shape: f32[16,64], index: 13, kind: input, shape index: {}]   ;;  %s6068_s14 = inlined_call_operand.vmem [shape: f32[64,256], index: 14, kind: input, shape index: {}]   ;;  %s6069_s15 = inlined_call_operand.vmem [shape: f32[128,64], index: 15, kind: input, shape index: {}]   ;;  %s6070_s16 = inlined_call_operand.vmem [shape: f32[128,1], index: 16, kind: input, shape index: {}]   ;;  %s6071_s17 = inlined_call_operand.vmem [shape: f32[64,128], index: 17, kind: input, shape index: {}]   ;;  %s6072_s18 = inlined_call_operand.vmem [shape: f32[64,1], index: 18, kind: input, shape index: {}]   ;;  %s6073_s19 = inlined_call_operand.vmem [shape: f32[64,4], index: 19, kind: input, shape index: {}]   ;;  %s6074_s20 = inlined_call_operand.vmem [shape: f32[4,64], index: 20, kind: input, shape index: {}]   ;;  %s6075_s21 = inlined_call_operand.vmem [shape: f32[64,16], index: 21, kind: input, shape index: {}]   ;;  %s6076_s22 = inlined_call_operand.vmem [shape: f32[2,128,1], index: 22, kind: output, shape index: {0}]   ;;  %s6077_s23 = inlined_call_operand.vmem [shape: f32[3,512], index: 23, kind: output, shape index: {1}]  }
   0x1   :  { %6115 = sst [smem:[#allocation13_spill]] %s6054_s0 }
   0x2   :  { %6116 = sst [smem:[#allocation14_spill]] %s6055_s1 }
   0x3   :  { %6117 = sst [smem:[#allocation15_spill]] %s6056_s2 }
   0x4   :  { %6118 = sst [smem:[#allocation16_spill]] %s6057_s3 }
   0x5   :  { %6119 = sst [smem:[#allocation17_spill]] %s6058_s4  ;;  %s4879_s4 = smov 0  }
   0x6   :  { %6120 = sst [smem:[#allocation18_spill]] %s6059_s5 }
   0x7   :  { %6121 = sst [smem:[#allocation19_spill]] %s6060_s6 }
   0x8   :  { %6122 = sst [smem:[#allocation20_spill]] %s6061_s7 }
   0x9   :  { %6123 = sst [smem:[#allocation21_spill]] %s6065_s11 }
   0xa   :  { %6124 = sst [smem:[#allocation22_spill]] %s6066_s12 }
   0xb LB: > { %6125 = sst [smem:[#allocation12_spill]] %s4739_s4  ;;  %s4885_s30 = sadd.s32 4294967295, %s4739_s4   ;;  %s4739_s4 = sphi %s4879_s4, %s34_s4  }
   0xc   : > { %p3898_p0 = scmp.ge.s32.totalorder %s4739_s4, 1  ;;  %p641_p1 = scmp.lt.s32.totalorder %s4739_s4, 3 }
   0xe   : > { %p642_p2 = pnand %p3898_p0, %p641_p1 }
   0xf   : > { %v753_v0 = vlaneseq (!%p642_p2)  ;;  %v3906_v2 = vld [vmem:[%s6063_s9 + $0x4] sm:$0x3] (!%p642_p2)  ;;  %v751_v3 = vld [vmem:[%s6063_s9] sm:$0x3] (!%p642_p2)  ;;  %v3907_v6 = vld [vmem:[%s6063_s9 + $0x6] sm:$0x3] (!%p642_p2) }
  0x10   : > { %645 = sbr.rel (%p642_p2) target bundleno = 4289 (0x10c1), region = 108  ;;  %v3905_v7 = vld [vmem:[%s6063_s9 + $0x2] sm:$0x3] (!%p642_p2)  ;;  %s3899_s7 = sshll.u32 (!%p642_p2), %s4885_s30, 1  ;;  %v3910_v12 = vld [vmem:[%s6063_s9 + $0xc] sm:$0x3] (!%p642_p2) }
  0x11   : > { %v754_v1 = vshrl.u32 (!%p642_p2), %v753_v0, 7  ;;  %p4915_p3 = scmp.lt.s32.totalorder (!%p642_p2), %s3899_s7, 3  ;;  %v4741_v13 = vmov (!%p642_p2), 0.0   ;;  %v3909_v18 = vld [vmem:[%s6063_s9 + $0xa] sm:$0x3] (!%p642_p2)  ;;  %s6089_s25 = smov (!%p642_p2), 113  }
  0x12   : > { %728 = vst [vmem:[#allocation2] sm:$0x77] (!%p642_p2), %v4741_v13  ;;  %729 = vst [vmem:[#allocation2 + $0x8] sm:$0x77] (!%p642_p2), %v4741_v13  ;;  %1175 = vmatprep.mubr.f32.mxu0 (!%p642_p2), %v4741_v13  ;;  %s6091_s5 = smov (!%p642_p2), 111   ;;  %s6127_s3 = sld [smem:[#allocation13_spill]] (!%p642_p2) }
  0x13   : > { %v4895_v4 = vsub.s32 (!%p642_p2), 0, %v754_v1  ;;  %v4897_v5 = vsub.s32 (!%p642_p2), 1, %v754_v1  ;;  %731 = vst [vmem:[#allocation3] sm:$0xff] (!%p642_p2), %v4741_v13  ;;  %732 = vst [vmem:[#allocation3 + $0x8] sm:$0xff] (!%p642_p2), %v4741_v13  ;;  %v3911_v27 = vld [vmem:[%s6063_s9 + $0xe] sm:$0x3] (!%p642_p2) }
  0x14   : > { %733 = vst [vmem:[#allocation3 + $0x10] sm:$0xff] (!%p642_p2), %v4741_v13  ;;  %734 = vst [vmem:[#allocation3 + $0x18] sm:$0xff] (!%p642_p2), %v4741_v13  ;;  %v3912_v28 = vld [vmem:[%s6063_s9 + $0x10] sm:$0x3] (!%p642_p2)  ;;  %s6097_s24 = smov (!%p642_p2), 127   ;;  %s6095_s1 = smov (!%p642_p2), 112  }
  0x15   : > { %v834_v8 = vrot.slane (!%p642_p2), %v3906_v2, %v4895_v4  ;;  %v838_v9 = vrot.slane (!%p642_p2), %v3906_v2, %v4897_v5  ;;  %v756_v10 = vrot.slane (!%p642_p2), %v751_v3, %v4895_v4  ;;  %v760_v11 = vrot.slane (!%p642_p2), %v751_v3, %v4897_v5  ;;  %735 = vst [vmem:[#allocation3 + $0x20] sm:$0xff] (!%p642_p2), %v4741_v13  ;;  %s6087_s26 = smov (!%p642_p2), 15   ;;  %s6093_s6 = smov (!%p642_p2), 1  }
  0x16   : > { %736 = vst [vmem:[#allocation3 + $0x28] sm:$0xff] (!%p642_p2), %v4741_v13  ;;  %737 = vst [vmem:[#allocation3 + $0x30] sm:$0xff] (!%p642_p2), %v4741_v13  ;;  %v873_v14 = vrot.slane (!%p642_p2), %v3907_v6, %v4895_v4  ;;  %v877_v15 = vrot.slane (!%p642_p2), %v3907_v6, %v4897_v5  ;;  %v795_v16 = vrot.slane (!%p642_p2), %v3905_v7, %v4895_v4  ;;  %s6085_s27 = smov (!%p642_p2), 16   ;;  %s6083_s28 = smov (!%p642_p2), 17   ;;  %vm765_vm0 = vcmask (!%p642_p2), 908288  }
  0x17   : > { %738 = vst [vmem:[#allocation3 + $0x38] sm:$0xff] %v4741_v13  ;;  %739 = vst [vmem:[#allocation3 + $0x40] sm:$0xff] %v4741_v13  ;;  %v799_v17 = vrot.slane %v3905_v7, %v4897_v5  ;;  %v839_v19 = vcombine.low %v834_v8, %v838_v9  ;;  %v761_v20 = vcombine.low %v756_v10, %v760_v11  ;;  %s6159_s7 = smov (!%p4915_p3, %s3899_s7), 3  ;;  %vm843_vm1 = vcmask 924672   ;;  %s6130_s11 = sld [smem:[#allocation21_spill]] }
  0x18   : > { %740 = vst [vmem:[#allocation3 + $0x48] sm:$0xff] %v4741_v13  ;;  %741 = vst [vmem:[#allocation3 + $0x50] sm:$0xff] %v4741_v13  ;;  %v878_v21 = vcombine.low %v873_v14, %v877_v15  ;;  %v969_v22 = vrot.slane %v3910_v12, %v4895_v4  ;;  %v973_v23 = vrot.slane %v3910_v12, %v4897_v5  ;;  %s6082_s2 = sshll.u32 %s6159_s7, 2  ;;  %vm804_vm2 = vcmask 916480   ;;  %s6134_s29 = smov 121  }
  0x19   : > { %742 = vst [vmem:[#allocation3 + $0x58] sm:$0xff] %v4741_v13  ;;  %743 = vst [vmem:[#allocation3 + $0x60] sm:$0xff] %v4741_v13  ;;  %840 = vrot.lane.b32.xlu1 %v839_v19, %s6089_s25  ;;  %762 = vrot.lane.b32.xlu0 %v761_v20, %s6091_s5  ;;  %v800_v24 = vcombine.low %v795_v16, %v799_v17  ;;  %v932_v25 = vrot.slane %v3909_v18, %v4895_v4  ;;  %s714_s0 = scalar_lea.vmem %s6127_s3, %s6082_s2  ;;  %v962_v50 = vld [vmem:[#allocation2 + $0xc] sm:$0x7]  ;;  %vm897_vm3 = vcmask 7168   ;;  %vm882_vm4 = vcmask 1039360  }
  0x1a   : > { %744 = vst [vmem:[#allocation3 + $0x68] sm:$0xff] %v4741_v13  ;;  %745 = vst [vmem:[#allocation3 + $0x70] sm:$0xff] %v4741_v13  ;;  %v936_v26 = vrot.slane %v3909_v18, %v4897_v5  ;;  %v727_v29 = vld [vmem:[%s714_s0] sm:$0x77]  ;;  %v974_v30 = vcombine.low %v969_v22, %v973_v23  ;;  %v1006_v31 = vrot.slane %v3911_v27, %v4895_v4  ;;  %v925_v61 = vld [vmem:[#allocation2 + $0xc] sm:$0x7] }
  0x1b   : > { %746 = vst [vmem:[#allocation3 + $0x78] sm:$0xff] %v4741_v13  ;;  %747 = vst [vmem:[#allocation3 + $0x80] sm:$0xff] %v4741_v13  ;;  %v1010_v32 = vrot.slane %v3911_v27, %v4897_v5  ;;  %v1043_v34 = vrot.slane %v3912_v28, %v4895_v4  ;;  %v1047_v35 = vrot.slane %v3912_v28, %v4897_v5  ;;  %v3908_v16 = vld [vmem:[%s6063_s9 + $0x8] sm:$0x3]  ;;  %vm858_vm5 = vcmask 121856   ;;  %s6128_s3 = sld [smem:[#allocation15_spill]] }
  0x1c   : > { %748 = vst [vmem:[#allocation3 + $0x88] sm:$0xff] %v4741_v13  ;;  %1387 = vst [vmem:[#allocation5] sm:$0xff] %v4741_v13  ;;  %v937_v33 = vcombine.low %v932_v25, %v936_v26  ;;  %v911_v17 = vrot.slane %v3908_v16, %v4895_v4  ;;  %v915_v18 = vrot.slane %v3908_v16, %v4897_v5  ;;  %vm819_vm6 = vcmask 130048   ;;  %s6129_s0 = sld [smem:[#allocation14_spill]]  ;;  %s6101_s2 = smov 119  }
  0x1d   : > { %1388 = vst [vmem:[#allocation5 + $0x8] sm:$0xff] %v4741_v13  ;;  %1392 = vst [vmem:[#allocation5 + $0x20] sm:$0xff] %v4741_v13  ;;  %879 = vrot.lane.b32.xlu1 %v878_v21, %s6097_s24  ;;  %801 = vrot.lane.b32.xlu0 %v800_v24, %s6095_s1  ;;  %v1011_v36 = vcombine.low %v1006_v31, %v1010_v32  ;;  %v1048_v37 = vcombine.low %v1043_v34, %v1047_v35  ;;  %vm6107_vm7 = vcmask 138240   ;;  %vm1104_vm8 = vcmask 588800   ;;  %s6139_s12 = sld [smem:[#allocation22_spill]]  ;;  %p716_p4 = scmp.lt.s32.totalorder %s4885_s30, 1 }
  0x1e   : > { %2736 = vst [vmem:[#allocation8] sm:$0xff] %v4741_v13  ;;  %730 = vst [vmem:[#allocation2 + $0x4] sm:$0x77] %v727_v29  ;;  %v916_v23 = vcombine.low %v911_v17, %v915_v18  ;;  %vm1389_vm9 = vcmask 523264   ;;  %vm1443_vm10 = vcmask 72704   ;;  %vm1480_vm11 = vcmask 64512  }
  0x1f   : > { %1396 = vst.msk [vmem:[#allocation6] sm:$0xff] %vm1389_vm9, %v4741_v13  ;;  %1397 = vst.msk [vmem:[#allocation6 + $0x8] sm:$0xff] %vm1389_vm9, %v4741_v13  ;;  %vm1517_vm12 = vcmask 56320   ;;  %vm1770_vm13 = vcmask 1043456   ;;  %vm1771_vm14 = vcmask 523268   ;;  %vm1774_vm15 = vcmask 519168  }
  0x20   : > { %1398 = vst.msk [vmem:[#allocation6 + $0x10] sm:$0xff] %vm1389_vm9, %v4741_v13  ;;  %1399 = vst.msk [vmem:[#allocation6 + $0x18] sm:$0xff] %vm1389_vm9, %v4741_v13  ;;  %s6161_s30 = smov (!%p716_p4, %s4885_s30), 1  ;;  %s6147_s4 = smov 15  }
  0x21   : > { %975 = vrot.lane.b32.xlu1 %v974_v30, %s6087_s26  ;;  %938 = vrot.lane.b32.xlu0 %v937_v33, %s6093_s6  ;;  %1400 = vst.msk [vmem:[#allocation6 + $0x20] sm:$0xff] %vm1389_vm9, %v4741_v13  ;;  %1401 = vst.msk [vmem:[#allocation6 + $0x28] sm:$0xff] %vm1389_vm9, %v4741_v13 }
  0x22   : > { %1402 = vst.msk [vmem:[#allocation6 + $0x30] sm:$0xff] %vm1389_vm9, %v4741_v13  ;;  %1403 = vst.msk [vmem:[#allocation6 + $0x38] sm:$0xff] %vm1389_vm9, %v4741_v13 }
  0x23   : > { %1404 = vst.msk [vmem:[#allocation6 + $0x40] sm:$0xff] %vm1389_vm9, %v4741_v13  ;;  %1405 = vst.msk [vmem:[#allocation6 + $0x48] sm:$0xff] %vm1389_vm9, %v4741_v13 }
  0x24   : > { %1406 = vst.msk [vmem:[#allocation6 + $0x50] sm:$0xff] %vm1389_vm9, %v4741_v13  ;;  %1407 = vst.msk [vmem:[#allocation6 + $0x58] sm:$0xff] %vm1389_vm9, %v4741_v13 }
  0x25   : > { %1012 = vrot.lane.b32.xlu0 %v1011_v36, %s6085_s27  ;;  %1049 = vrot.lane.b32.xlu1 %v1048_v37, %s6083_s28  ;;  %v750_v40 = vld [vmem:[#allocation2 + $0x8] sm:$0x7]  ;;  %v749_v59 = vld [vmem:[#allocation2] sm:$0x77]  ;;  %1408 = vst.msk [vmem:[#allocation6 + $0x60] sm:$0xff] %vm1389_vm9, %v4741_v13  ;;  %1409 = vst.msk [vmem:[#allocation6 + $0x68] sm:$0xff] %vm1389_vm9, %v4741_v13 }
  0x26   : > { %v788_v45 = vld [vmem:[#allocation2 + $0x8] sm:$0x7]  ;;  %v826_v1 = vld [vmem:[#allocation2] sm:$0x77]  ;;  %1410 = vst.msk [vmem:[#allocation6 + $0x70] sm:$0xff] %vm1389_vm9, %v4741_v13  ;;  %1411 = vst.msk [vmem:[#allocation6 + $0x78] sm:$0xff] %vm1389_vm9, %v4741_v13 }
  0x27   : > { %v827_v51 = vld [vmem:[#allocation2 + $0x8] sm:$0x7]  ;;  %v787_v8 = vld [vmem:[#allocation2] sm:$0x77]  ;;  %1412 = vst.msk [vmem:[#allocation6 + $0x80] sm:$0xff] %vm1389_vm9, %v4741_v13  ;;  %1413 = vst.msk [vmem:[#allocation6 + $0x88] sm:$0xff] %vm1389_vm9, %v4741_v13 }
  0x28   : > { %v866_v58 = vld [vmem:[#allocation2 + $0x8] sm:$0x7]  ;;  %v865_v15 = vld [vmem:[#allocation2] sm:$0x77]  ;;  %2739 = vst.msk [vmem:[#allocation9] sm:$0xff] %vm1389_vm9, %v4741_v13  ;;  %2740 = vst.msk [vmem:[#allocation9 + $0x8] sm:$0xff] %vm1389_vm9, %v4741_v13 }
  0x29   : > { %v924_v9 = vld [vmem:[#allocation2 + $0x4] sm:$0x77]  ;;  %2741 = vst.msk [vmem:[#allocation9 + $0x10] sm:$0xff] %vm1389_vm9, %v4741_v13  ;;  %2742 = vst.msk [vmem:[#allocation9 + $0x18] sm:$0xff] %vm1389_vm9, %v4741_v13 }
  0x2a   : > { %v961_v25 = vld [vmem:[#allocation2 + $0x4] sm:$0x77]  ;;  %2743 = vst.msk [vmem:[#allocation9 + $0x20] sm:$0xff] %vm1389_vm9, %v4741_v13  ;;  %2744 = vst.msk [vmem:[#allocation9 + $0x28] sm:$0xff] %vm1389_vm9, %v4741_v13 }
  0x2b   : > { %v904_v26 = vld [vmem:[#allocation2 + $0x4] sm:$0x77]  ;;  %2745 = vst.msk [vmem:[#allocation9 + $0x30] sm:$0xff] %vm1389_vm9, %v4741_v13  ;;  %2746 = vst.msk [vmem:[#allocation9 + $0x38] sm:$0xff] %vm1389_vm9, %v4741_v13 }
  0x2c   : > { %v918_v27 = vmul.f32 %v916_v23, %v904_v26  ;;  %v998_v28 = vld [vmem:[#allocation2 + $0x4] sm:$0x77]  ;;  %2747 = vst.msk [vmem:[#allocation9 + $0x40] sm:$0xff] %vm1389_vm9, %v4741_v13 }
  0x2d   : > { %v1035_v35 = vld [vmem:[#allocation2 + $0x4] sm:$0x77] }
  0x2e   : > { %v920_v33 = vcombine.high %v918_v27, %v918_v27  ;;  %922 = vst [vmem:[#allocation3 + $0x40] sm:$0x7] %v918_v27 }
  0x30   : > { %923 = vst [vmem:[#allocation3 + $0x48] sm:$0x7] %v920_v33 }
  0x8b   : > { %v841_v38 = vpop.permute.xlu1 %840  ;;  %v763_v39 = vpop.permute.xlu0 %762 }
  0x8c   : > { %v764_v41 = vrot.slane %v763_v39, 4  ;;  %v842_v47 = vrot.slane %v841_v38, 4 }
  0x8e   : > { %v770_v42 = vmul.f32 %v764_v41, %v750_v40  ;;  %v848_v56 = vmul.f32 %v842_v47, %v827_v51  ;;  %v766_v57 = vsel %vm765_vm0, %v764_v41, %v763_v39  ;;  %v844_v0 = vsel %vm843_vm1, %v842_v47, %v841_v38 }
  0x8f   : > { %v880_v43 = vpop.permute.xlu1 %879  ;;  %v802_v44 = vpop.permute.xlu0 %801  ;;  %v769_v63 = vmul.f32 %v766_v57, %v749_v59  ;;  %v847_v3 = vmul.f32 %v844_v0, %v826_v1 }
  0x90   : > { %v803_v46 = vrot.slane %v802_v44, 4  ;;  %778 = vrot.lane.b32.xlu1 %v770_v42, %s6083_s28  ;;  %v881_v54 = vrot.slane %v880_v43, 4 }
  0x91   : > { %v773_v21 = vcombine.high %v769_v63, %v769_v63  ;;  %v851_v38 = vcombine.high %v847_v3, %v847_v3 }
  0x92   : > { %v809_v48 = vmul.f32 %v803_v46, %v788_v45  ;;  %v887_v62 = vmul.f32 %v881_v54, %v866_v58  ;;  %v805_v6 = vsel %vm804_vm2, %v803_v46, %v802_v44  ;;  %v883_v14 = vsel %vm882_vm4, %v881_v54, %v880_v43  ;;  %v999_v43 = vld [vmem:[#allocation2 + $0xc] sm:$0x7] }
  0x93   : > { %v976_v49 = vpop.permute.xlu1 %975  ;;  %v939_v53 = vpop.permute.xlu0 %938  ;;  %v808_v10 = vmul.f32 %v805_v6, %v787_v8  ;;  %v886_v20 = vmul.f32 %v883_v14, %v865_v15  ;;  %v1036_v46 = vld [vmem:[#allocation2 + $0xc] sm:$0x7] }
  0x94   : > { %v977_v52 = vrot.slane %v976_v49, 4  ;;  %817 = vrot.lane.b32.xlu1 %v809_v48, %s6085_s27  ;;  %v940_v60 = vrot.slane %v939_v53, 4  ;;  %v1092_v48 = vld [vmem:[%s6128_s3] sm:$0xff] }
  0x95   : > { %v812_v32 = vcombine.high %v808_v10, %v808_v10  ;;  %v890_v41 = vcombine.high %v886_v20, %v886_v20 }
  0x96   : > { %v982_v55 = vmul.f32 %v977_v52, %v962_v50  ;;  %v945_v2 = vmul.f32 %v940_v60, %v925_v61  ;;  %v941_v7 = vsel %vm897_vm3, %v940_v60, %v939_v53  ;;  %v978_v24 = vsel %vm858_vm5, %v977_v52, %v976_v49  ;;  %v1093_v49 = vld [vmem:[%s6128_s3 + $0x8] sm:$0xff]  ;;  %s6136_s3 = smov 119  }
  0x97   : > { %v944_v11 = vmul.f32 %v941_v7, %v924_v9  ;;  %v1013_v12 = vpop.permute.xlu0 %1012  ;;  %v1050_v22 = vpop.permute.xlu1 %1049  ;;  %v981_v31 = vmul.f32 %v978_v24, %v961_v25  ;;  %v4750_v50 = vmov 0  }
  0x98   : > { %990 = vrot.lane.b32.xlu0 %v982_v55, %s6089_s25  ;;  %856 = vrot.lane.b32.xlu1 %v848_v56, %s6087_s26  ;;  %v1014_v19 = vrot.slane %v1013_v12, 4  ;;  %v1051_v30 = vrot.slane %v1050_v22, 4 }
  0x99   : > { %v985_v37 = vcombine.high %v981_v31, %v981_v31  ;;  %v948_v44 = vcombine.high %v944_v11, %v944_v11  ;;  %4529 = vset.pattern.permute.xlu0 %v4750_v50  ;;  %4530 = vset.pattern.permute.xlu1 %v4750_v50 }
  0x9a   : > { %v1015_v29 = vsel %vm819_vm6, %v1014_v19, %v1013_v12  ;;  %v1052_v36 = vsel %vm6107_vm7, %v1051_v30, %v1050_v22  ;;  %v1019_v45 = vmul.f32 %v1014_v19, %v999_v43  ;;  %v1056_v47 = vmul.f32 %v1051_v30, %v1036_v46 }
  0x9b   : > { %v1018_v34 = vmul.f32 %v1015_v29, %v998_v28  ;;  %v1055_v39 = vmul.f32 %v1052_v36, %v1035_v35 }
  0x9c   : > { %895 = vrot.lane.b32.xlu1 %v887_v62, %s6093_s6  ;;  %774 = vrot.lane.b32.xlu0 %v769_v63, %s6083_s28 }
  0x9d   : > { %v1022_v40 = vcombine.high %v1018_v34, %v1018_v34  ;;  %v1059_v42 = vcombine.high %v1055_v39, %v1055_v39 }
  0xa0   : > { %953 = vrot.lane.b32.xlu1 %v945_v2, %s6097_s24  ;;  %852 = vrot.lane.b32.xlu0 %v847_v3, %s6087_s26 }
  0xa4   : > { %813 = vrot.lane.b32.xlu1 %v808_v10, %s6085_s27  ;;  %949 = vrot.lane.b32.xlu0 %v944_v11, %s6097_s24 }
  0xa8   : > { %891 = vrot.lane.b32.xlu1 %v886_v20, %s6093_s6  ;;  %776 = vrot.lane.b32.xlu0 %v773_v21, %s6083_s28  ;;  %s6133_s28 = smov 1  }
  0xac   : > { %986 = vrot.lane.b32.xlu1 %v981_v31, %s6089_s25  ;;  %815 = vrot.lane.b32.xlu0 %v812_v32, %s6085_s27  ;;  %s6135_s27 = smov 120  }
  0xb0   : > { %988 = vrot.lane.b32.xlu1 %v985_v37, %s6089_s25  ;;  %854 = vrot.lane.b32.xlu0 %v851_v38, %s6087_s26  ;;  %v1083_v38 = vld [vmem:[#allocation3 + $0x48] sm:$0xff]  ;;  %s6131_s25 = smov 127   ;;  %s6103_s26 = smov 120  }
  0xb4   : > { %893 = vrot.lane.b32.xlu0 %v890_v41, %s6093_s6  ;;  %1025 = vrot.lane.b32.xlu1 %v1022_v40, %s6095_s1  ;;  %s6132_s6 = smov 112  }
  0xb8   : > { %951 = vrot.lane.b32.xlu0 %v948_v44, %s6097_s24  ;;  %1062 = vrot.lane.b32.xlu1 %v1059_v42, %s6091_s5  ;;  %s6105_s24 = smov 121  }
  0xbc   : > { %1027 = vrot.lane.b32.xlu0 %v1019_v45, %s6095_s1  ;;  %1060 = vrot.lane.b32.xlu1 %v1055_v39, %s6091_s5  ;;  %v1082_v39 = vld [vmem:[#allocation3 + $0x40] sm:$0xff] }
  0xc0   : > { %1023 = vrot.lane.b32.xlu0 %v1018_v34, %s6095_s1  ;;  %1101 = vperm.xlu1 %4530, %v1093_v49   ;;  %s6110_s1 = smov 8  }
  0xc4   : > { %1064 = vrot.lane.b32.xlu0 %v1056_v47, %s6091_s5  ;;  %s6138_s5 = sld [smem:[#allocation16_spill]] }
  0xc8   : > { %1096 = vperm.xlu0 %4529, %v1092_v48  }
 0x102   : > { %v779_v51 = vpop.permute.xlu1 %778 }
 0x106   : > { %v818_v52 = vpop.permute.xlu1 %817 }
 0x10a   : > { %v991_v53 = vpop.permute.xlu0 %990  ;;  %v857_v54 = vpop.permute.xlu1 %856 }
 0x10e   : > { %v896_v55 = vpop.permute.xlu1 %895  ;;  %v775_v56 = vpop.permute.xlu0 %774 }
 0x112   : > { %v954_v57 = vpop.permute.xlu1 %953  ;;  %v853_v58 = vpop.permute.xlu0 %852 }
 0x116   : > { %v814_v59 = vpop.permute.xlu1 %813  ;;  %v950_v60 = vpop.permute.xlu0 %949 }
 0x11a   : > { %v892_v61 = vpop.permute.xlu1 %891  ;;  %v777_v62 = vpop.permute.xlu0 %776 }
 0x11b   : > { %v781_v63 = vsel %vm6107_vm7, %v775_v56, %v777_v62  ;;  %v782_v0 = vsel %vm6107_vm7, %v777_v62, %v779_v51  ;;  %vm1772_vm7 = vmor %vm1771_vm14, %vm1770_vm13  ;;  %vm1876_vm14 = vcmask 31744  }
 0x11c   : > { %785 = vst [vmem:[#allocation3] sm:$0x7] %v781_v63  ;;  %786 = vst [vmem:[#allocation3 + $0x8] sm:$0x7] %v782_v0 }
 0x11e   : > { %v987_v1 = vpop.permute.xlu1 %986  ;;  %v816_v2 = vpop.permute.xlu0 %815 }
 0x11f   : > { %v820_v3 = vsel %vm819_vm6, %v814_v59, %v816_v2  ;;  %v821_v6 = vsel %vm819_vm6, %v816_v2, %v818_v52 }
 0x120   : > { %824 = vst [vmem:[#allocation3 + $0x10] sm:$0x7] %v820_v3  ;;  %825 = vst [vmem:[#allocation3 + $0x18] sm:$0x7] %v821_v6 }
 0x122   : > { %v989_v7 = vpop.permute.xlu1 %988  ;;  %v855_v8 = vpop.permute.xlu0 %854 }
 0x123   : > { %v992_v9 = vsel %vm843_vm1, %v987_v1, %v989_v7  ;;  %v993_v10 = vsel %vm843_vm1, %v989_v7, %v991_v53  ;;  %v859_v11 = vsel %vm858_vm5, %v853_v58, %v855_v8  ;;  %v860_v12 = vsel %vm858_vm5, %v855_v8, %v857_v54  ;;  %v1075_v16 = vld [vmem:[#allocation3 + $0x8] sm:$0xff]  ;;  %v1074_v20 = vld [vmem:[#allocation3] sm:$0xff]  ;;  %v1296_v8 = vld [vmem:[%s6130_s11 + $0x80] sm:$0xff] }
 0x124   : > { %996 = vst [vmem:[#allocation3 + $0x60] sm:$0x7] %v992_v9  ;;  %997 = vst [vmem:[#allocation3 + $0x68] sm:$0x7] %v993_v10  ;;  %v1297_v9 = vld [vmem:[%s6130_s11 + $0x88] sm:$0xff]  ;;  %v1280_v10 = vld [vmem:[%s6130_s11] sm:$0xff] }
 0x125   : > { %863 = vst [vmem:[#allocation3 + $0x20] sm:$0x7] %v859_v11  ;;  %864 = vst [vmem:[#allocation3 + $0x28] sm:$0x7] %v860_v12  ;;  %v4301_v12 = vpack.c.bf16 %v1297_v9, %v1296_v8 }
 0x126   : > { %v894_v14 = vpop.permute.xlu0 %893  ;;  %v1026_v15 = vpop.permute.xlu1 %1025 }
 0x127   : > { %v898_v17 = vsel %vm897_vm3, %v892_v61, %v894_v14  ;;  %v899_v18 = vsel %vm897_vm3, %v894_v14, %v896_v55  ;;  %v1077_v19 = vld [vmem:[#allocation3 + $0x18] sm:$0xff]  ;;  %v1076_v21 = vld [vmem:[#allocation3 + $0x10] sm:$0xff]  ;;  %4302 = vmatprep.subr.bf16.mxu1 %v4301_v12 }
 0x128   : > { %902 = vst [vmem:[#allocation3 + $0x30] sm:$0x7] %v898_v17  ;;  %903 = vst [vmem:[#allocation3 + $0x38] sm:$0x7] %v899_v18  ;;  %v4285_v22 = vpack.c.bf16 %v1077_v19, %v1075_v16  ;;  %v4287_v23 = vpack.c.bf16 %v1076_v21, %v1074_v20  ;;  %v1072_v55 = vld [vmem:[%s6129_s0] sm:$0xff]  ;;  %v1281_v14 = vld [vmem:[%s6130_s11 + $0x8] sm:$0xff] }
 0x129   : > { %v1299_v16 = vld [vmem:[%s6130_s11 + $0x98] sm:$0xff]  ;;  %v4303_v19 = vpack.c.bf16 %v1281_v14, %v1280_v10  ;;  %v1282_v21 = vld [vmem:[%s6130_s11 + $0x10] sm:$0xff] }
 0x12a   : > { %4286 = vmatprep.subr.bf16.mxu0 %v4285_v22  ;;  %v952_v24 = vpop.permute.xlu0 %951  ;;  %v1063_v25 = vpop.permute.xlu1 %1062  ;;  %v1283_v22 = vld [vmem:[%s6130_s11 + $0x18] sm:$0xff] }
 0x12b   : > { %v955_v26 = vsel %vm882_vm4, %v950_v60, %v952_v24  ;;  %v956_v27 = vsel %vm882_vm4, %v952_v24, %v954_v57  ;;  %4288 = vmatpush1.bf16.msra.mxu0 %v4287_v23  ;;  %v1087_v48 = vld [vmem:[#allocation3 + $0x68] sm:$0xff]  ;;  %v1086_v51 = vld [vmem:[#allocation3 + $0x60] sm:$0xff]  ;;  %v1073_v57 = vld [vmem:[%s6129_s0 + $0x8] sm:$0xff]  ;;  %4304 = vmatpush3.bf16.msra.mxu1 %v4303_v19 }
 0x12c   : > { %959 = vst [vmem:[#allocation3 + $0x50] sm:$0x7] %v955_v26  ;;  %960 = vst [vmem:[#allocation3 + $0x58] sm:$0x7] %v956_v27  ;;  %v1079_v30 = vld [vmem:[#allocation3 + $0x28] sm:$0xff]  ;;  %v1078_v34 = vld [vmem:[#allocation3 + $0x20] sm:$0xff]  ;;  %v4307_v27 = vpack.c.bf16 %v1283_v22, %v1282_v21 }
 0x12d   : > { %v1300_v23 = vld [vmem:[%s6130_s11 + $0xa0] sm:$0xff] }
 0x12e   : > { %v1028_v28 = vpop.permute.xlu0 %1027  ;;  %v1061_v29 = vpop.permute.xlu1 %1060 }
 0x12f   : > { %v1030_v31 = vsel %vm804_vm2, %v1026_v15, %v1028_v28  ;;  %v1066_v32 = vsel %vm765_vm0, %v1061_v29, %v1063_v25  ;;  %v1081_v33 = vld [vmem:[#allocation3 + $0x38] sm:$0xff]  ;;  %v1080_v35 = vld [vmem:[#allocation3 + $0x30] sm:$0xff] }
 0x130   : > { %1034 = vst [vmem:[#allocation3 + $0x78] sm:$0x7] %v1030_v31  ;;  %1070 = vst [vmem:[#allocation3 + $0x80] sm:$0x7] %v1066_v32  ;;  %v4289_v36 = vpack.c.bf16 %v1081_v33, %v1079_v30  ;;  %v4291_v37 = vpack.c.bf16 %v1080_v35, %v1078_v34  ;;  %v1284_v29 = vld [vmem:[%s6130_s11 + $0x20] sm:$0xff]  ;;  %v1285_v30 = vld [vmem:[%s6130_s11 + $0x28] sm:$0xff] }
 0x131   : > { %v1302_v31 = vld [vmem:[%s6130_s11 + $0xb0] sm:$0xff]  ;;  %v1303_v32 = vld [vmem:[%s6130_s11 + $0xb8] sm:$0xff]  ;;  %v4311_v33 = vpack.c.bf16 %v1285_v30, %v1284_v29  ;;  %v3915_v29 = vld [vmem:[%s6064_s10] ss:$0 sm:$0xff] }
 0x132   : > { %4290 = vmatprep.subr.bf16.mxu0 %v4289_v36  ;;  %v1024_v40 = vpop.permute.xlu0 %1023  ;;  %v4313_v34 = vpack.c.bf16 %v1303_v32, %v1302_v31  ;;  %v1286_v35 = vld [vmem:[%s6130_s11 + $0x30] sm:$0xff]  ;;  %v1287_v36 = vld [vmem:[%s6130_s11 + $0x38] sm:$0xff]  ;;  %v3929_v30 = vld [vmem:[%s6064_s10 + $0x7] ss:$0 sm:$0xff] }
 0x133   : > { %v1029_v41 = vsel %vm804_vm2, %v1024_v40, %v1026_v15  ;;  %4292 = vmatpush1.bf16.msra.mxu0 %v4291_v37  ;;  %v1085_v42 = vld [vmem:[#allocation3 + $0x58] sm:$0xff]  ;;  %v1084_v43 = vld [vmem:[#allocation3 + $0x50] sm:$0xff]  ;;  %v1298_v15 = vld [vmem:[%s6130_s11 + $0x90] sm:$0xff] }
 0x134   : > { %1033 = vst [vmem:[#allocation3 + $0x70] sm:$0x7] %v1029_v41  ;;  %v4293_v44 = vpack.c.bf16 %v1085_v42, %v1083_v38  ;;  %v4295_v45 = vpack.c.bf16 %v1084_v43, %v1082_v39  ;;  %v4305_v20 = vpack.c.bf16 %v1299_v16, %v1298_v15  ;;  %v1304_v37 = vld [vmem:[%s6130_s11 + $0xc0] sm:$0xff]  ;;  %v1305_v38 = vld [vmem:[%s6130_s11 + $0xc8] sm:$0xff]  ;;  %v4315_v39 = vpack.c.bf16 %v1287_v36, %v1286_v35  ;;  %v1306_v43 = vld [vmem:[%s6130_s11 + $0xd0] sm:$0xff] }
 0x135   : > { %v4317_v40 = vpack.c.bf16 %v1305_v38, %v1304_v37  ;;  %v1288_v41 = vld [vmem:[%s6130_s11 + $0x40] sm:$0xff]  ;;  %v1289_v42 = vld [vmem:[%s6130_s11 + $0x48] sm:$0xff] }
 0x136   : > { %4294 = vmatprep.subr.bf16.mxu0 %v4293_v44  ;;  %v1065_v46 = vpop.permute.xlu0 %1064  ;;  %4306 = vmatprep.subr.bf16.mxu1 %v4305_v20  ;;  %v1307_v44 = vld [vmem:[%s6130_s11 + $0xd8] sm:$0xff] }
 0x137   : > { %v1067_v47 = vsel %vm765_vm0, %v1063_v25, %v1065_v46  ;;  %4296 = vmatpush1.bf16.msra.mxu0 %v4295_v45  ;;  %v1089_v49 = vld [vmem:[#allocation3 + $0x78] sm:$0xff]  ;;  %v1090_v56 = vld [vmem:[#allocation3 + $0x80] sm:$0xff]  ;;  %4308 = vmatpush3.bf16.msra.mxu1 %v4307_v27  ;;  %v4319_v45 = vpack.c.bf16 %v1289_v42, %v1288_v41  ;;  %v4321_v46 = vpack.c.bf16 %v1307_v44, %v1306_v43 }
 0x138   : > { %1071 = vst [vmem:[#allocation3 + $0x88] sm:$0x7] %v1067_v47  ;;  %v4297_v50 = vpack.c.bf16 %v1089_v49, %v1087_v48  ;;  %v1301_v25 = vld [vmem:[%s6130_s11 + $0xa8] sm:$0xff]  ;;  %v1290_v47 = vld [vmem:[%s6130_s11 + $0x50] sm:$0xff]  ;;  %v1291_v48 = vld [vmem:[%s6130_s11 + $0x58] sm:$0xff] }
 0x139   : > { %v4309_v28 = vpack.c.bf16 %v1301_v25, %v1300_v23  ;;  %v4323_v49 = vpack.c.bf16 %v1291_v48, %v1290_v47 }
 0x13a   : > { %4298 = vmatprep.subr.bf16.mxu0 %v4297_v50  ;;  %v1308_v50 = vld [vmem:[%s6130_s11 + $0xe0] sm:$0xff] }
 0x13b   : > { %v1088_v52 = vld [vmem:[#allocation3 + $0x70] sm:$0xff]  ;;  %4310 = vmatprep.subr.bf16.mxu1 %v4309_v28 }
 0x13c   : > { %v4299_v53 = vpack.c.bf16 %v1088_v52, %v1086_v51  ;;  %4312 = vmatpush3.bf16.msra.mxu1 %v4311_v33  ;;  %v1309_v51 = vld [vmem:[%s6130_s11 + $0xe8] sm:$0xff] }
 0x13d   : > { %4314 = vmatprep.subr.bf16.mxu1 %v4313_v34  ;;  %v4325_v52 = vpack.c.bf16 %v1309_v51, %v1308_v50 }
 0x13e   : > { %4300 = vmatpush1.bf16.msra.mxu0 %v4299_v53  ;;  %v1292_v53 = vld [vmem:[%s6130_s11 + $0x60] sm:$0xff] }
 0x13f   : > { %v1091_v54 = vld [vmem:[#allocation3 + $0x88] sm:$0xff]  ;;  %v1102_v62 = vpop.permute.xlu1 %1101 }
 0x140   : > { %1127 = vmatprep.subr.mxu0 %v1091_v54  ;;  %4316 = vmatpush3.bf16.msra.mxu1 %v4315_v39  ;;  %v1293_v54 = vld [vmem:[%s6130_s11 + $0x68] sm:$0xff] }
 0x141   : > { %4318 = vmatprep.subr.bf16.mxu1 %v4317_v40 }
 0x142   : > { %1128 = vmatpush1.msra.mxu0 %v1090_v56  ;;  %v1310_v56 = vld [vmem:[%s6130_s11 + $0xf0] sm:$0xff] }
 0x143   : > { %3913 = vmatmul.mubr.msk.f32.vlgmr.msra.gmra.mrb[0].mxu0 %vm1104_vm8, %v1072_v55  ;;  %v4327_v55 = vpack.c.bf16 %v1293_v54, %v1292_v53 }
 0x144   : > { %1181 = vmatprep.mubr.f32.mxu0 %v4741_v13  ;;  %4320 = vmatpush3.bf16.msra.mxu1 %v4319_v45 }
 0x145   : > { %4322 = vmatprep.subr.bf16.mxu1 %v4321_v46 }
 0x147   : > { %3914 = vmatmul.mubr.msk.f32.gmra.mrb[2].mxu0 %vm1104_vm8, %v1073_v57  ;;  %v1097_v58 = vpop.permute.xlu0 %1096  ;;  %v1311_v57 = vld [vmem:[%s6130_s11 + $0xf8] sm:$0xff] }
 0x148   : > { %4324 = vmatpush3.bf16.msra.mxu1 %v4323_v49 }
 0x149   : > { %4326 = vmatprep.subr.bf16.mxu1 %v4325_v52 }
 0x14c   : > { %4328 = vmatpush3.bf16.msra.mxu1 %v4327_v55 }
 0x216   : > { %v1177_v59 = vpop.f32.mrb[0].mxu0 }
 0x217   : > { %v1179_v60 = vpop.f32.mrb[1].mxu0  ;;  %v5055_v63 = vadd.f32 %v1177_v59, %v1097_v58  ;;  %v1294_v59 = vld [vmem:[%s6130_s11 + $0x70] sm:$0xff] }
 0x218   : > { %v5053_v61 = vadd.f32 %v1179_v60, %v1097_v58  ;;  %v4329_v58 = vpack.c.bf16 %v1311_v57, %v1310_v56  ;;  %v1295_v60 = vld [vmem:[%s6130_s11 + $0x78] sm:$0xff]  ;;  %s6108_s11 = smov 9  }
 0x219   : > { %v1188_v17 = vmax.f32 %v5055_v63, 0.0  ;;  %v3919_v63 = vld [vmem:[%s6064_s10 + $0x2] ss:$0 sm:$0xff] }
 0x21a   : > { %v1189_v0 = vmax.f32 %v5053_v61, 0.0  ;;  %v1183_v1 = vpop.f32.mrb[2].mxu0  ;;  %4330 = vmatprep.subr.bf16.mxu1 %v4329_v58 }
 0x21b   : > { %v5058_v2 = vadd.f32 %v1183_v1, %v1102_v62  ;;  %v1185_v3 = vpop.f32.mrb[3].mxu0  ;;  %v4331_v1 = vpack.c.bf16 %v1295_v60, %v1294_v59 }
 0x21c   : > { %v4531_v6 = vpack.i.bf16 %v4741_v13, %v1189_v0  ;;  %v5063_v7 = vadd.f32 %v1185_v3, %v1102_v62 }
 0x21d   : > { %v1190_v11 = vmax.f32 %v5058_v2, 0.0  ;;  %4332 = vmatpush3.bf16.msra.mxu1 %v4331_v1  ;;  %v3917_v2 = vld [vmem:[%s6064_s10 + $0x1] ss:$0 sm:$0xff] }
 0x21e   : > { %v1191_v18 = vmax.f32 %v5063_v7, 0.0  ;;  %4532 = vrot.lane.b32.xlu1 %v4531_v6, %s6131_s25  ;;  %v3921_v7 = vld [vmem:[%s6064_s10 + $0x3] ss:$0 sm:$0xff] }
 0x21f   : > { %v4541_v24 = vpack.i.bf16 %v1190_v11, %v4741_v13  ;;  %v3923_v13 = vld [vmem:[%s6064_s10 + $0x4] ss:$0 sm:$0xff] }
 0x220   : > { %v4536_v26 = vpack.i.bf16 %v1191_v18, %v1188_v17 }
 0x222   : > { %4542 = vrot.lane.b32.xlu1 %v4541_v24, %s6131_s25  ;;  %4537 = vrot.lane.b32.xlu0 %v4536_v26, %s6131_s25 }
 0x290   : > { %v4533_v62 = vpop.permute.xlu1 %4532 }
 0x291   : > { %v4535_v3 = vunpack.i.h.bf16 %v4533_v62  ;;  %v4534_v6 = vunpack.i.l.bf16 %v4533_v62 }
 0x293   : > { %v1246_v8 = vmax.f32 %v4535_v3, 0.0  ;;  %v1231_v9 = vsel %vm882_vm4, %v4534_v6, %v4535_v3 }
 0x294   : > { %v4543_v10 = vpop.permute.xlu1 %4542  ;;  %v4538_v12 = vpop.permute.xlu0 %4537  ;;  %v1239_v14 = vmax.f32 %v1189_v0, %v1231_v9 }
 0x295   : > { %v4545_v15 = vunpack.i.h.bf16 %v4543_v10  ;;  %v4544_v16 = vunpack.i.l.bf16 %v4543_v10  ;;  %v4540_v19 = vunpack.i.h.bf16 %v4538_v12  ;;  %v4539_v20 = vunpack.i.l.bf16 %v4538_v12 }
 0x296   : > { %v4546_v21 = vpack.i.bf16 %v1246_v8, %v1239_v14 }
 0x297   : > { %v1249_v22 = vmax.f32 %v4544_v16, 0.0  ;;  %v1232_v23 = vsel %vm882_vm4, %v4545_v15, %v4540_v19  ;;  %v1230_v24 = vsel %vm882_vm4, %v4539_v20, %v4534_v6  ;;  %v1233_v25 = vsel %vm882_vm4, %v4540_v19, %v4544_v16 }
 0x298   : > { %4547 = vrot.lane.b32.xlu0 %v4546_v21, %s6132_s6  ;;  %v1240_v26 = vmax.f32 %v1190_v11, %v1232_v23  ;;  %v1238_v61 = vmax.f32 %v1188_v17, %v1230_v24  ;;  %v1241_v0 = vmax.f32 %v1191_v18, %v1233_v25  ;;  %v3927_v11 = vld [vmem:[%s6064_s10 + $0x6] ss:$0 sm:$0xff]  ;;  %v3925_v17 = vld [vmem:[%s6064_s10 + $0x5] ss:$0 sm:$0xff]  ;;  %v3931_v18 = vld [vmem:[%s6064_s10 + $0x8] ss:$0 sm:$0xff] }
 0x29a   : > { %v4556_v27 = vpack.i.bf16 %v1240_v26, %v1249_v22  ;;  %v4551_v28 = vpack.i.bf16 %v1241_v0, %v1238_v61 }
 0x29c   : > { %4557 = vrot.lane.b32.xlu0 %v4556_v27, %s6132_s6  ;;  %4552 = vrot.lane.b32.xlu1 %v4551_v28, %s6132_s6 }
 0x2a0   : > { %1424 = vrot.lane.b32.xlu1 %v3915_v29, %s6101_s2  ;;  %1461 = vrot.lane.b32.xlu0 %v3917_v2, %s6103_s26  ;;  %s6112_s26 = smov 7   ;;  %s6137_s2 = sld [smem:[#allocation17_spill]] }
 0x2a4   : > { %1498 = vrot.lane.b32.xlu1 %v3919_v63, %s6105_s24  ;;  %1535 = vrot.lane.b32.xlu0 %v3921_v7, %s6131_s25  ;;  %s6141_s24 = smov 8  }
 0x2a6   : > { %v1689_v25 = vld [vmem:[%s6137_s2] sm:$0xf]  ;;  %s3993_s2 = sshll.u32 %s6161_s30, 7 }
 0x2a8   : > { %1607 = vrot.lane.b32.xlu0 %v3927_v11, %s6112_s26  ;;  %1583 = vrot.lane.b32.xlu1 %v3925_v17, %s6133_s28  ;;  %v5332_v11 = vld [vmem:[%s6138_s5] sm:$0xff]  ;;  %s6145_s5 = smov 111  }
 0x2a9   : > { %v1696_v17 = vcombine.high %v5332_v11, %v5332_v11 }
 0x2ab   : > { %3932 = vmatprep.mubr.msk.f32.mxu0 %vm819_vm6, %v1696_v17  ;;  %v5372_v17 = vld [vmem:[#allocation5] sm:$0xff] }
 0x2ac   : > { %1655 = vrot.lane.b32.xlu0 %v3931_v18, %s6108_s11  ;;  %1631 = vrot.lane.b32.xlu1 %v3929_v30, %s6110_s1  ;;  %1773 = vst.msk [vmem:[#allocation7] sm:$0xff] %vm1772_vm7, %v5372_v17  ;;  %vm4758_vm7 = vmmov 0  }
 0x30a   : > { %v4548_v31 = vpop.permute.xlu0 %4547 }
 0x30b   : > { %v4550_v32 = vunpack.i.h.bf16 %v4548_v31  ;;  %v4549_v33 = vunpack.i.l.bf16 %v4548_v31 }
 0x30d   : > { %v1269_v34 = vsel %vm804_vm2, %v4549_v33, %v4550_v32 }
 0x30e   : > { %v4558_v35 = vpop.permute.xlu0 %4557  ;;  %v4553_v36 = vpop.permute.xlu1 %4552  ;;  %v1277_v37 = vmax.f32 %v1239_v14, %v1269_v34 }
 0x30f   : > { %v4560_v38 = vunpack.i.h.bf16 %v4558_v35  ;;  %v4559_v39 = vunpack.i.l.bf16 %v4558_v35  ;;  %v4555_v40 = vunpack.i.h.bf16 %v4553_v36  ;;  %v4554_v41 = vunpack.i.l.bf16 %v4553_v36 }
 0x310   : > { %1376 = vmatprep.mubr.f32.mxu1 %v1277_v37 }
 0x311   : > { %v1268_v42 = vsel %vm804_vm2, %v4554_v41, %v4549_v33  ;;  %v1271_v43 = vsel %vm804_vm2, %v4555_v40, %v4559_v39  ;;  %v1270_v47 = vsel %vm804_vm2, %v4560_v38, %v4555_v40 }
 0x312   : > { %v1276_v44 = vmax.f32 %v1238_v61, %v1268_v42  ;;  %v1279_v45 = vmax.f32 %v1241_v0, %v1271_v43  ;;  %v5224_v46 = vpop.permute.xlu1 %1424  ;;  %v1278_v49 = vmax.f32 %v1240_v26, %v1270_v47  ;;  %v5229_v50 = vpop.permute.xlu0 %1461  ;;  %v4757_v26 = vmov 0.0|0.0  }
 0x313   : > { %v1427_v48 = vmul.f32 0.0, %v5224_v46  ;;  %v1464_v51 = vmul.f32 0.0, %v5229_v50  ;;  %4333 = vmatprep.subr.bf16.mxu0 %v4757_v26 }
 0x314   : > { %1377 = vmatmul.mubr.f32.vlgmr.msra.gmra.mrb[0].mxu1 %v1276_v44 }
 0x315   : > { %1381 = vmatprep.mubr.f32.mxu1 %v1279_v45  ;;  %1435 = vrot.lane.b32.xlu1 %v1427_v48, %s6108_s11 }
 0x316   : > { %v5234_v52 = vpop.permute.xlu1 %1498  ;;  %v1536_v54 = vpop.permute.xlu0 %1535 }
 0x317   : > { %v1501_v53 = vmul.f32 0.0, %v5234_v52  ;;  %v1538_v55 = vmul.f32 0.0, %v1536_v54 }
 0x318   : > { %1382 = vmatmul.mubr.f32.gmra.mrb[2].mxu1 %v1278_v49 }
 0x319   : > { %1439 = vrot.lane.b32.xlu1 %v1427_v48, %s6108_s11 }
 0x31a   : > { %v1584_v3 = vpop.permute.xlu1 %1583  ;;  %v1608_v12 = vpop.permute.xlu0 %1607 }
 0x31d   : > { %1472 = vrot.lane.b32.xlu1 %v1464_v51, %s6110_s1 }
 0x31e   : > { %v1632_v16 = vpop.permute.xlu1 %1631  ;;  %v1656_v21 = vpop.permute.xlu0 %1655 }
 0x321   : > { %1476 = vrot.lane.b32.xlu1 %v1464_v51, %s6110_s1 }
 0x325   : > { %1509 = vrot.lane.b32.xlu1 %v1501_v53, %s6112_s26 }
 0x329   : > { %1513 = vrot.lane.b32.xlu1 %v1501_v53, %s6112_s26 }
 0x32d   : > { %1546 = vrot.lane.b32.xlu1 %v1538_v55, %s6133_s28 }
 0x331   : > { %1550 = vrot.lane.b32.xlu1 %v1538_v55, %s6133_s28 }
 0x387   : > { %v1436_v18 = vpop.permute.xlu1 %1435 }
 0x38b   : > { %v1440_v30 = vpop.permute.xlu1 %1439 }
 0x38f   : > { %v1473_v31 = vpop.permute.xlu1 %1472 }
 0x393   : > { %v1477_v32 = vpop.permute.xlu1 %1476 }
 0x397   : > { %v1510_v33 = vpop.permute.xlu1 %1509 }
 0x39b   : > { %v1514_v34 = vpop.permute.xlu1 %1513 }
 0x39f   : > { %v1547_v35 = vpop.permute.xlu1 %1546 }
 0x3a3   : > { %v1551_v36 = vpop.permute.xlu1 %1550 }
 0x3e7   : > { %v4026_v56 = vpop.f32.mrb[0].mxu1 }
 0x3e8   : > { %v4027_v57 = vpop.f32.mrb[1].mxu1 }
 0x3e9   : > { %v4028_v58 = vadd.f32 %v4027_v57, %v4026_v56 }
 0x3eb   : > { %1394 = vst.msk [vmem:[#allocation5 + $0x8] sm:$0xff] %vm1389_vm9, %v4028_v58  ;;  %v4029_v59 = vpop.f32.mrb[2].mxu1 }
 0x3ec   : > { %v4030_v60 = vpop.f32.mrb[3].mxu1 }
 0x3ed   : > { %v4031_v62 = vadd.f32 %v4030_v60, %v4029_v59 }
 0x3ef   : > { %1395 = vst.msk [vmem:[#allocation5 + $0x20] sm:$0xff] %vm1389_vm9, %v4031_v62 }
 0x3f2   : > { %v1560_v1 = vld [vmem:[#allocation5 + $0x8] sm:$0xff] }
 0x3f3   : > { %v1570_v6 = vmul.f32 %v3923_v13, %v1560_v1  ;;  %v1586_v8 = vmul.f32 %v1584_v3, %v1560_v1  ;;  %v1428_v9 = vmul.f32 %v1560_v1, %v5224_v46  ;;  %v1610_v15 = vmul.f32 %v1608_v12, %v1560_v1 }
 0x3f4   : > { %v1465_v19 = vmul.f32 %v1560_v1, %v5229_v50  ;;  %v1634_v20 = vmul.f32 %v1632_v16, %v1560_v1  ;;  %v1502_v22 = vmul.f32 %v1560_v1, %v5234_v52  ;;  %v1658_v23 = vmul.f32 %v1656_v21, %v1560_v1 }
 0x3f5   : > { %1572 = vst.msk [vmem:[#allocation6 + $0x40] sm:$0xff] %vm1389_vm9, %v1570_v6  ;;  %1590 = vrot.lane.b32.xlu1 %v1586_v8, %s6131_s25  ;;  %1437 = vrot.lane.b32.xlu0 %v1428_v9, %s6108_s11  ;;  %v1539_v24 = vmul.f32 %v1560_v1, %v1536_v54 }
 0x3f6   : > { %v1561_v10 = vld [vmem:[#allocation5 + $0x20] sm:$0xff] }
 0x3f7   : > { %v1571_v14 = vmul.f32 %v3923_v13, %v1561_v10  ;;  %v1430_v61 = vmul.f32 %v1561_v10, %v5224_v46  ;;  %v1467_v0 = vmul.f32 %v1561_v10, %v5229_v50  ;;  %v1504_v27 = vmul.f32 %v1561_v10, %v5234_v52 }
 0x3f8   : > { %v1541_v28 = vmul.f32 %v1561_v10, %v1536_v54  ;;  %v1587_v29 = vmul.f32 %v1584_v3, %v1561_v10  ;;  %v1611_v2 = vmul.f32 %v1608_v12, %v1561_v10  ;;  %v1635_v63 = vmul.f32 %v1632_v16, %v1561_v10 }
 0x3f9   : > { %1573 = vst.msk [vmem:[#allocation6 + $0x48] sm:$0xff] %vm1389_vm9, %v1571_v14  ;;  %1614 = vrot.lane.b32.xlu1 %v1610_v15, %s6134_s29  ;;  %1474 = vrot.lane.b32.xlu0 %v1465_v19, %s6110_s1  ;;  %v1659_v7 = vmul.f32 %v1656_v21, %v1561_v10 }
 0x3fc   : > { %v1679_v19 = vld [vmem:[#allocation6 + $0x40] sm:$0xff] }
 0x3fd   : > { %1638 = vrot.lane.b32.xlu1 %v1634_v20, %s6135_s27  ;;  %1511 = vrot.lane.b32.xlu0 %v1502_v22, %s6112_s26 }
 0x400   : > { %v1680_v15 = vld [vmem:[#allocation6 + $0x48] sm:$0xff] }
 0x401   : > { %1662 = vrot.lane.b32.xlu1 %v1658_v23, %s6136_s3  ;;  %1548 = vrot.lane.b32.xlu0 %v1539_v24, %s6133_s28  ;;  %v4346_v20 = vpack.c.bf16 %v1680_v15, %v1679_v19 }
 0x405   : > { %1692 = vperm.xlu1 %4530, %v1689_v25   ;;  %1441 = vrot.lane.b32.xlu0 %v1430_v61, %s6108_s11  ;;  %s6140_s11 = smov 7  }
 0x409   : > { %1478 = vrot.lane.b32.xlu0 %v1467_v0, %s6110_s1  ;;  %s5584_s1 = scalar_lea.vmem %s6076_s22, %s3993_s2  ;;  %s6142_s2 = smov 9  }
 0x40d   : > { %1515 = vrot.lane.b32.xlu0 %v1504_v27, %s6112_s26 }
 0x411   : > { %1552 = vrot.lane.b32.xlu0 %v1541_v28, %s6133_s28 }
 0x415   : > { %1592 = vrot.lane.b32.xlu0 %v1587_v29, %s6131_s25 }
 0x419   : > { %1616 = vrot.lane.b32.xlu0 %v1611_v2, %s6134_s29 }
 0x41d   : > { %1640 = vrot.lane.b32.xlu0 %v1635_v63, %s6135_s27 }
 0x421   : > { %1664 = vrot.lane.b32.xlu0 %v1659_v7, %s6136_s3 }
 0x467   : > { %v1591_v37 = vpop.permute.xlu1 %1590  ;;  %v1438_v38 = vpop.permute.xlu0 %1437 }
 0x468   : > { %1596 = vst.msk [vmem:[#allocation6 + $0x50] sm:$0xff] %vm1389_vm9, %v1591_v37  ;;  %v1444_v39 = vsel %vm1443_vm10, %v1436_v18, %v1438_v38  ;;  %v1790_v37 = vld [vmem:[%s6139_s12 + $0x18] sm:$0xff] }
 0x469   : > { %1448 = vst.msk [vmem:[#allocation6] sm:$0xff] %vm1389_vm9, %v1444_v39  ;;  %v1791_v39 = vld [vmem:[%s6139_s12 + $0x20] sm:$0xff] }
 0x46b   : > { %v1615_v40 = vpop.permute.xlu1 %1614  ;;  %v1475_v41 = vpop.permute.xlu0 %1474 }
 0x46c   : > { %1620 = vst.msk [vmem:[#allocation6 + $0x60] sm:$0xff] %vm1389_vm9, %v1615_v40  ;;  %v1481_v42 = vsel %vm1480_vm11, %v1473_v31, %v1475_v41  ;;  %v1792_v40 = vld [vmem:[%s6139_s12 + $0x28] sm:$0xff] }
 0x46d   : > { %1485 = vst.msk [vmem:[#allocation6 + $0x10] sm:$0xff] %vm1389_vm9, %v1481_v42  ;;  %v4367_v41 = vpack.c.bf16 %v1792_v40, %v1791_v39  ;;  %v1793_v42 = vld [vmem:[%s6139_s12 + $0x30] sm:$0xff]  ;;  %v2036_v39 = vld [vmem:[%s6069_s15 + $0x58] sm:$0xff]  ;;  %v2037_v40 = vld [vmem:[%s6069_s15 + $0x60] sm:$0xff] }
 0x46f   : > { %v1639_v43 = vpop.permute.xlu1 %1638  ;;  %v1512_v44 = vpop.permute.xlu0 %1511  ;;  %v1681_v23 = vld [vmem:[#allocation6 + $0x50] sm:$0xff] }
 0x470   : > { %1644 = vst.msk [vmem:[#allocation6 + $0x70] sm:$0xff] %vm1389_vm9, %v1639_v43  ;;  %v1518_v45 = vsel %vm1517_vm12, %v1510_v33, %v1512_v44  ;;  %v1671_v55 = vld [vmem:[#allocation6] sm:$0xff]  ;;  %v1787_v33 = vld [vmem:[%s6139_s12] sm:$0xff]  ;;  %v1794_v43 = vld [vmem:[%s6139_s12 + $0x38] sm:$0xff] }
 0x471   : > { %1522 = vst.msk [vmem:[#allocation6 + $0x20] sm:$0xff] %vm1389_vm9, %v1518_v45  ;;  %v4370_v45 = vpack.c.bf16 %v1794_v43, %v1793_v42  ;;  %v2039_v42 = vld [vmem:[%s6069_s15 + $0x70] sm:$0xff]  ;;  %v2040_v43 = vld [vmem:[%s6069_s15 + $0x78] sm:$0xff] }
 0x473   : > { %v1663_v46 = vpop.permute.xlu1 %1662  ;;  %v1549_v47 = vpop.permute.xlu0 %1548  ;;  %v1683_v61 = vld [vmem:[#allocation6 + $0x60] sm:$0xff] }
 0x474   : > { %1668 = vst.msk [vmem:[#allocation6 + $0x80] sm:$0xff] %vm1389_vm9, %v1663_v46  ;;  %v1554_v48 = vsel %vm897_vm3, %v1547_v35, %v1549_v47  ;;  %v1673_v60 = vld [vmem:[#allocation6 + $0x10] sm:$0xff] }
 0x475   : > { %1558 = vst.msk [vmem:[#allocation6 + $0x30] sm:$0xff] %vm1389_vm9, %v1554_v48 }
 0x477   : > { %v1442_v49 = vpop.permute.xlu0 %1441  ;;  %v1685_v28 = vld [vmem:[#allocation6 + $0x70] sm:$0xff] }
 0x478   : > { %v1445_v50 = vsel %vm1443_vm10, %v1440_v30, %v1442_v49  ;;  %v1675_v3 = vld [vmem:[#allocation6 + $0x20] sm:$0xff] }
 0x479   : > { %1449 = vst.msk [vmem:[#allocation6 + $0x8] sm:$0xff] %vm1389_vm9, %v1445_v50  ;;  %v1868_v50 = vld [vmem:[%s6073_s19] sm:$0xff] }
 0x47a   : > { %4142 = vmatprep.mubr.msk.f32.mxu1 %vm1876_vm14, %v1868_v50 }
 0x47b   : > { %v1479_v51 = vpop.permute.xlu0 %1478  ;;  %v1687_v63 = vld [vmem:[#allocation6 + $0x80] sm:$0xff] }
 0x47c   : > { %v1482_v52 = vsel %vm1480_vm11, %v1477_v32, %v1479_v51  ;;  %v1677_v10 = vld [vmem:[#allocation6 + $0x30] sm:$0xff] }
 0x47d   : > { %1486 = vst.msk [vmem:[#allocation6 + $0x18] sm:$0xff] %vm1389_vm9, %v1482_v52  ;;  %v1869_v52 = vld [vmem:[%s6073_s19 + $0x8] sm:$0xff] }
 0x47f   : > { %v1516_v53 = vpop.permute.xlu0 %1515 }
 0x480   : > { %v1519_v54 = vsel %vm1517_vm12, %v1514_v34, %v1516_v53  ;;  %v1672_v56 = vld [vmem:[#allocation6 + $0x8] sm:$0xff]  ;;  %v1789_v34 = vld [vmem:[%s6139_s12 + $0x10] sm:$0xff] }
 0x481   : > { %1523 = vst.msk [vmem:[#allocation6 + $0x28] sm:$0xff] %vm1389_vm9, %v1519_v54  ;;  %v4334_v57 = vpack.c.bf16 %v1672_v56, %v1671_v55  ;;  %v4364_v38 = vpack.c.bf16 %v1790_v37, %v1789_v34  ;;  %v1870_v54 = vld [vmem:[%s6073_s19 + $0x10] sm:$0xff]  ;;  %v1871_v55 = vld [vmem:[%s6073_s19 + $0x18] sm:$0xff]  ;;  %v1872_v56 = vld [vmem:[%s6073_s19 + $0x20] sm:$0xff] }
 0x482   : > { %v2031_v34 = vld [vmem:[%s6069_s15 + $0x30] sm:$0xff]  ;;  %v2034_v37 = vld [vmem:[%s6069_s15 + $0x48] sm:$0xff] }
 0x483   : > { %4335 = vmatpush1.bf16.msra.mxu0 %v4334_v57  ;;  %v1553_v58 = vpop.permute.xlu0 %1552  ;;  %v1873_v57 = vld [vmem:[%s6073_s19 + $0x28] sm:$0xff] }
 0x484   : > { %v1555_v59 = vsel %vm897_vm3, %v1551_v36, %v1553_v58  ;;  %4336 = vmatprep.subr.bf16.mxu0 %v4757_v26  ;;  %v1674_v62 = vld [vmem:[#allocation6 + $0x18] sm:$0xff]  ;;  %v1693_v18 = vpop.permute.xlu1 %1692  ;;  %v1874_v58 = vld [vmem:[%s6073_s19 + $0x30] sm:$0xff] }
 0x485   : > { %1559 = vst.msk [vmem:[#allocation6 + $0x38] sm:$0xff] %vm1389_vm9, %v1555_v59  ;;  %v4337_v13 = vpack.c.bf16 %v1674_v62, %v1673_v60  ;;  %v1875_v59 = vld [vmem:[%s6073_s19 + $0x38] sm:$0xff]  ;;  %v2025_v60 = vld [vmem:[%s6069_s15] sm:$0xff]  ;;  %v5452_v62 = vld [vmem:[%s6075_s21 + $0x8] sm:$0xff] }
 0x487   : > { %4338 = vmatpush1.bf16.msra.mxu0 %v4337_v13  ;;  %v1593_v1 = vpop.permute.xlu0 %1592  ;;  %v5457_v13 = vld [vmem:[%s6075_s21] sm:$0xff] }
 0x488   : > { %1597 = vst.msk [vmem:[#allocation6 + $0x58] sm:$0xff] %vm1389_vm9, %v1593_v1  ;;  %4339 = vmatprep.subr.bf16.mxu0 %v4757_v26  ;;  %v1676_v6 = vld [vmem:[#allocation6 + $0x28] sm:$0xff] }
 0x489   : > { %v4340_v8 = vpack.c.bf16 %v1676_v6, %v1675_v3 }
 0x48b   : > { %4341 = vmatpush1.bf16.msra.mxu0 %v4340_v8  ;;  %v1617_v9 = vpop.permute.xlu0 %1616 }
 0x48c   : > { %1621 = vst.msk [vmem:[#allocation6 + $0x68] sm:$0xff] %vm1389_vm9, %v1617_v9  ;;  %4342 = vmatprep.subr.bf16.mxu0 %v4757_v26  ;;  %v1678_v12 = vld [vmem:[#allocation6 + $0x38] sm:$0xff]  ;;  %v5464_v9 = vld [vmem:[%s6075_s21 + $0x18] sm:$0xff] }
 0x48d   : > { %v4343_v14 = vpack.c.bf16 %v1678_v12, %v1677_v10  ;;  %v5469_v10 = vld [vmem:[%s6075_s21 + $0x10] sm:$0xff] }
 0x48f   : > { %4344 = vmatpush1.bf16.msra.mxu0 %v4343_v14  ;;  %v1641_v16 = vpop.permute.xlu0 %1640  ;;  %v1682_v21 = vld [vmem:[#allocation6 + $0x58] sm:$0xff] }
 0x490   : > { %1645 = vst.msk [vmem:[#allocation6 + $0x78] sm:$0xff] %vm1389_vm9, %v1641_v16  ;;  %4345 = vmatprep.subr.bf16.mxu0 %v4757_v26  ;;  %v4349_v24 = vpack.c.bf16 %v1682_v21, %v1681_v23  ;;  %v5481_v21 = vld [vmem:[%s6075_s21 + $0x20] sm:$0xff] }
 0x493   : > { %4347 = vmatpush1.bf16.msra.mxu0 %v4346_v20  ;;  %v1665_v22 = vpop.permute.xlu0 %1664  ;;  %v1684_v25 = vld [vmem:[#allocation6 + $0x68] sm:$0xff]  ;;  %v5476_v20 = vld [vmem:[%s6075_s21 + $0x28] sm:$0xff] }
 0x494   : > { %1669 = vst.msk [vmem:[#allocation6 + $0x88] sm:$0xff] %vm1389_vm9, %v1665_v22  ;;  %4348 = vmatprep.subr.bf16.mxu0 %v4757_v26  ;;  %v4352_v0 = vpack.c.bf16 %v1684_v25, %v1683_v61 }
 0x497   : > { %4350 = vmatpush1.bf16.msra.mxu0 %v4349_v24  ;;  %v1686_v27 = vld [vmem:[#allocation6 + $0x78] sm:$0xff] }
 0x498   : > { %4351 = vmatprep.subr.bf16.mxu0 %v4757_v26  ;;  %v4355_v29 = vpack.c.bf16 %v1686_v27, %v1685_v28  ;;  %v5493_v27 = vld [vmem:[%s6075_s21 + $0x30] sm:$0xff] }
 0x49b   : > { %4353 = vmatpush1.bf16.msra.mxu0 %v4352_v0  ;;  %v1688_v2 = vld [vmem:[#allocation6 + $0x88] sm:$0xff] }
 0x49c   : > { %4354 = vmatprep.subr.bf16.mxu0 %v4757_v26  ;;  %v4358_v7 = vpack.c.bf16 %v1688_v2, %v1687_v63  ;;  %v5488_v0 = vld [vmem:[%s6075_s21 + $0x38] sm:$0xff] }
 0x49f   : > { %4356 = vmatpush1.bf16.msra.mxu0 %v4355_v29 }
 0x4a0   : > { %4357 = vmatprep.subr.bf16.mxu0 %v4757_v26 }
 0x4a3   : > { %4359 = vmatpush1.bf16.msra.mxu0 %v4358_v7 }
 0x4a4   : > { %4360 = vmatprep.subr.bf16.mxu0 %v4757_v26 }
 0x4a6   : > { %1764 = vmatmul.mubr.f32.vlgmr.msra.gmra.mrb[4].mxu0 %v5332_v11  ;;  %v1788_v11 = vld [vmem:[%s6139_s12 + $0x8] sm:$0xff] }
 0x4a7   : > { %v4361_v36 = vpack.c.bf16 %v1788_v11, %v1787_v33  ;;  %4137 = vmatprep.mubr.msk.f32.mxu0 %vm4758_vm7, %v5372_v17  ;;  %v2029_v33 = vld [vmem:[%s6069_s15 + $0x20] sm:$0xff]  ;;  %v2030_v11 = vld [vmem:[%s6069_s15 + $0x28] sm:$0xff] }
 0x4a9   : > { %4362 = vmatpush3.bf16.msra.mxu0 %v4361_v36  ;;  %v2033_v36 = vld [vmem:[%s6069_s15 + $0x40] sm:$0xff] }
 0x4aa   : > { %4363 = vmatprep.subr.bf16.mxu0 %v4757_v26 }
 0x4ad   : > { %4365 = vmatpush3.bf16.msra.mxu0 %v4364_v38  ;;  %v2035_v38 = vld [vmem:[%s6069_s15 + $0x50] sm:$0xff] }
 0x4ae   : > { %4366 = vmatprep.subr.bf16.mxu0 %v4757_v26 }
 0x4b1   : > { %4368 = vmatpush3.bf16.msra.mxu0 %v4367_v41  ;;  %v2038_v41 = vld [vmem:[%s6069_s15 + $0x68] sm:$0xff] }
 0x4b2   : > { %4369 = vmatprep.subr.bf16.mxu0 %v4757_v26 }
 0x4b5   : > { %4371 = vmatpush3.bf16.msra.mxu0 %v4370_v45 }
 0x4b6   : > { %4432 = vmatprep.subr.bf16.mxu0 %v4757_v26 }
 0x579   : > { %v1765_v30 = vpop.f32.mrb[4].mxu0 }
 0x57a   : > { %v1766_v31 = vadd.f32 %v1765_v30, %v1693_v18  ;;  %v1767_v32 = vpop.f32.mrb[5].mxu0  ;;  %v2026_v30 = vld [vmem:[%s6069_s15 + $0x8] sm:$0xff] }
 0x57b   : > { %v2028_v32 = vld [vmem:[%s6069_s15 + $0x18] sm:$0xff] }
 0x57c   : > { %v1769_v35 = vmax.f32 %v1766_v31, 0.0  ;;  %v2027_v31 = vld [vmem:[%s6069_s15 + $0x10] sm:$0xff] }
 0x57e   : > { %1775 = vst.msk [vmem:[#allocation7] sm:$0xf] %vm1774_vm15, %v1769_v35  ;;  %v2032_v35 = vld [vmem:[%s6069_s15 + $0x38] sm:$0xff] }
 0x585   : > { %v1776_v44 = vld [vmem:[#allocation7] sm:$0xf] }
 0x586   : > { %1778 = vrot.lane.b32.xlu0 %v1776_v44, %s6131_s25 }
 0x5f8   : > { %v1779_v46 = vpop.permute.xlu0 %1778 }
 0x5f9   : > { %v1781_v47 = vmax.f32 %v1776_v44, %v1779_v46 }
 0x5fb   : > { %1783 = vrot.lane.b32.xlu1 %v1781_v47, %s6135_s27 }
 0x66d   : > { %v1784_v48 = vpop.permute.xlu1 %1783 }
 0x66e   : > { %v1786_v49 = vmax.f32 %v1781_v47, %v1784_v48 }
 0x670   : > { %4138 = vmatmul.mubr.msk.f32.vlgmr.msra.gmra.mrb[6].mxu0 %vm1389_vm9, %v1786_v49 }
 0x671   : > { %4261 = vmatprep.mubr.msk.f32.mxu0 %vm4758_vm7, %v5372_v17 }
 0x743   : > { %v1864_v51 = vpop.f32.mrb[6].mxu0 }
 0x744   : > { %v4139_v53 = vpop.f32.mrb[7].mxu0  ;;  %4140 = vmatprep.subr.msk.mxu1 %vm1770_vm13, %v1864_v51 }
 0x745   : > { %4141 = vmatpush3.msk.msra.mxu1 %vm1770_vm13, %v1864_v51  ;;  %vm2758_vm13 = vcmask 973824  }
 0x746   : > { %4143 = vmatmul.mubr.msk.f32.vlgmr.msra.gmra.mrb[4].mxu1 %vm1876_vm14, %v1869_v52 }
 0x747   : > { %4145 = vmatprep.mubr.msk.f32.mxu1 %vm1876_vm14, %v1870_v54 }
 0x74a   : > { %4146 = vmatmul.mubr.msk.f32.gmra.mrb[6].mxu1 %vm1876_vm14, %v1871_v55 }
 0x74b   : > { %4148 = vmatprep.mubr.msk.f32.mxu1 %vm1876_vm14, %v1872_v56 }
 0x74e   : > { %4149 = vmatmul.mubr.msk.f32.gmra.mrb[8].mxu1 %vm1876_vm14, %v1873_v57 }
 0x74f   : > { %4151 = vmatprep.mubr.msk.f32.mxu1 %vm1876_vm14, %v1874_v58 }
 0x752   : > { %4152 = vmatmul.mubr.msk.f32.gmra.mrb[10].mxu1 %vm1876_vm14, %v1875_v59  ;;  %vm2804_vm14 = vcmask 990208  }
 0x753   : > { %4170 = vmatprep.mubr.msk.f32.mxu1 %vm1389_vm9, %v2025_v60 }
 0x819   : > { %v4144_v1 = vpop.f32.mrb[4].mxu1 }
 0x81a   : > { %v2018_v3 = vmul.f32 %v4144_v1, %v5452_v62  ;;  %v1970_v6 = vpop.f32.mrb[5].mxu1 }
 0x81b   : > { %v2017_v8 = vmul.f32 %v5457_v13, %v1970_v6 }
 0x81d   : > { %v4372_v12 = vpack.c.bf16 %v2018_v3, %v2017_v8  ;;  %v4147_v14 = vpop.f32.mrb[6].mxu1 }
 0x81e   : > { %v2020_v15 = vmul.f32 %v4147_v14, %v5464_v9  ;;  %v1980_v16 = vpop.f32.mrb[7].mxu1 }
 0x81f   : > { %v2019_v19 = vmul.f32 %v5469_v10, %v1980_v16  ;;  %4373 = vmatprep.subr.bf16.mxu1 %v4372_v12 }
 0x820   : > { %4375 = vmatpush3.bf16.msra.mxu1 %v4372_v12 }
 0x821   : > { %v4376_v22 = vpack.c.bf16 %v2020_v15, %v2019_v19  ;;  %v4150_v23 = vpop.f32.mrb[8].mxu1 }
 0x822   : > { %v2022_v24 = vmul.f32 %v4150_v23, %v5476_v20  ;;  %v1990_v25 = vpop.f32.mrb[9].mxu1 }
 0x823   : > { %v2021_v61 = vmul.f32 %v5481_v21, %v1990_v25  ;;  %4377 = vmatprep.subr.bf16.mxu1 %v4376_v22 }
 0x824   : > { %4379 = vmatpush3.bf16.msra.mxu1 %v4376_v22 }
 0x825   : > { %v4380_v28 = vpack.c.bf16 %v2022_v24, %v2021_v61  ;;  %v4153_v29 = vpop.f32.mrb[10].mxu1 }
 0x826   : > { %v2024_v2 = vmul.f32 %v4153_v29, %v5488_v0  ;;  %v2000_v63 = vpop.f32.mrb[11].mxu1  ;;  %v2283_v29 = vld [vmem:[%s6070_s16 + $0x8] sm:$0xff] }
 0x827   : > { %v2023_v7 = vmul.f32 %v5493_v27, %v2000_v63  ;;  %4381 = vmatprep.subr.bf16.mxu1 %v4380_v28 }
 0x828   : > { %4383 = vmatpush3.bf16.msra.mxu1 %v4380_v28 }
 0x829   : > { %v4384_v18 = vpack.c.bf16 %v2024_v2, %v2023_v7  ;;  %v2282_v2 = vld [vmem:[%s6070_s16] sm:$0xff] }
 0x82b   : > { %4385 = vmatprep.subr.bf16.mxu1 %v4384_v18 }
 0x82c   : > { %4387 = vmatpush3.bf16.msra.mxu1 %v4384_v18 }
 0x82f   : > { %4171 = vmatmul.mubr.msk.f32.vlgmr.msra.gmra.mrb[12].mxu1 %vm1389_vm9, %v2026_v30 }
 0x830   : > { %4173 = vmatprep.mubr.msk.f32.mxu1 %vm1389_vm9, %v2027_v31  ;;  %v2285_v31 = vld [vmem:[%s6070_s16 + $0x18] sm:$0xff] }
 0x833   : > { %4174 = vmatmul.mubr.msk.f32.gmra.mrb[14].mxu1 %vm1389_vm9, %v2028_v32 }
 0x834   : > { %4176 = vmatprep.mubr.msk.f32.mxu1 %vm1389_vm9, %v2029_v33 }
 0x837   : > { %4177 = vmatmul.mubr.msk.f32.gmra.mrb[16].mxu1 %vm1389_vm9, %v2030_v11 }
 0x838   : > { %4179 = vmatprep.mubr.msk.f32.mxu1 %vm1389_vm9, %v2031_v34  ;;  %v2284_v34 = vld [vmem:[%s6070_s16 + $0x10] sm:$0xff] }
 0x83b   : > { %4180 = vmatmul.mubr.msk.f32.gmra.mrb[18].mxu1 %vm1389_vm9, %v2032_v35  ;;  %v2286_v35 = vld [vmem:[%s6070_s16 + $0x20] sm:$0xff] }
 0x83c   : > { %4182 = vmatprep.mubr.msk.f32.mxu1 %vm1389_vm9, %v2033_v36 }
 0x83f   : > { %4183 = vmatmul.mubr.msk.f32.gmra.mrb[20].mxu1 %vm1389_vm9, %v2034_v37 }
 0x840   : > { %4185 = vmatprep.mubr.msk.f32.mxu1 %vm1389_vm9, %v2035_v38 }
 0x843   : > { %4186 = vmatmul.mubr.msk.f32.gmra.mrb[22].mxu1 %vm1389_vm9, %v2036_v39 }
 0x844   : > { %4188 = vmatprep.mubr.msk.f32.mxu1 %vm1389_vm9, %v2037_v40  ;;  %v2287_v40 = vld [vmem:[%s6070_s16 + $0x28] sm:$0xff] }
 0x847   : > { %4189 = vmatmul.mubr.msk.f32.gmra.mrb[24].mxu1 %vm1389_vm9, %v2038_v41  ;;  %v2288_v41 = vld [vmem:[%s6070_s16 + $0x30] sm:$0xff] }
 0x848   : > { %4191 = vmatprep.mubr.msk.f32.mxu1 %vm1389_vm9, %v2039_v42 }
 0x84b   : > { %4192 = vmatmul.mubr.msk.f32.gmra.mrb[26].mxu1 %vm1389_vm9, %v2040_v43 }
 0x902   : > { %v4172_v44 = vpop.f32.mrb[12].mxu1 }
 0x903   : > { %v2155_v45 = vpop.f32.mrb[13].mxu1  ;;  %v2237_v46 = vsel %vm819_vm6, %v4172_v44, 0.0 }
 0x904   : > { %2238 = vadd.xlane.f32.xlu1 %v2237_v46  ;;  %v2234_v47 = vsel %vm819_vm6, %v2155_v45, 0.0 }
 0x905   : > { %2235 = vadd.xlane.f32.xlu0 %v2234_v47  ;;  %v2289_v47 = vld [vmem:[%s6070_s16 + $0x38] sm:$0xff] }
 0x906   : > { %v4175_v48 = vpop.f32.mrb[14].mxu1 }
 0x907   : > { %v2243_v49 = vsel %vm819_vm6, %v4175_v48, 0.0  ;;  %v2165_v50 = vpop.f32.mrb[15].mxu1  ;;  %v2290_v48 = vld [vmem:[%s6070_s16 + $0x40] sm:$0xff] }
 0x908   : > { %v2240_v53 = vsel %vm819_vm6, %v2165_v50, 0.0 }
 0x909   : > { %2244 = vadd.xlane.f32.xlu0 %v2243_v49 }
 0x90a   : > { %v4178_v51 = vpop.f32.mrb[16].mxu1 }
 0x90b   : > { %v2175_v52 = vpop.f32.mrb[17].mxu1  ;;  %v2249_v55 = vsel %vm819_vm6, %v4178_v51, 0.0 }
 0x90c   : > { %v2246_v54 = vsel %vm819_vm6, %v2175_v52, 0.0 }
 0x90d   : > { %2241 = vadd.xlane.f32.xlu0 %v2240_v53  ;;  %2247 = vadd.xlane.f32.xlu1 %v2246_v54  ;;  %v2291_v54 = vld [vmem:[%s6070_s16 + $0x48] sm:$0xff] }
 0x90e   : > { %v4181_v56 = vpop.f32.mrb[18].mxu1 }
 0x90f   : > { %v2185_v57 = vpop.f32.mrb[19].mxu1  ;;  %v2255_v59 = vsel %vm819_vm6, %v4181_v56, 0.0 }
 0x910   : > { %v2252_v58 = vsel %vm819_vm6, %v2185_v57, 0.0 }
 0x911   : > { %2250 = vadd.xlane.f32.xlu0 %v2249_v55  ;;  %2253 = vadd.xlane.f32.xlu1 %v2252_v58  ;;  %v2292_v55 = vld [vmem:[%s6070_s16 + $0x50] sm:$0xff] }
 0x912   : > { %v4184_v60 = vpop.f32.mrb[20].mxu1 }
 0x913   : > { %v2195_v1 = vpop.f32.mrb[21].mxu1  ;;  %v2261_v6 = vsel %vm819_vm6, %v4184_v60, 0.0 }
 0x914   : > { %v2258_v3 = vsel %vm819_vm6, %v2195_v1, 0.0  ;;  %v2293_v1 = vld [vmem:[%s6070_s16 + $0x58] sm:$0xff] }
 0x915   : > { %2256 = vadd.xlane.f32.xlu0 %v2255_v59  ;;  %2259 = vadd.xlane.f32.xlu1 %v2258_v3  ;;  %v2294_v3 = vld [vmem:[%s6070_s16 + $0x60] sm:$0xff] }
 0x916   : > { %v4187_v8 = vpop.f32.mrb[22].mxu1 }
 0x917   : > { %v2205_v12 = vpop.f32.mrb[23].mxu1  ;;  %v2267_v15 = vsel %vm819_vm6, %v4187_v8, 0.0 }
 0x918   : > { %v2264_v14 = vsel %vm819_vm6, %v2205_v12, 0.0 }
 0x919   : > { %2262 = vadd.xlane.f32.xlu0 %v2261_v6  ;;  %2265 = vadd.xlane.f32.xlu1 %v2264_v14 }
 0x91a   : > { %v4190_v16 = vpop.f32.mrb[24].mxu1 }
 0x91b   : > { %v2215_v19 = vpop.f32.mrb[25].mxu1  ;;  %v2273_v23 = vsel %vm819_vm6, %v4190_v16, 0.0  ;;  %v2295_v16 = vld [vmem:[%s6070_s16 + $0x68] sm:$0xff] }
 0x91c   : > { %v2270_v22 = vsel %vm819_vm6, %v2215_v19, 0.0  ;;  %v2296_v19 = vld [vmem:[%s6070_s16 + $0x70] sm:$0xff] }
 0x91d   : > { %2268 = vadd.xlane.f32.xlu0 %v2267_v15  ;;  %2271 = vadd.xlane.f32.xlu1 %v2270_v22 }
 0x91e   : > { %v4193_v24 = vpop.f32.mrb[26].mxu1 }
 0x91f   : > { %v2225_v25 = vpop.f32.mrb[27].mxu1  ;;  %v2279_v28 = vsel %vm819_vm6, %v4193_v24, 0.0 }
 0x920   : > { %v2276_v61 = vsel %vm819_vm6, %v2225_v25, 0.0 }
 0x921   : > { %2274 = vadd.xlane.f32.xlu0 %v2273_v23  ;;  %2277 = vadd.xlane.f32.xlu1 %v2276_v61 }
 0x925   : > { %2280 = vadd.xlane.f32.xlu0 %v2279_v28  ;;  %v2297_v28 = vld [vmem:[%s6070_s16 + $0x78] sm:$0xff] }
 0x991   : > { %v2239_v63 = vpop.xlane.xlu1 %2238 }
 0x992   : > { %v2299_v7 = vadd.f32 %v2283_v29, %v2239_v63  ;;  %v2236_v18 = vpop.xlane.xlu0 %2235 }
 0x993   : > { %v2298_v30 = vadd.f32 %v2282_v2, %v2236_v18 }
 0x994   : > { %2315 = vst.msk [vmem:[%s5584_s1 + $0x8] sm:$0xff] %vm897_vm3, %v2299_v7 }
 0x995   : > { %v4561_v32 = vpack.i.bf16 %v2299_v7, %v2298_v30  ;;  %2314 = vst.msk [vmem:[%s5584_s1] sm:$0xff] %vm897_vm3, %v2298_v30  ;;  %v2418_v7 = vld [vmem:[%s6072_s18] sm:$0xff]  ;;  %v2420_v30 = vld [vmem:[%s6072_s18 + $0x10] sm:$0xff] }
 0x996   : > { %v2245_v33 = vpop.xlane.xlu0 %2244 }
 0x997   : > { %v2301_v11 = vadd.f32 %v2285_v31, %v2245_v33  ;;  %4562 = vperm.xlu1 %4530, %v4561_v32   ;;  %v2419_v31 = vld [vmem:[%s6072_s18 + $0x8] sm:$0xff]  ;;  %v2422_v32 = vld [vmem:[%s6072_s18 + $0x20] sm:$0xff]  ;;  %v2421_v33 = vld [vmem:[%s6072_s18 + $0x18] sm:$0xff] }
 0x999   : > { %2317 = vst.msk [vmem:[%s5584_s1 + $0x18] sm:$0xff] %vm897_vm3, %v2301_v11 }
 0x99a   : > { %v2242_v36 = vpop.xlane.xlu0 %2241  ;;  %v2248_v37 = vpop.xlane.xlu1 %2247 }
 0x99b   : > { %v2300_v38 = vadd.f32 %v2284_v34, %v2242_v36  ;;  %v2302_v39 = vadd.f32 %v2286_v35, %v2248_v37  ;;  %v2424_v34 = vld [vmem:[%s6072_s18 + $0x30] sm:$0xff]  ;;  %v2423_v35 = vld [vmem:[%s6072_s18 + $0x28] sm:$0xff]  ;;  %v2425_v36 = vld [vmem:[%s6072_s18 + $0x38] sm:$0xff] }
 0x99d   : > { %v4566_v42 = vpack.i.bf16 %v2301_v11, %v2300_v38  ;;  %2316 = vst.msk [vmem:[%s5584_s1 + $0x10] sm:$0xff] %vm897_vm3, %v2300_v38  ;;  %2318 = vst.msk [vmem:[%s5584_s1 + $0x20] sm:$0xff] %vm897_vm3, %v2302_v39  ;;  %v2410_v11 = vld [vmem:[%s6071_s17] sm:$0xff] }
 0x99e   : > { %v2251_v43 = vpop.xlane.xlu0 %2250  ;;  %v2254_v44 = vpop.xlane.xlu1 %2253  ;;  %4226 = vmatprep.mubr.f32.mxu1 %v2410_v11 }
 0x99f   : > { %v2303_v45 = vadd.f32 %v2287_v40, %v2251_v43  ;;  %4567 = vperm.xlu0 %4529, %v4566_v42   ;;  %v2304_v46 = vadd.f32 %v2288_v41, %v2254_v44 }
 0x9a1   : > { %2319 = vst.msk [vmem:[%s5584_s1 + $0x28] sm:$0xff] %vm897_vm3, %v2303_v45  ;;  %v4571_v49 = vpack.i.bf16 %v2303_v45, %v2302_v39  ;;  %2320 = vst.msk [vmem:[%s5584_s1 + $0x30] sm:$0xff] %vm897_vm3, %v2304_v46 }
 0x9a2   : > { %v2257_v50 = vpop.xlane.xlu0 %2256  ;;  %v2260_v51 = vpop.xlane.xlu1 %2259 }
 0x9a3   : > { %v2305_v52 = vadd.f32 %v2289_v47, %v2257_v50  ;;  %4572 = vperm.xlu1 %4530, %v4571_v49   ;;  %v2306_v53 = vadd.f32 %v2290_v48, %v2260_v51 }
 0x9a5   : > { %2321 = vst.msk [vmem:[%s5584_s1 + $0x38] sm:$0xff] %vm897_vm3, %v2305_v52  ;;  %v4576_v56 = vpack.i.bf16 %v2305_v52, %v2304_v46  ;;  %2322 = vst.msk [vmem:[%s5584_s1 + $0x40] sm:$0xff] %vm897_vm3, %v2306_v53 }
 0x9a6   : > { %v2263_v57 = vpop.xlane.xlu0 %2262  ;;  %v2266_v58 = vpop.xlane.xlu1 %2265 }
 0x9a7   : > { %v2307_v59 = vadd.f32 %v2291_v54, %v2263_v57  ;;  %4577 = vperm.xlu1 %4530, %v4576_v56   ;;  %v2308_v60 = vadd.f32 %v2292_v55, %v2266_v58 }
 0x9a9   : > { %2323 = vst.msk [vmem:[%s5584_s1 + $0x48] sm:$0xff] %vm897_vm3, %v2307_v59  ;;  %v4581_v6 = vpack.i.bf16 %v2307_v59, %v2306_v53  ;;  %2324 = vst.msk [vmem:[%s5584_s1 + $0x50] sm:$0xff] %vm897_vm3, %v2308_v60 }
 0x9aa   : > { %v2269_v8 = vpop.xlane.xlu0 %2268  ;;  %v2272_v12 = vpop.xlane.xlu1 %2271 }
 0x9ab   : > { %v2309_v14 = vadd.f32 %v2293_v1, %v2269_v8  ;;  %4582 = vperm.xlu0 %4529, %v4581_v6   ;;  %v2310_v15 = vadd.f32 %v2294_v3, %v2272_v12 }
 0x9ad   : > { %2325 = vst.msk [vmem:[%s5584_s1 + $0x58] sm:$0xff] %vm897_vm3, %v2309_v14  ;;  %v4586_v22 = vpack.i.bf16 %v2309_v14, %v2308_v60  ;;  %2326 = vst.msk [vmem:[%s5584_s1 + $0x60] sm:$0xff] %vm897_vm3, %v2310_v15 }
 0x9ae   : > { %v2275_v23 = vpop.xlane.xlu0 %2274  ;;  %v2278_v24 = vpop.xlane.xlu1 %2277 }
 0x9af   : > { %v2311_v25 = vadd.f32 %v2295_v16, %v2275_v23  ;;  %4587 = vperm.xlu1 %4530, %v4586_v22   ;;  %v2312_v61 = vadd.f32 %v2296_v19, %v2278_v24  ;;  %v2411_v19 = vld [vmem:[%s6071_s17 + $0x8] sm:$0xff]  ;;  %v2412_v22 = vld [vmem:[%s6071_s17 + $0x10] sm:$0xff]  ;;  %v2413_v23 = vld [vmem:[%s6071_s17 + $0x18] sm:$0xff] }
 0x9b0   : > { %v2414_v24 = vld [vmem:[%s6071_s17 + $0x20] sm:$0xff] }
 0x9b1   : > { %2327 = vst.msk [vmem:[%s5584_s1 + $0x68] sm:$0xff] %vm897_vm3, %v2311_v25  ;;  %v4591_v29 = vpack.i.bf16 %v2311_v25, %v2310_v15  ;;  %2328 = vst.msk [vmem:[%s5584_s1 + $0x70] sm:$0xff] %vm897_vm3, %v2312_v61  ;;  %v2415_v25 = vld [vmem:[%s6071_s17 + $0x28] sm:$0xff] }
 0x9b2   : > { %v2281_v2 = vpop.xlane.xlu0 %2280 }
 0x9b3   : > { %v2313_v63 = vadd.f32 %v2297_v28, %v2281_v2  ;;  %4592 = vperm.xlu0 %4529, %v4591_v29   ;;  %v2417_v28 = vld [vmem:[%s6071_s17 + $0x38] sm:$0xff]  ;;  %v2661_v29 = vld [vmem:[%s6067_s13] sm:$0xff]  ;;  %v2662_v2 = vld [vmem:[%s6067_s13 + $0x8] sm:$0xff] }
 0x9b5   : > { %2329 = vst.msk [vmem:[%s5584_s1 + $0x78] sm:$0xff] %vm897_vm3, %v2313_v63  ;;  %v4596_v18 = vpack.i.bf16 %v2313_v63, %v2312_v61  ;;  %v2416_v61 = vld [vmem:[%s6071_s17 + $0x30] sm:$0xff]  ;;  %v4433_v63 = vpack.c.bf16 %v2662_v2, %v2661_v29  ;;  %s6143_s1 = sld [smem:[#allocation19_spill]] }
 0x9b7   : > { %2428 = vperm.xlu0 %4529, %v2418_v7   ;;  %4597 = vperm.xlu1 %4530, %v4596_v18  }
 0x9b8   : > { %4434 = vmatpush3.bf16.msra.mxu0 %v4433_v63 }
 0x9bb   : > { %2438 = vperm.xlu0 %4529, %v2420_v30   ;;  %2433 = vperm.xlu1 %4530, %v2419_v31  }
 0x9bf   : > { %2448 = vperm.xlu0 %4529, %v2422_v32   ;;  %2443 = vperm.xlu1 %4530, %v2421_v33  }
 0x9c3   : > { %2458 = vperm.xlu0 %4529, %v2424_v34   ;;  %2453 = vperm.xlu1 %4530, %v2423_v35  }
 0x9c7   : > { %2463 = vperm.xlu1 %4530, %v2425_v36  }
 0xa16   : > { %v4563_v37 = vpop.permute.xlu1 %4562 }
 0xa17   : > { %v4565_v38 = vunpack.i.h.bf16 %v4563_v37  ;;  %v4564_v39 = vunpack.i.l.bf16 %v4563_v37 }
 0xa19   : > { %v4388_v40 = vpack.c.bf16 %v4565_v38, %v4564_v39 }
 0xa1b   : > { %4389 = vmatprep.subr.bf16.mxu1 %v4388_v40 }
 0xa1c   : > { %4391 = vmatpush3.bf16.msra.mxu1 %v4388_v40 }
 0xa1e   : > { %v4568_v41 = vpop.permute.xlu0 %4567 }
 0xa1f   : > { %v4570_v42 = vunpack.i.h.bf16 %v4568_v41  ;;  %v4569_v43 = vunpack.i.l.bf16 %v4568_v41 }
 0xa21   : > { %v4392_v44 = vpack.c.bf16 %v4570_v42, %v4569_v43 }
 0xa22   : > { %v4573_v45 = vpop.permute.xlu1 %4572 }
 0xa23   : > { %v4575_v46 = vunpack.i.h.bf16 %v4573_v45  ;;  %v4574_v47 = vunpack.i.l.bf16 %v4573_v45  ;;  %4393 = vmatprep.subr.bf16.mxu1 %v4392_v44 }
 0xa24   : > { %4395 = vmatpush3.bf16.msra.mxu1 %v4392_v44 }
 0xa25   : > { %v4396_v48 = vpack.c.bf16 %v4575_v46, %v4574_v47 }
 0xa26   : > { %v4578_v49 = vpop.permute.xlu1 %4577 }
 0xa27   : > { %v4580_v50 = vunpack.i.h.bf16 %v4578_v49  ;;  %v4579_v51 = vunpack.i.l.bf16 %v4578_v49  ;;  %4397 = vmatprep.subr.bf16.mxu1 %v4396_v48 }
 0xa28   : > { %4399 = vmatpush3.bf16.msra.mxu1 %v4396_v48 }
 0xa29   : > { %v4400_v52 = vpack.c.bf16 %v4580_v50, %v4579_v51 }
 0xa2a   : > { %v4583_v53 = vpop.permute.xlu0 %4582 }
 0xa2b   : > { %v4585_v54 = vunpack.i.h.bf16 %v4583_v53  ;;  %v4584_v55 = vunpack.i.l.bf16 %v4583_v53  ;;  %4401 = vmatprep.subr.bf16.mxu1 %v4400_v52 }
 0xa2c   : > { %4403 = vmatpush3.bf16.msra.mxu1 %v4400_v52 }
 0xa2d   : > { %v4404_v56 = vpack.c.bf16 %v4585_v54, %v4584_v55 }
 0xa2e   : > { %v4588_v57 = vpop.permute.xlu1 %4587 }
 0xa2f   : > { %v4590_v58 = vunpack.i.h.bf16 %v4588_v57  ;;  %v4589_v59 = vunpack.i.l.bf16 %v4588_v57  ;;  %4405 = vmatprep.subr.bf16.mxu1 %v4404_v56 }
 0xa30   : > { %4407 = vmatpush3.bf16.msra.mxu1 %v4404_v56 }
 0xa31   : > { %v4408_v60 = vpack.c.bf16 %v4590_v58, %v4589_v59  ;;  %v3961_v58 = vld [vmem:[%s6064_s10] ss:$0 sm:$0xff]  ;;  %v3971_v59 = vld [vmem:[%s6064_s10 + $0x5] ss:$0 sm:$0xff] }
 0xa32   : > { %v4593_v1 = vpop.permute.xlu0 %4592  ;;  %2755 = vrot.lane.b32.xlu0 %v3961_v58, %s6136_s3  ;;  %v3028_v58 = vld [vmem:[%s6068_s14 + $0x48] sm:$0xff] }
 0xa33   : > { %v4595_v3 = vunpack.i.h.bf16 %v4593_v1  ;;  %v4594_v6 = vunpack.i.l.bf16 %v4593_v1  ;;  %4409 = vmatprep.subr.bf16.mxu1 %v4408_v60  ;;  %v3975_v1 = vld [vmem:[%s6064_s10 + $0x7] ss:$0 sm:$0xff] }
 0xa34   : > { %4411 = vmatpush3.bf16.msra.mxu1 %v4408_v60  ;;  %v3973_v60 = vld [vmem:[%s6064_s10 + $0x6] ss:$0 sm:$0xff] }
 0xa35   : > { %v4412_v8 = vpack.c.bf16 %v4595_v3, %v4594_v6  ;;  %v3977_v3 = vld [vmem:[%s6064_s10 + $0x8] ss:$0 sm:$0xff] }
 0xa36   : > { %v4598_v12 = vpop.permute.xlu1 %4597  ;;  %v2429_v18 = vpop.permute.xlu0 %2428 }
 0xa37   : > { %v4600_v14 = vunpack.i.h.bf16 %v4598_v12  ;;  %v4599_v15 = vunpack.i.l.bf16 %v4598_v12  ;;  %4413 = vmatprep.subr.bf16.mxu1 %v4412_v8 }
 0xa38   : > { %4415 = vmatpush3.bf16.msra.mxu1 %v4412_v8 }
 0xa39   : > { %v4416_v16 = vpack.c.bf16 %v4600_v14, %v4599_v15 }
 0xa3a   : > { %v2434_v7 = vpop.permute.xlu1 %2433  ;;  %v2439_v32 = vpop.permute.xlu0 %2438 }
 0xa3b   : > { %4417 = vmatprep.subr.bf16.mxu1 %v4416_v16 }
 0xa3c   : > { %4419 = vmatpush3.bf16.msra.mxu1 %v4416_v16 }
 0xa3d   : > { %4420 = vmatprep.subr.bf16.mxu1 %v4757_v26 }
 0xa3e   : > { %v2444_v30 = vpop.permute.xlu1 %2443  ;;  %v2449_v43 = vpop.permute.xlu0 %2448 }
 0xa3f   : > { %4227 = vmatmul.mubr.f32.vlgmr.msra.gmra.mrb[28].mxu1 %v2411_v19 }
 0xa40   : > { %4229 = vmatprep.mubr.f32.mxu1 %v2412_v22 }
 0xa42   : > { %v2454_v40 = vpop.permute.xlu1 %2453  ;;  %v2459_v53 = vpop.permute.xlu0 %2458 }
 0xa43   : > { %4230 = vmatmul.mubr.f32.gmra.mrb[30].mxu1 %v2413_v23  ;;  %v3969_v23 = vld [vmem:[%s6064_s10 + $0x4] ss:$0 sm:$0xff] }
 0xa44   : > { %4232 = vmatprep.mubr.f32.mxu1 %v2414_v24 }
 0xa46   : > { %v2464_v50 = vpop.permute.xlu1 %2463 }
 0xa47   : > { %4233 = vmatmul.mubr.f32.gmra.mrb[32].mxu1 %v2415_v25 }
 0xa48   : > { %4235 = vmatprep.mubr.f32.mxu1 %v2416_v61 }
 0xa4b   : > { %4236 = vmatmul.mubr.f32.gmra.mrb[34].mxu1 %v2417_v28 }
 0xa4c   : > { %4254 = vmatprep.mubr.msk.f32.mxu1 %vm4758_vm7, %v5372_v17  ;;  %vm2781_vm7 = vcmask 982016  }
 0xaa4   : > { %v2756_v14 = vpop.permute.xlu0 %2755 }
 0xaa5   : > { %v2757_v19 = vrot.slane %v2756_v14, 4 }
 0xaa7   : > { %v2759_v28 = vsel %vm2758_vm13, %v2757_v19, %v2756_v14 }
 0xb12   : > { %v4228_v31 = vpop.f32.mrb[28].mxu1 }
 0xb13   : > { %v2538_v33 = vadd.f32 %v4228_v31, %v2434_v7  ;;  %v2532_v11 = vpop.f32.mrb[29].mxu1 }
 0xb14   : > { %v2533_v34 = vadd.f32 %v2532_v11, %v2429_v18 }
 0xb15   : > { %v2581_v35 = vmul.f32 %v2538_v33, %v5452_v62 }
 0xb16   : > { %v2580_v36 = vmul.f32 %v2533_v34, %v5457_v13  ;;  %v4231_v37 = vpop.f32.mrb[30].mxu1 }
 0xb17   : > { %v2548_v38 = vadd.f32 %v4231_v37, %v2444_v30  ;;  %v2542_v39 = vpop.f32.mrb[31].mxu1 }
 0xb18   : > { %v4421_v41 = vpack.c.bf16 %v2581_v35, %v2580_v36  ;;  %v2543_v42 = vadd.f32 %v2542_v39, %v2439_v32 }
 0xb19   : > { %v2583_v44 = vmul.f32 %v2548_v38, %v5464_v9 }
 0xb1a   : > { %v2582_v45 = vmul.f32 %v2543_v42, %v5469_v10  ;;  %v4234_v46 = vpop.f32.mrb[32].mxu1  ;;  %4422 = vmatpush3.bf16.msra.mxu1 %v4421_v41 }
 0xb1b   : > { %v2558_v47 = vadd.f32 %v4234_v46, %v2454_v40  ;;  %v2552_v48 = vpop.f32.mrb[33].mxu1  ;;  %4423 = vmatprep.subr.bf16.mxu1 %v4757_v26 }
 0xb1c   : > { %v4424_v62 = vpack.c.bf16 %v2583_v44, %v2582_v45  ;;  %v2553_v49 = vadd.f32 %v2552_v48, %v2449_v43 }
 0xb1d   : > { %v2585_v13 = vmul.f32 %v2558_v47, %v5476_v20 }
 0xb1e   : > { %v2584_v51 = vmul.f32 %v2553_v49, %v5481_v21  ;;  %v4237_v52 = vpop.f32.mrb[34].mxu1  ;;  %4425 = vmatpush3.bf16.msra.mxu1 %v4424_v62  ;;  %v2571_v21 = vld [vmem:[%s6074_s20] sm:$0xf] }
 0xb1f   : > { %v2568_v54 = vadd.f32 %v4237_v52, %v2464_v50  ;;  %v2562_v9 = vpop.f32.mrb[35].mxu1  ;;  %4426 = vmatprep.subr.bf16.mxu1 %v4757_v26  ;;  %v2924_v49 = vld [vmem:[%s6143_s1] sm:$0xff]  ;;  %v3022_v52 = vld [vmem:[%s6068_s14 + $0x18] sm:$0xff] }
 0xb20   : > { %v4427_v10 = vpack.c.bf16 %v2585_v13, %v2584_v51  ;;  %v2563_v55 = vadd.f32 %v2562_v9, %v2459_v53  ;;  %v2925_v13 = vld [vmem:[%s6143_s1 + $0x8] sm:$0xff]  ;;  %v3019_v53 = vld [vmem:[%s6068_s14] sm:$0xff]  ;;  %v3021_v9 = vld [vmem:[%s6068_s14 + $0x10] sm:$0xff] }
 0xb21   : > { %v2587_v56 = vmul.f32 %v2568_v54, %v5488_v0  ;;  %v3963_v0 = vld [vmem:[%s6064_s10 + $0x1] ss:$0 sm:$0xff]  ;;  %v3020_v51 = vld [vmem:[%s6068_s14 + $0x8] sm:$0xff] }
 0xb22   : > { %v2586_v57 = vmul.f32 %v2563_v55, %v5493_v27  ;;  %4428 = vmatpush3.bf16.msra.mxu1 %v4427_v10  ;;  %2778 = vrot.lane.b32.xlu1 %v3963_v0, %s6135_s27  ;;  %v3967_v27 = vld [vmem:[%s6064_s10 + $0x3] ss:$0 sm:$0xff]  ;;  %v4451_v54 = vpack.c.bf16 %v3022_v52, %v3020_v51  ;;  %v3024_v10 = vld [vmem:[%s6068_s14 + $0x28] sm:$0xff]  ;;  %v3026_v55 = vld [vmem:[%s6068_s14 + $0x38] sm:$0xff] }
 0xb23   : > { %4429 = vmatprep.subr.bf16.mxu1 %v4757_v26  ;;  %v3965_v26 = vld [vmem:[%s6064_s10 + $0x2] ss:$0 sm:$0xff]  ;;  %v3030_v0 = vld [vmem:[%s6068_s14 + $0x58] sm:$0xff]  ;;  %v3984_v52 = vld [vmem:[%s6063_s9 + $0x6] sm:$0x3] }
 0xb24   : > { %v4430_v20 = vpack.c.bf16 %v2587_v56, %v2586_v57  ;;  %2801 = vrot.lane.b32.xlu0 %v3965_v26, %s6134_s29  ;;  %v4453_v56 = vpack.c.bf16 %v3021_v9, %v3019_v53  ;;  %v4455_v57 = vpack.c.bf16 %v3026_v55, %v3024_v10  ;;  %4452 = vmatprep.subr.bf16.mxu0 %v4451_v54  ;;  %v3986_v9 = vld [vmem:[%s6063_s9 + $0xa] sm:$0x3] }
 0xb25   : > { %v3357_v53 = vrot.slane %v3984_v52, %v4895_v4  ;;  %v3361_v54 = vrot.slane %v3984_v52, %v4897_v5  ;;  %v3441_v10 = vrot.slane %v3986_v9, %v4895_v4  ;;  %v3445_v55 = vrot.slane %v3986_v9, %v4897_v5 }
 0xb26   : > { %4431 = vmatpush3.bf16.msra.mxu1 %v4430_v20  ;;  %2824 = vrot.lane.b32.xlu1 %v3967_v27, %s6131_s25  ;;  %v3023_v20 = vld [vmem:[%s6068_s14 + $0x20] sm:$0xff]  ;;  %v4459_v27 = vpack.c.bf16 %v3030_v0, %v3028_v58 }
 0xb28   : > { %2856 = vrot.lane.b32.xlu0 %v3971_v59, %s6133_s28  ;;  %v3027_v59 = vld [vmem:[%s6068_s14 + $0x40] sm:$0xff] }
 0xb29   : > { %4255 = vmatmul.mubr.msk.f32.vlgmr.msra.gmra.mrb[36].mxu1 %vm1389_vm9, %v2571_v21  ;;  %v3025_v21 = vld [vmem:[%s6068_s14 + $0x30] sm:$0xff] }
 0xb2a   : > { %2872 = vrot.lane.b32.xlu1 %v3973_v60, %s6140_s11  ;;  %v4457_v26 = vpack.c.bf16 %v3025_v21, %v3023_v20  ;;  %v3029_v60 = vld [vmem:[%s6068_s14 + $0x50] sm:$0xff]  ;;  %v3988_v21 = vld [vmem:[%s6063_s9 + $0xe] sm:$0x3] }
 0xb2b   : > { %v3561_v58 = vrot.slane %v3988_v21, %v4895_v4  ;;  %v3565_v0 = vrot.slane %v3988_v21, %v4897_v5  ;;  %v3985_v21 = vld [vmem:[%s6063_s9 + $0x8] sm:$0x3] }
 0xb2c   : > { %2888 = vrot.lane.b32.xlu0 %v3975_v1, %s6141_s24  ;;  %v4461_v1 = vpack.c.bf16 %v3029_v60, %v3027_v59 }
 0xb2e   : > { %2904 = vrot.lane.b32.xlu1 %v3977_v3, %s6142_s2 }
 0xb94   : > { %v2779_v16 = vpop.permute.xlu1 %2778 }
 0xb95   : > { %v2780_v22 = vrot.slane %v2779_v16, 4 }
 0xb96   : > { %v2802_v24 = vpop.permute.xlu0 %2801 }
 0xb97   : > { %v2782_v29 = vsel %vm2781_vm7, %v2780_v22, %v2779_v16 }
 0xb98   : > { %v2825_v30 = vpop.permute.xlu1 %2824 }
 0xb99   : > { %v2826_v32 = vrot.slane %v2825_v30, 4 }
 0xb9a   : > { %v2857_v37 = vpop.permute.xlu0 %2856 }
 0xb9b   : > { %v2827_v34 = vsel %vm882_vm4, %v2826_v32, %v2825_v30 }
 0xb9c   : > { %v2873_v39 = vpop.permute.xlu1 %2872 }
 0xb9e   : > { %v2889_v43 = vpop.permute.xlu0 %2888 }
 0xba0   : > { %v2905_v46 = vpop.permute.xlu1 %2904 }
 0xbfc   : > { %v2657_v6 = vpop.f32.mrb[36].mxu1 }
 0xbfd   : > { %4262 = vmatmul.mubr.msk.f32.vlgmr.msra.gmra.mrb[8].mxu0 %vm819_vm6, %v2657_v6  ;;  %v4256_v8 = vpop.f32.mrb[37].mxu1 }
 0xbfe   : > { %3105 = vmatprep.mubr.f32.mxu0 %v5372_v17  ;;  %v2803_v17 = vrot.slane %v2802_v24, 4  ;;  %4454 = vmatpush1.bf16.msra.mxu0 %v4453_v56  ;;  %v3987_v56 = vld [vmem:[%s6063_s9 + $0xc] sm:$0x3] }
 0xbff   : > { %4456 = vmatprep.subr.bf16.mxu0 %v4455_v57  ;;  %v3501_v57 = vrot.slane %v3987_v56, %v4895_v4  ;;  %v3505_v20 = vrot.slane %v3987_v56, %v4897_v5 }
 0xc00   : > { %v2805_v31 = vsel %vm2804_vm14, %v2803_v17, %v2802_v24 }
 0xc02   : > { %4458 = vmatpush1.bf16.msra.mxu0 %v4457_v26  ;;  %v3989_v26 = vld [vmem:[%s6063_s9 + $0x10] sm:$0x3] }
 0xc03   : > { %4460 = vmatprep.subr.bf16.mxu0 %v4459_v27  ;;  %v3621_v27 = vrot.slane %v3989_v26, %v4895_v4  ;;  %v3625_v59 = vrot.slane %v3989_v26, %v4897_v5 }
 0xc06   : > { %4462 = vmatpush1.bf16.msra.mxu0 %v4461_v1 }
 0xcd0   : > { %v2732_v12 = vpop.f32.mrb[8].mxu0 }
 0xcd1   : > { %2738 = vst.msk [vmem:[#allocation8 + $0x4] sm:$0xf] %vm1774_vm15, %v2732_v12  ;;  %v4263_v15 = vpop.f32.mrb[9].mxu0 }
 0xcd8   : > { %v2839_v25 = vld [vmem:[#allocation8 + $0x4] sm:$0xf] }
 0xcd9   : > { %v2748_v61 = vld [vmem:[#allocation8] sm:$0xff]  ;;  %v2847_v2 = vmul.f32 %v3969_v23, %v2839_v25 }
 0xcda   : > { %v2761_v63 = vmul.f32 %v2759_v28, %v2748_v61  ;;  %v2784_v18 = vmul.f32 %v2782_v29, %v2748_v61  ;;  %v2807_v11 = vmul.f32 %v2805_v31, %v2748_v61  ;;  %v2829_v36 = vmul.f32 %v2827_v34, %v2748_v61  ;;  %v2849_v38 = vld [vmem:[#allocation8 + $0x4] sm:$0xf] }
 0xcdb   : > { %2848 = vst.msk [vmem:[#allocation9 + $0x20] sm:$0xf] %vm1774_vm15, %v2847_v2  ;;  %v2865_v41 = vld [vmem:[#allocation8 + $0x4] sm:$0xf]  ;;  %v2859_v42 = vmul.f32 %v2857_v37, %v2849_v38 }
 0xcdc   : > { %v2763_v7 = vcombine.high %v2761_v63, %v2761_v63  ;;  %2764 = vrot.lane.b32.xlu0 %v2761_v63, %s6142_s2  ;;  %v2786_v33 = vcombine.high %v2784_v18, %v2784_v18  ;;  %v2809_v35 = vcombine.high %v2807_v11, %v2807_v11  ;;  %v2831_v40 = vcombine.high %v2829_v36, %v2829_v36  ;;  %v2881_v44 = vld [vmem:[#allocation8 + $0x4] sm:$0xf] }
 0xcdd   : > { %v2875_v45 = vmul.f32 %v2873_v39, %v2865_v41  ;;  %v2897_v47 = vld [vmem:[#allocation8 + $0x4] sm:$0xf]  ;;  %v2891_v48 = vmul.f32 %v2889_v43, %v2881_v44  ;;  %v3033_v43 = vld [vmem:[%s6068_s14 + $0x70] sm:$0xff] }
 0xcde   : > { %2766 = vrot.lane.b32.xlu1 %v2763_v7, %s6142_s2  ;;  %v2907_v62 = vmul.f32 %v2905_v46, %v2897_v47  ;;  %s6144_s2 = sld [smem:[#allocation18_spill]]  ;;  %v3032_v39 = vld [vmem:[%s6068_s14 + $0x68] sm:$0xff]  ;;  %v3982_v46 = vld [vmem:[%s6063_s9 + $0x2] sm:$0x3] }
 0xce0   : > { %2787 = vrot.lane.b32.xlu0 %v2784_v18, %s6141_s24 }
 0xce2   : > { %2789 = vrot.lane.b32.xlu1 %v2786_v33, %s6141_s24  ;;  %v2919_v32 = vld [vmem:[#allocation9 + $0x20] sm:$0xff]  ;;  %s6146_s24 = smov 113  }
 0xce4   : > { %2810 = vrot.lane.b32.xlu0 %v2807_v11, %s6140_s11  ;;  %v2913_v50 = vld [vmem:[%s6144_s2] sm:$0xff]  ;;  %v2914_v38 = vld [vmem:[%s6144_s2 + $0x8] sm:$0xff] }
 0xce5   : > { %4282 = vmatprep.mubr.msk.f32.mxu1 %vm1104_vm8, %v2913_v50 }
 0xce6   : > { %2812 = vrot.lane.b32.xlu1 %v2809_v35, %s6140_s11 }
 0xce8   : > { %2832 = vrot.lane.b32.xlu0 %v2829_v36, %s6133_s28 }
 0xcea   : > { %2834 = vrot.lane.b32.xlu1 %v2831_v40, %s6133_s28  ;;  %v3034_v40 = vld [vmem:[%s6068_s14 + $0x78] sm:$0xff] }
 0xceb   : > { %v4463_v41 = vpack.c.bf16 %v3034_v40, %v3032_v39 }
 0xcec   : > { %2861 = vrot.lane.b32.xlu0 %v2859_v42, %s6131_s25  ;;  %v3031_v42 = vld [vmem:[%s6068_s14 + $0x60] sm:$0xff] }
 0xced   : > { %v4465_v44 = vpack.c.bf16 %v3033_v43, %v3031_v42  ;;  %4464 = vmatprep.subr.bf16.mxu0 %v4463_v41 }
 0xcee   : > { %2877 = vrot.lane.b32.xlu1 %v2875_v45, %s6134_s29  ;;  %v3172_v45 = vld [vmem:[%s6063_s9] sm:$0x3]  ;;  %s6148_s29 = smov 16  }
 0xcef   : > { %4466 = vmatpush1.bf16.msra.mxu0 %v4465_v44  ;;  %v3177_v47 = vrot.slane %v3172_v45, %v4895_v4 }
 0xcf0   : > { %2893 = vrot.lane.b32.xlu0 %v2891_v48, %s6135_s27  ;;  %v3181_v48 = vrot.slane %v3172_v45, %v4897_v5  ;;  %s6149_s27 = smov 17  }
 0xcf2   : > { %2909 = vrot.lane.b32.xlu1 %v2907_v62, %s6136_s3  ;;  %v3237_v62 = vrot.slane %v3982_v46, %v4895_v4  ;;  %s6151_s3 = sld [smem:[#allocation20_spill]] }
 0xcf4   : > { %2928 = vperm.xlu0 %4529, %v2924_v49   ;;  %v3241_v49 = vrot.slane %v3982_v46, %v4897_v5 }
 0xcf6   : > { %2933 = vperm.xlu1 %4530, %v2925_v13   ;;  %v3983_v13 = vld [vmem:[%s6063_s9 + $0x4] sm:$0x3] }
 0xcf7   : > { %v3297_v50 = vrot.slane %v3983_v13, %v4895_v4  ;;  %v3301_v51 = vrot.slane %v3983_v13, %v4897_v5 }
 0xcf8   : > { %3182 = vrot.lane.b32.xlu0 %v3177_v47, %s6145_s5 }
 0xcfa   : > { %3184 = vrot.lane.b32.xlu1 %v3181_v48, %s6145_s5 }
 0xcfc   : > { %3242 = vrot.lane.b32.xlu0 %v3237_v62, %s6132_s6 }
 0xcfe   : > { %3244 = vrot.lane.b32.xlu1 %v3241_v49, %s6132_s6 }
 0xd00   : > { %3302 = vrot.lane.b32.xlu0 %v3297_v50, %s6146_s24 }
 0xd02   : > { %3304 = vrot.lane.b32.xlu1 %v3301_v51, %s6146_s24 }
 0xd04   : > { %3362 = vrot.lane.b32.xlu0 %v3357_v53, %s6131_s25 }
 0xd06   : > { %3364 = vrot.lane.b32.xlu1 %v3361_v54, %s6131_s25 }
 0xd08   : > { %3446 = vrot.lane.b32.xlu0 %v3441_v10, %s6133_s28 }
 0xd0a   : > { %3448 = vrot.lane.b32.xlu1 %v3445_v55, %s6133_s28 }
 0xd0c   : > { %3506 = vrot.lane.b32.xlu0 %v3501_v57, %s6147_s4 }
 0xd0e   : > { %3508 = vrot.lane.b32.xlu1 %v3505_v20, %s6147_s4 }
 0xd10   : > { %3566 = vrot.lane.b32.xlu0 %v3561_v58, %s6148_s29 }
 0xd12   : > { %3568 = vrot.lane.b32.xlu1 %v3565_v0, %s6148_s29 }
 0xd14   : > { %3626 = vrot.lane.b32.xlu0 %v3621_v27, %s6149_s27 }
 0xd16   : > { %3628 = vrot.lane.b32.xlu1 %v3625_v59, %s6149_s27 }
 0xd4e   : > { %v2765_v3 = vpop.permute.xlu0 %2764 }
 0xd50   : > { %v2767_v6 = vpop.permute.xlu1 %2766 }
 0xd51   : > { %v2768_v8 = vsel %vm1443_vm10, %v2765_v3, %v2767_v6 }
 0xd52   : > { %2770 = vst.msk [vmem:[#allocation9] sm:$0xf] %vm1774_vm15, %v2768_v8  ;;  %v2788_v12 = vpop.permute.xlu0 %2787 }
 0xd54   : > { %v2790_v14 = vpop.permute.xlu1 %2789 }
 0xd55   : > { %v2791_v15 = vsel %vm1480_vm11, %v2788_v12, %v2790_v14 }
 0xd56   : > { %2793 = vst.msk [vmem:[#allocation9 + $0x8] sm:$0xf] %vm1774_vm15, %v2791_v15  ;;  %v2811_v16 = vpop.permute.xlu0 %2810 }
 0xd58   : > { %v2813_v19 = vpop.permute.xlu1 %2812 }
 0xd59   : > { %v2814_v22 = vsel %vm1517_vm12, %v2811_v16, %v2813_v19  ;;  %v2915_v61 = vld [vmem:[#allocation9] sm:$0xff] }
 0xd5a   : > { %2816 = vst.msk [vmem:[#allocation9 + $0x10] sm:$0xf] %vm1774_vm15, %v2814_v22  ;;  %v2833_v23 = vpop.permute.xlu0 %2832 }
 0xd5c   : > { %v2835_v24 = vpop.permute.xlu1 %2834 }
 0xd5d   : > { %v2836_v25 = vsel %vm897_vm3, %v2833_v23, %v2835_v24  ;;  %v2916_v28 = vld [vmem:[#allocation9 + $0x8] sm:$0xff] }
 0xd5e   : > { %2838 = vst.msk [vmem:[#allocation9 + $0x18] sm:$0xf] %vm1774_vm15, %v2836_v25  ;;  %v2862_v29 = vpop.permute.xlu0 %2861  ;;  %v4435_v17 = vpack.c.bf16 %v2916_v28, %v2915_v61  ;;  %v4732_v25 = vld [vmem:[#allocation5] sm:$0xff] }
 0xd5f   : > { %2864 = vst.msk [vmem:[#allocation9 + $0x28] sm:$0xf] %vm1774_vm15, %v2862_v29 }
 0xd60   : > { %4436 = vmatprep.subr.bf16.mxu1 %v4435_v17  ;;  %v2878_v2 = vpop.permute.xlu1 %2877 }
 0xd61   : > { %2880 = vst.msk [vmem:[#allocation9 + $0x30] sm:$0xf] %vm1774_vm15, %v2878_v2  ;;  %4438 = vmatpush3.bf16.msra.mxu1 %v4435_v17  ;;  %v2917_v18 = vld [vmem:[#allocation9 + $0x10] sm:$0xff] }
 0xd62   : > { %v2894_v63 = vpop.permute.xlu0 %2893 }
 0xd63   : > { %2896 = vst.msk [vmem:[#allocation9 + $0x38] sm:$0xf] %vm1774_vm15, %v2894_v63 }
 0xd64   : > { %v2910_v7 = vpop.permute.xlu1 %2909 }
 0xd65   : > { %2912 = vst.msk [vmem:[#allocation9 + $0x40] sm:$0xf] %vm1774_vm15, %v2910_v7  ;;  %v2918_v30 = vld [vmem:[#allocation9 + $0x18] sm:$0xff] }
 0xd66   : > { %v4439_v31 = vpack.c.bf16 %v2918_v30, %v2917_v18  ;;  %v2920_v33 = vld [vmem:[#allocation9 + $0x28] sm:$0xff] }
 0xd67   : > { %v4443_v11 = vpack.c.bf16 %v2920_v33, %v2919_v32 }
 0xd68   : > { %4440 = vmatprep.subr.bf16.mxu1 %v4439_v31  ;;  %v2921_v34 = vld [vmem:[#allocation9 + $0x30] sm:$0xff] }
 0xd69   : > { %4442 = vmatpush3.bf16.msra.mxu1 %v4439_v31 }
 0xd6a   : > { %4444 = vmatprep.subr.bf16.mxu1 %v4443_v11  ;;  %v2922_v35 = vld [vmem:[#allocation9 + $0x38] sm:$0xff] }
 0xd6b   : > { %v4447_v36 = vpack.c.bf16 %v2922_v35, %v2921_v34 }
 0xd6c   : > { %v2923_v37 = vld [vmem:[#allocation9 + $0x40] sm:$0xff] }
 0xd6d   : > { %4446 = vmatpush3.bf16.msra.mxu1 %v4443_v11 }
 0xd6e   : > { %4448 = vmatprep.subr.bf16.mxu1 %v4447_v36 }
 0xd71   : > { %4450 = vmatpush3.bf16.msra.mxu1 %v4447_v36 }
 0xd72   : > { %4280 = vmatprep.subr.mxu1 %v2923_v37 }
 0xd73   : > { %v2929_v60 = vpop.permute.xlu0 %2928 }
 0xd75   : > { %4281 = vmatpush3.msra.mxu1 %v2923_v37  ;;  %v2934_v15 = vpop.permute.xlu1 %2933 }
 0xd76   : > { %4283 = vmatmul.mubr.msk.f32.vlgmr.msra.gmra.mrb[38].mxu1 %vm1104_vm8, %v2914_v38  ;;  %vm6150_vm8 = vcmask 138240  }
 0xd77   : > { %v3183_v1 = vpop.permute.xlu0 %3182  ;;  %vm6153_vm10 = vmmov %vm6150_vm8 }
 0xd78   : > { %v3190_v6 = vmul.f32 0.0, %v3183_v1  ;;  %vm6154_vm11 = vmmov %vm6150_vm8 }
 0xd79   : > { %v3185_v2 = vpop.permute.xlu1 %3184  ;;  %vm6155_vm12 = vmmov %vm6150_vm8 }
 0xd7a   : > { %v4601_v14 = vpack.i.bf16 %v3190_v6, %v3190_v6  ;;  %v3186_v34 = vsel %vm765_vm0, %v3183_v1, %v3185_v2 }
 0xd7b   : > { %v3243_v16 = vpop.permute.xlu0 %3242 }
 0xd7c   : > { %v3250_v23 = vmul.f32 0.0, %v3243_v16  ;;  %4602 = vrot.lane.b32.xlu0 %v4601_v14, %s6149_s27 }
 0xd7d   : > { %v3245_v63 = vpop.permute.xlu1 %3244 }
 0xd7e   : > { %v4606_v24 = vpack.i.bf16 %v3250_v23, %v3250_v23  ;;  %v3246_v35 = vsel %vm804_vm2, %v3243_v16, %v3245_v63  ;;  %v3415_v16 = vrot.slane %v3985_v21, %v4895_v4 }
 0xd7f   : > { %v3303_v61 = vpop.permute.xlu0 %3302 }
 0xd80   : > { %v3310_v29 = vmul.f32 0.0, %v3303_v61  ;;  %4607 = vrot.lane.b32.xlu1 %v4606_v24, %s6148_s29 }
 0xd81   : > { %v3305_v18 = vpop.permute.xlu1 %3304 }
 0xd82   : > { %v4611_v17 = vpack.i.bf16 %v3310_v29, %v3310_v29  ;;  %v3306_v32 = vsel %vm843_vm1, %v3303_v61, %v3305_v18 }
 0xd83   : > { %v5919_v7 = vpop.permute.xlu0 %3362 }
 0xd84   : > { %4612 = vrot.lane.b32.xlu0 %v4611_v17, %s6147_s4 }
 0xd85   : > { %v3365_v31 = vpop.permute.xlu1 %3364 }
 0xd86   : > { %v3366_v33 = vsel %vm882_vm4, %v5919_v7, %v3365_v31 }
 0xd87   : > { %v3447_v30 = vpop.permute.xlu0 %3446 }
 0xd89   : > { %v3449_v58 = vpop.permute.xlu1 %3448 }
 0xd8a   : > { %v3450_v59 = vsel %vm897_vm3, %v3447_v30, %v3449_v58 }
 0xd8b   : > { %v5924_v11 = vpop.permute.xlu0 %3506 }
 0xd8f   : > { %v3567_v46 = vpop.permute.xlu0 %3566 }
 0xe49   : > { %v4284_v3 = vpop.f32.mrb[38].mxu1 }
 0xe4a   : > { %v3008_v8 = vpop.f32.mrb[39].mxu1  ;;  %v3014_v19 = vadd.f32 %v4284_v3, %v2934_v15  ;;  %v3627_v3 = vpop.permute.xlu0 %3626 }
 0xe4b   : > { %v3009_v12 = vadd.f32 %v3008_v8, %v2929_v60 }
 0xe4c   : > { %v3018_v28 = vmax.f32 %v3014_v19, 0.0  ;;  %v3456_v19 = vmul.f32 0.0, %v3449_v58 }
 0xe4d   : > { %v3017_v22 = vmax.f32 %v3009_v12, 0.0  ;;  %v3419_v12 = vrot.slane %v3985_v21, %v4897_v5 }
 0xe4f   : > { %3980 = vmatmul.mubr.msk.f32.vlgmr.msra.gmra.mrb[10].mxu0 %vm1389_vm9, %v3017_v22 }
 0xe50   : > { %3111 = vmatprep.mubr.f32.mxu0 %v4732_v25 }
 0xe53   : > { %3981 = vmatmul.mubr.msk.f32.gmra.mrb[12].mxu0 %vm1389_vm9, %v3018_v28  ;;  %v3509_v28 = vpop.permute.xlu1 %3508  ;;  %vm6152_vm9 = vmmov %vm6150_vm8 }
 0xf22   : > { %v3107_v36 = vpop.f32.mrb[10].mxu0 }
 0xf23   : > { %v5928_v37 = vpop.f32.mrb[11].mxu0  ;;  %v3251_v38 = vmul.f32 %v3246_v35, %v3107_v36  ;;  %v3191_v39 = vmul.f32 %v3186_v34, %v3107_v36  ;;  %v3311_v40 = vmul.f32 %v3306_v32, %v3107_v36  ;;  %v3371_v41 = vmul.f32 %v3366_v33, %v3107_v36 }
 0xf24   : > { %v3252_v42 = vmul.f32 %v3245_v63, %v5928_v37  ;;  %v3192_v43 = vmul.f32 %v3185_v2, %v5928_v37  ;;  %v3312_v44 = vmul.f32 %v3305_v18, %v5928_v37  ;;  %v3372_v45 = vmul.f32 %v3365_v31, %v5928_v37 }
 0xf25   : > { %v3454_v57 = vmul.f32 %v3447_v30, %v3107_v36  ;;  %v3514_v6 = vmul.f32 %v5924_v11, %v3107_v36  ;;  %v3574_v14 = vmul.f32 %v3567_v46, %v3107_v36  ;;  %v3455_v22 = vmul.f32 %v3450_v59, %v5928_v37 }
 0xf26   : > { %v3113_v47 = vpop.f32.mrb[12].mxu0  ;;  %v4621_v48 = vpack.i.bf16 %v3252_v42, %v3251_v38  ;;  %v4616_v62 = vpack.i.bf16 %v3192_v43, %v3191_v39  ;;  %v4626_v49 = vpack.i.bf16 %v3312_v44, %v3311_v40  ;;  %v4636_v13 = vpack.i.bf16 %v3372_v45, %v3371_v41 }
 0xf27   : > { %v5934_v50 = vpop.f32.mrb[13].mxu0  ;;  %v3194_v51 = vmul.f32 %v3186_v34, %v3113_v47  ;;  %v3254_v52 = vmul.f32 %v3246_v35, %v3113_v47  ;;  %v3314_v53 = vmul.f32 %v3306_v32, %v3113_v47  ;;  %v3374_v55 = vmul.f32 %v3366_v33, %v3113_v47  ;;  %v3569_v35 = vpop.permute.xlu1 %3568 }
 0xf28   : > { %4622 = vrot.lane.b32.xlu1 %v4621_v48, %s6148_s29  ;;  %4617 = vrot.lane.b32.xlu0 %v4616_v62, %s6149_s27  ;;  %v3195_v54 = vmul.f32 %v3185_v2, %v5934_v50  ;;  %v3255_v9 = vmul.f32 %v3245_v63, %v5934_v50  ;;  %v3315_v10 = vmul.f32 %v3305_v18, %v5934_v50  ;;  %v3370_v63 = vmul.f32 0.0, %v5919_v7 }
 0xf29   : > { %v3375_v56 = vmul.f32 %v3365_v31, %v5934_v50  ;;  %v3457_v20 = vmul.f32 %v3447_v30, %v3113_v47  ;;  %v3517_v8 = vmul.f32 %v5924_v11, %v3113_v47  ;;  %v3577_v15 = vmul.f32 %v3567_v46, %v3113_v47 }
 0xf2a   : > { %v4631_v0 = vpack.i.bf16 %v3195_v54, %v3194_v51  ;;  %v4641_v26 = vpack.i.bf16 %v3255_v9, %v3254_v52  ;;  %v4646_v27 = vpack.i.bf16 %v3315_v10, %v3314_v53  ;;  %v3634_v25 = vmul.f32 %v3627_v3, %v3107_v36  ;;  %v5996_v51 = vld [vmem:[%s6151_s3] sm:$0x77] }
 0xf2b   : > { %v4661_v60 = vpack.i.bf16 %v3375_v56, %v3374_v55  ;;  %v4666_v1 = vpack.i.bf16 %v3457_v20, %v3454_v57  ;;  %v4681_v23 = vpack.i.bf16 %v3517_v8, %v3514_v6  ;;  %v4696_v24 = vpack.i.bf16 %v3577_v15, %v3574_v14  ;;  %v3629_v44 = vpop.permute.xlu1 %3628 }
 0xf2c   : > { %4627 = vrot.lane.b32.xlu0 %v4626_v49, %s6147_s4  ;;  %4632 = vrot.lane.b32.xlu1 %v4631_v0, %s6149_s27  ;;  %v3637_v61 = vmul.f32 %v3627_v3, %v3113_v47  ;;  %v5956_v29 = vmul.f32 %v3419_v12, %v5928_v37  ;;  %v5959_v5 = vmul.f32 %v3419_v12, %v5934_v50  ;;  %v3516_v34 = vmul.f32 0.0, %v3509_v28 }
 0xf2d   : > { %v5961_v4 = vmul.f32 %v3415_v16, %v3107_v36  ;;  %v5963_v2 = vmul.f32 %v3415_v16, %v3113_v47  ;;  %v4656_v18 = vpack.i.bf16 %v3456_v19, %v3455_v22  ;;  %v3510_v31 = vsel %vm858_vm5, %v5924_v11, %v3509_v28 }
 0xf2e   : > { %v4716_v17 = vpack.i.bf16 %v3637_v61, %v3634_v25  ;;  %v4483_v30 = vpack.c.bf16 %v5959_v5, %v5956_v29  ;;  %v4651_v33 = vpack.i.bf16 %v3370_v63, %v3370_v63  ;;  %v3515_v36 = vmul.f32 %v3510_v31, %v5928_v37 }
 0xf2f   : > { %v4485_v32 = vpack.c.bf16 %v5963_v2, %v5961_v4  ;;  %v3570_v7 = vsel %vm819_vm6, %v3567_v46, %v3569_v35  ;;  %v3576_v38 = vmul.f32 0.0, %v3569_v35  ;;  %v3458_v40 = vmul.f32 %v3450_v59, %v5934_v50  ;;  %v4608_v10 = vpop.permute.xlu1 %4607 }
 0xf30   : > { %4642 = vrot.lane.b32.xlu0 %v4641_v26, %s6148_s29  ;;  %4637 = vrot.lane.b32.xlu1 %v4636_v13, %s6133_s28  ;;  %v4671_v11 = vpack.i.bf16 %v3516_v34, %v3515_v36  ;;  %v3575_v39 = vmul.f32 %v3570_v7, %v5928_v37  ;;  %v3518_v43 = vmul.f32 %v3510_v31, %v5934_v50  ;;  %v3636_v48 = vmul.f32 0.0, %v3629_v44 }
 0xf31   : > { %v4676_v42 = vpack.i.bf16 %v3456_v19, %v3458_v40  ;;  %v3578_v46 = vmul.f32 %v3570_v7, %v5934_v50  ;;  %v3630_v47 = vsel %vm6150_vm8, %v3627_v3, %v3629_v44  ;;  %v3714_v52 = vcombine.high %v5996_v51, %v5996_v51 }
 0xf32   : > { %v4686_v41 = vpack.i.bf16 %v3576_v38, %v3575_v39  ;;  %v4691_v45 = vpack.i.bf16 %v3516_v34, %v3518_v43  ;;  %v3638_v49 = vmul.f32 %v3630_v47, %v5934_v50  ;;  %v3635_v13 = vmul.f32 %v3630_v47, %v5928_v37  ;;  %v3707_v37 = vld [vmem:[%s6062_s8] sm:$0x7]  ;;  %v4603_v50 = vpop.permute.xlu0 %4602 }
 0xf33   : > { %v4701_v62 = vpack.i.bf16 %v3576_v38, %v3578_v46  ;;  %3990 = vmatprep.mubr.msk.f32.mxu0 %vm819_vm6, %v3714_v52  ;;  %v4605_v0 = vunpack.i.h.bf16 %v4603_v50  ;;  %v4604_v26 = vunpack.i.l.bf16 %v4603_v50  ;;  %v4610_v22 = vunpack.i.h.bf16 %v4608_v10 }
 0xf34   : > { %4657 = vrot.lane.b32.xlu0 %v4656_v18, %s6131_s25  ;;  %4647 = vrot.lane.b32.xlu1 %v4646_v27, %s6147_s4  ;;  %v4711_v53 = vpack.i.bf16 %v3636_v48, %v3638_v49  ;;  %v4706_v54 = vpack.i.bf16 %v3636_v48, %v3635_v13 }
 0xf36   : > { %v4613_v9 = vpop.permute.xlu0 %4612 }
 0xf37   : > { %v4615_v38 = vunpack.i.h.bf16 %v4613_v9 }
 0xf38   : > { %4662 = vrot.lane.b32.xlu0 %v4661_v60, %s6133_s28  ;;  %4652 = vrot.lane.b32.xlu1 %v4651_v33, %s6133_s28  ;;  %v4614_v33 = vunpack.i.l.bf16 %v4613_v9 }
 0xf3c   : > { %4667 = vrot.lane.b32.xlu0 %v4666_v1, %s6131_s25  ;;  %4672 = vrot.lane.b32.xlu1 %v4671_v11, %s6146_s24 }
 0xf40   : > { %4687 = vrot.lane.b32.xlu0 %v4686_v41, %s6132_s6  ;;  %4677 = vrot.lane.b32.xlu1 %v4676_v42, %s6131_s25 }
 0xf44   : > { %4692 = vrot.lane.b32.xlu0 %v4691_v45, %s6146_s24  ;;  %4682 = vrot.lane.b32.xlu1 %v4681_v23, %s6146_s24  ;;  %v4609_v23 = vunpack.i.l.bf16 %v4608_v10 }
 0xf48   : > { %4697 = vrot.lane.b32.xlu0 %v4696_v24, %s6132_s6  ;;  %4702 = vrot.lane.b32.xlu1 %v4701_v62, %s6132_s6  ;;  %s6156_s6 = sshll.u32 %s6159_s7, 2 }
 0xf49   : > { %s725_s26 = scalar_lea.vmem %s6077_s23, %s6156_s6 }
 0xf4c   : > { %4712 = vrot.lane.b32.xlu0 %v4711_v53, %s6145_s5  ;;  %4707 = vrot.lane.b32.xlu1 %v4706_v54, %s6145_s5 }
 0xf50   : > { %3710 = vperm.xlu0 %4529, %v3707_v37   ;;  %4717 = vrot.lane.b32.xlu1 %v4716_v17, %s6145_s5 }
 0xf9a   : > { %v4623_v55 = vpop.permute.xlu1 %4622  ;;  %v4618_v56 = vpop.permute.xlu0 %4617 }
 0xf9b   : > { %v4620_v57 = vunpack.i.h.bf16 %v4618_v56  ;;  %v4619_v20 = vunpack.i.l.bf16 %v4618_v56  ;;  %v4625_v60 = vunpack.i.h.bf16 %v4623_v55  ;;  %v4624_v1 = vunpack.i.l.bf16 %v4623_v55 }
 0xf9d   : > { %v3214_v3 = vsel %vm6152_vm9, %v4604_v26, %v4619_v20  ;;  %v3215_v8 = vsel %vm6154_vm11, %v4619_v20, %v4620_v57  ;;  %v3274_v17 = vsel %vm819_vm6, %v4609_v23, %v4624_v1  ;;  %v3275_v18 = vsel %vm819_vm6, %v4624_v1, %v4625_v60 }
 0xf9e   : > { %v4628_v21 = vpop.permute.xlu0 %4627  ;;  %v4633_v58 = vpop.permute.xlu1 %4632 }
 0xf9f   : > { %v4635_v27 = vunpack.i.h.bf16 %v4633_v58  ;;  %v4634_v59 = vunpack.i.l.bf16 %v4633_v58  ;;  %v4630_v61 = vunpack.i.h.bf16 %v4628_v21  ;;  %v4629_v28 = vunpack.i.l.bf16 %v4628_v21 }
 0xfa1   : > { %v3216_v6 = vsel %vm6153_vm10, %v4605_v0, %v4634_v59  ;;  %v3217_v12 = vsel %vm6155_vm12, %v4634_v59, %v4635_v27  ;;  %v3334_v40 = vsel %vm858_vm5, %v4614_v33, %v4629_v28  ;;  %v3335_v41 = vsel %vm858_vm5, %v4629_v28, %v4630_v61 }
 0xfa2   : > { %v4469_v14 = vpack.c.bf16 %v3216_v6, %v3214_v3  ;;  %v4643_v15 = vpop.permute.xlu0 %4642  ;;  %v4638_v16 = vpop.permute.xlu1 %4637  ;;  %v4467_v19 = vpack.c.bf16 %v3217_v12, %v3215_v8 }
 0xfa3   : > { %v4645_v24 = vunpack.i.h.bf16 %v4643_v15  ;;  %v4644_v25 = vunpack.i.l.bf16 %v4643_v15  ;;  %v4640_v42 = vunpack.i.h.bf16 %v4638_v16  ;;  %v4639_v43 = vunpack.i.l.bf16 %v4638_v16 }
 0xfa4   : > { %4468 = vmatprep.subr.bf16.mxu0 %v4467_v19 }
 0xfa5   : > { %v3276_v63 = vsel %vm819_vm6, %v4610_v22, %v4644_v25  ;;  %4470 = vmatpush1.bf16.msra.mxu0 %v4469_v14  ;;  %v3277_v31 = vsel %vm819_vm6, %v4644_v25, %v4645_v24  ;;  %v3395_v50 = vsel %vm897_vm3, %v4639_v43, %v4640_v42 }
 0xfa6   : > { %v4473_v34 = vpack.c.bf16 %v3276_v63, %v3274_v17  ;;  %v4658_v35 = vpop.permute.xlu0 %4657  ;;  %v4648_v36 = vpop.permute.xlu1 %4647  ;;  %v4471_v7 = vpack.c.bf16 %v3277_v31, %v3275_v18 }
 0xfa7   : > { %v4650_v11 = vunpack.i.h.bf16 %v4648_v36  ;;  %v4649_v39 = vunpack.i.l.bf16 %v4648_v36  ;;  %v4660_v20 = vunpack.i.h.bf16 %v4658_v35  ;;  %v4659_v21 = vunpack.i.l.bf16 %v4658_v35 }
 0xfa8   : > { %4472 = vmatprep.subr.bf16.mxu0 %v4471_v7 }
 0xfa9   : > { %v3336_v44 = vsel %vm858_vm5, %v4615_v38, %v4649_v39  ;;  %4474 = vmatpush1.bf16.msra.mxu0 %v4473_v34  ;;  %v3337_v45 = vsel %vm858_vm5, %v4649_v39, %v4650_v11  ;;  %v3479_v12 = vsel %vm882_vm4, %v4659_v21, %v4660_v20 }
 0xfaa   : > { %v4477_v46 = vpack.c.bf16 %v3336_v44, %v3334_v40  ;;  %v4663_v47 = vpop.permute.xlu0 %4662  ;;  %v4653_v48 = vpop.permute.xlu1 %4652  ;;  %v4475_v62 = vpack.c.bf16 %v3337_v45, %v3335_v41 }
 0xfab   : > { %v4665_v49 = vunpack.i.h.bf16 %v4663_v47  ;;  %v4664_v13 = vunpack.i.l.bf16 %v4663_v47  ;;  %v4655_v52 = vunpack.i.h.bf16 %v4653_v48  ;;  %v4654_v53 = vunpack.i.l.bf16 %v4653_v48 }
 0xfac   : > { %4476 = vmatprep.subr.bf16.mxu0 %v4475_v62 }
 0xfad   : > { %v3396_v54 = vsel %vm897_vm3, %v4655_v52, %v4664_v13  ;;  %v3394_v37 = vsel %vm897_vm3, %v4654_v53, %v4639_v43  ;;  %4478 = vmatpush1.bf16.msra.mxu0 %v4477_v46  ;;  %v3397_v9 = vsel %vm897_vm3, %v4664_v13, %v4665_v49 }
 0xfae   : > { %v4481_v10 = vpack.c.bf16 %v3396_v54, %v3394_v37  ;;  %v4668_v55 = vpop.permute.xlu0 %4667  ;;  %v4673_v56 = vpop.permute.xlu1 %4672  ;;  %v4479_v57 = vpack.c.bf16 %v3397_v9, %v3395_v50 }
 0xfaf   : > { %v4669_v58 = vunpack.i.l.bf16 %v4668_v55  ;;  %v4670_v27 = vunpack.i.h.bf16 %v4668_v55  ;;  %v4675_v1 = vunpack.i.h.bf16 %v4673_v56  ;;  %v4674_v3 = vunpack.i.l.bf16 %v4673_v56 }
 0xfb0   : > { %4480 = vmatprep.subr.bf16.mxu0 %v4479_v57 }
 0xfb1   : > { %4482 = vmatpush1.bf16.msra.mxu0 %v4481_v10  ;;  %v3478_v6 = vsel %vm882_vm4, %v4669_v58, %v4659_v21  ;;  %v3539_v25 = vsel %vm843_vm1, %v4674_v3, %v4675_v1 }
 0xfb2   : > { %v4688_v0 = vpop.permute.xlu0 %4687  ;;  %v4678_v26 = vpop.permute.xlu1 %4677  ;;  %4484 = vmatprep.subr.bf16.mxu0 %v4483_v30 }
 0xfb3   : > { %v4680_v59 = vunpack.i.h.bf16 %v4678_v26  ;;  %v4679_v60 = vunpack.i.l.bf16 %v4678_v26  ;;  %v4690_v24 = vunpack.i.h.bf16 %v4688_v0  ;;  %v4689_v61 = vunpack.i.l.bf16 %v4688_v0 }
 0xfb5   : > { %v3480_v8 = vsel %vm882_vm4, %v4670_v27, %v4679_v60  ;;  %4486 = vmatpush1.bf16.msra.mxu0 %v4485_v32  ;;  %v3481_v14 = vsel %vm882_vm4, %v4679_v60, %v4680_v59  ;;  %v3599_v38 = vsel %vm804_vm2, %v4689_v61, %v4690_v24 }
 0xfb6   : > { %v4489_v15 = vpack.c.bf16 %v3480_v8, %v3478_v6  ;;  %v4693_v29 = vpop.permute.xlu0 %4692  ;;  %v4683_v5 = vpop.permute.xlu1 %4682  ;;  %v4487_v30 = vpack.c.bf16 %v3481_v14, %v3479_v12 }
 0xfb7   : > { %v4695_v16 = vunpack.i.h.bf16 %v4693_v29  ;;  %v4694_v19 = vunpack.i.l.bf16 %v4693_v29  ;;  %v4685_v22 = vunpack.i.h.bf16 %v4683_v5  ;;  %v4684_v23 = vunpack.i.l.bf16 %v4683_v5 }
 0xfb8   : > { %4488 = vmatprep.subr.bf16.mxu0 %v4487_v30 }
 0xfb9   : > { %v3540_v4 = vsel %vm843_vm1, %v4685_v22, %v4694_v19  ;;  %v3538_v2 = vsel %vm843_vm1, %v4684_v23, %v4674_v3  ;;  %4490 = vmatpush1.bf16.msra.mxu0 %v4489_v15  ;;  %v3541_v32 = vsel %vm843_vm1, %v4694_v19, %v4695_v16 }
 0xfba   : > { %v4493_v28 = vpack.c.bf16 %v3540_v4, %v3538_v2  ;;  %v4698_v17 = vpop.permute.xlu0 %4697  ;;  %v4703_v63 = vpop.permute.xlu1 %4702  ;;  %v4491_v18 = vpack.c.bf16 %v3541_v32, %v3539_v25 }
 0xfbb   : > { %v4700_v31 = vunpack.i.h.bf16 %v4698_v17  ;;  %v4699_v33 = vunpack.i.l.bf16 %v4698_v17  ;;  %v4705_v34 = vunpack.i.h.bf16 %v4703_v63  ;;  %v4704_v35 = vunpack.i.l.bf16 %v4703_v63 }
 0xfbc   : > { %4492 = vmatprep.subr.bf16.mxu0 %v4491_v18 }
 0xfbd   : > { %v3598_v36 = vsel %vm804_vm2, %v4699_v33, %v4689_v61  ;;  %v3600_v7 = vsel %vm804_vm2, %v4700_v31, %v4704_v35  ;;  %4494 = vmatpush1.bf16.msra.mxu0 %v4493_v28  ;;  %v3601_v11 = vsel %vm804_vm2, %v4704_v35, %v4705_v34 }
 0xfbe   : > { %v4497_v39 = vpack.c.bf16 %v3600_v7, %v3598_v36  ;;  %v4713_v40 = vpop.permute.xlu0 %4712  ;;  %v4708_v41 = vpop.permute.xlu1 %4707  ;;  %v4495_v42 = vpack.c.bf16 %v3601_v11, %v3599_v38 }
 0xfbf   : > { %v4715_v43 = vunpack.i.h.bf16 %v4713_v40  ;;  %v4714_v44 = vunpack.i.l.bf16 %v4713_v40  ;;  %v4710_v45 = vunpack.i.h.bf16 %v4708_v41  ;;  %v4709_v46 = vunpack.i.l.bf16 %v4708_v41 }
 0xfc0   : > { %4496 = vmatprep.subr.bf16.mxu0 %v4495_v42 }
 0xfc1   : > { %4498 = vmatpush1.bf16.msra.mxu0 %v4497_v39  ;;  %v3659_v47 = vsel %vm765_vm0, %v4709_v46, %v4710_v45  ;;  %v3661_v48 = vsel %vm765_vm0, %v4714_v44, %v4715_v43 }
 0xfc2   : > { %v4718_v62 = vpop.permute.xlu1 %4717  ;;  %v4499_v49 = vpack.c.bf16 %v3661_v48, %v3659_v47 }
 0xfc3   : > { %v4720_v13 = vunpack.i.h.bf16 %v4718_v62  ;;  %v4719_v52 = vunpack.i.l.bf16 %v4718_v62 }
 0xfc4   : > { %4500 = vmatprep.subr.bf16.mxu0 %v4499_v49 }
 0xfc5   : > { %v3660_v53 = vsel %vm765_vm0, %v4720_v13, %v4714_v44  ;;  %v3658_v54 = vsel %vm765_vm0, %v4719_v52, %v4709_v46 }
 0xfc6   : > { %v4501_v37 = vpack.c.bf16 %v3660_v53, %v3658_v54 }
 0xfc8   : > { %4502 = vmatpush1.bf16.msra.mxu0 %v4501_v37 }
 0xfcb   : > { %3782 = vmatmul.mubr.f32.vlgmr.msra.gmra.mrb[14].mxu0 %v5996_v51 }
 0xfcf   : > { %v3711_v50 = vpop.permute.xlu0 %3710 }
0x109e   : > { %v3783_v9 = vpop.f32.mrb[14].mxu0 }
0x109f   : > { %v3784_v10 = vadd.f32 %v3783_v9, %v3711_v50  ;;  %v3785_v55 = vpop.f32.mrb[15].mxu0 }
0x10a0   : > { %v3786_v56 = vadd.f32 %v3785_v55, %v3711_v50 }
0x10a1   : > { %v3788_v57 = vsub.f32 0.0, %v3784_v10 }
0x10a2   : > { %v3789_v20 = vsub.f32 0.0, %v3786_v56 }
0x10a3   : > { %v3790_v21 = vmul.f32 1.442695, %v3788_v57 }
0x10a4   : > { %v3792_v58 = vmul.f32 1.442695, %v3789_v20 }
0x10a5   : > { %4723 = vpow2.f32 %v3790_v21 }
0x10a6   : > { %4725 = vpow2.f32 %v3792_v58 }
0x10af   : > { %v4724_v0 = vpop.eup %4723 }
0x10b0   : > { %v4726_v26 = vpop.eup %4725  ;;  %v3794_v27 = vadd.f32 1.0, %v4724_v0 }
0x10b1   : > { %v3795_v59 = vadd.f32 1.0, %v4726_v26 }
0x10b2   : > { %4727 = vrcp.f32 %v3794_v27 }
0x10b3   : > { %4729 = vrcp.f32 %v3795_v59 }
0x10bc   : > { %v4728_v60 = vpop.eup %4727 }
0x10bd   : > { %v4730_v51 = vpop.eup %4729 }
0x10be   : > { %v3802_v1 = vcombine.low %v4728_v60, %v4730_v51 }
0x10c0   : > { %3804 = vst [vmem:[%s725_s26] sm:$0x77] %v3802_v1 }
0x10c1 PF: > { %s6157_s30 = sld [smem:[#allocation12_spill]] }
0x10c7   : > { %s34_s4 = sadd.s32 1, %s6157_s30  }
0x10c8   : > { %p31_p5 = scmp.ge.s32.totalorder %s34_s4, 4  }
0x10ca   :  { %33 = sbr.rel (!%p31_p5) target bundleno = 11 (0xb), region = 166 }

</bundles_post_ra>
